<compile_context>
chip_gen: v7x
topology: tpu7x:2x2x1
jax: 0.10.0
libtpu: 0.0.40
codegen_flags: <defaults>
</compile_context>

<pallas_src>
import jax
import jax.numpy as jnp
from jax.experimental import pallas as pl
from jax.experimental.pallas import tpu as pltpu

# ---------------- configuration (small synthetic shapes) ----------------
N, C, H, W = 2, 3, 16, 16
P = 4                           # patch size
L = (H // P) * (W // P)         # 16 patches
DP = P * P * C                  # 48 = patch pixel dim
DE = 32                         # encoder embed dim
DD = 32                         # decoder embed dim
HS = 32                         # score-net hidden dim
MASK_RATIO = 0.75
LV = int(L * (1 - MASK_RATIO))  # 4 visible patches
NV = LV + 1                     # variants: 0 = anchor (no mask), 1..LV = single drops
T = L + 1                       # decoder tokens incl. cls (cls kept in the LAST slot)

_ATTN_SCALE = 1.0 / (DD ** 0.5)
_SENTINEL = 2 * N * L           # id value that matches no patch / token index

# ---- packed-parameter row offsets (every sub-weight starts at a x8-aligned row) ----
OFF_S_W1 = 0                    # (DP, HS)  score-net dense-1
OFF_E_W = OFF_S_W1 + DP         # (DP, DE)  encoder patch embed           -> 48
OFF_D_W = OFF_E_W + DP          # (DE, DD)  decoder embed                 -> 96
OFF_WQK = OFF_D_W + DE          # (DD, DD)  wq @ wk.T (scale folded in)   -> 128
OFF_WV = OFF_WQK + DD           # (DD, DD)  value projection              -> 160
OFF_ENCPOS = OFF_WV + DD        # (L,  DE)  encoder pos embed             -> 192
OFF_DECPOS = OFF_ENCPOS + L     # (T,  DD)  decoder pos embed, cls LAST   -> 208
OFF_VECS = OFF_DECPOS + 24      # (8,  DD)  bias / vector rows            -> 232
W32_ROWS = OFF_VECS + 8         # 240 rows x 32 lanes
VR_SB1, VR_SW2, VR_EB, VR_DB, VR_MTOK, VR_XCLS = 0, 1, 2, 3, 4, 5

OFF_WP = 0                      # (DD, DP)  decoder prediction head
OFF_BP = DD                     # (1,  DP)
W48_ROWS = 40                   # 40 rows x 48 lanes


# ---------------- the fused Pallas kernel ----------------
def _ltrp_fused_kernel(ids_ref, patches_ref, w32_ref, w48_ref, sb2_ref, loss_ref):
    f32, bf16 = jnp.float32, jnp.bfloat16

    ids = ids_ref[...]                                          # (N, NV) int32, col 0 = sentinel
    patches = patches_ref[...]                                  # (N, L, DP) f32

    # ---- packed parameters: static, sublane-aligned ref views ----
    s_w1 = w32_ref[OFF_S_W1:OFF_S_W1 + DP, :].astype(bf16)      # (DP, HS)
    e_w = w32_ref[OFF_E_W:OFF_E_W + DP, :].astype(bf16)         # (DP, DE)
    d_w = w32_ref[OFF_D_W:OFF_D_W + DE, :].astype(bf16)         # (DE, DD)
    wqk = w32_ref[OFF_WQK:OFF_WQK + DD, :].astype(bf16)         # (DD, DD), scale pre-folded
    wv = w32_ref[OFF_WV:OFF_WV + DD, :].astype(bf16)            # (DD, DD)
    enc_pos = w32_ref[OFF_ENCPOS:OFF_ENCPOS + L, :]             # (L, DE)  f32
    dec_pos = w32_ref[OFF_DECPOS:OFF_DECPOS + T, :]             # (T, DD)  f32, cls row last
    vecs = w32_ref[OFF_VECS:OFF_VECS + 8, :]                    # (8, 32)  f32
    s_b1 = vecs[VR_SB1:VR_SB1 + 1]                              # (1, HS)
    s_w2 = vecs[VR_SW2:VR_SW2 + 1]                              # (1, HS)
    e_b = vecs[VR_EB:VR_EB + 1]                                 # (1, DE)
    d_b = vecs[VR_DB:VR_DB + 1]                                 # (1, DD)
    mask_tok = vecs[VR_MTOK:VR_MTOK + 1]                        # (1, DD)
    xd_cls = vecs[VR_XCLS:VR_XCLS + 1]                          # (1, DD) = cls @ d_w + d_b
    wp = w48_ref[OFF_WP:OFF_WP + DD, :].astype(bf16)            # (DD, DP)
    bp = w48_ref[OFF_BP:OFF_BP + 1, :]                          # (1, DP)
    s_b2 = sb2_ref[0]                                           # scalar (SMEM)

    # ---- masking one-hots from ids (iota + compare; variant-0 rows are all-zero) ----
    sel = (ids[:, :, None] ==
           jax.lax.broadcasted_iota(jnp.int32, (N, NV, L), 2)).astype(f32)    # (N,NV,L)
    hit_k = (ids[:, :, None] ==
             jax.lax.broadcasted_iota(jnp.int32, (N, NV, T), 2)).astype(f32)  # (N,NV,T)
    hit_t = (ids[:, None, :] ==
             jax.lax.broadcasted_iota(jnp.int32, (N, T, NV), 1)).astype(f32)  # (N,T,NV)
    visible = jnp.sum(sel, axis=1)                              # (N, L)  1 = visible patch
    maskf = 1.0 - visible                                       # (N, L)  1 = masked patch
    vis_tok = jnp.sum(hit_t, axis=-1)                           # (N, T)  1 = visible token slot
    is_cls = (jax.lax.broadcasted_iota(jnp.int32, (N, T), 1) == L).astype(f32)

    # ---- gather kept patches + their pos embeds (variant 0 gathers nothing -> zeros) ----
    sel_b = sel.astype(bf16)
    x_kept = jnp.einsum('nil,nld->nid', sel_b, patches.astype(bf16),
                        preferred_element_type=f32)             # (N, NV, DP)
    pos_kept = jnp.einsum('nil,le->nie', sel_b, enc_pos.astype(bf16),
                          preferred_element_type=f32)           # (N, NV, DE)

    # ---- score_net only on the kept patches (dense + gelu + lane-reduction head) ----
    h = jax.nn.gelu(jnp.einsum('nid,dh->nih', x_kept.astype(bf16), s_w1,
                               preferred_element_type=f32) + s_b1[None])
    y_pred = jnp.sum(h * s_w2[None], axis=-1) + s_b2            # (N, NV); col 0 is the dummy

    # ---- mim encoder (patch embed + pos) on the kept patches ----
    tok = jax.nn.gelu(jnp.einsum('nid,de->nie', x_kept.astype(bf16), e_w,
                                 preferred_element_type=f32) + e_b[None]) + pos_kept
    xd_vis = jnp.einsum('nie,ef->nif', tok.astype(bf16), d_w,
                        preferred_element_type=f32) + d_b[None]           # (N, NV, DD)

    # ---- decoder tokens: patch slots 0..L-1 in restored order, cls at slot L ----
    patch_part = jnp.einsum('nti,nid->ntd', hit_t.astype(bf16), xd_vis.astype(bf16),
                            preferred_element_type=f32)                   # (N, T, DD)
    x_dec = (dec_pos[None]
             + patch_part
             + is_cls[:, :, None] * xd_cls[None]
             + (1.0 - is_cls - vis_tok)[:, :, None] * mask_tok[None])     # (N, T, DD)

    # ---- shared attention precompute (q only for patch rows; Wq Wk^T pre-composed) ----
    xb = x_dec.astype(bf16)                                     # keys / values source
    xb_p = x_dec[:, :L, :].astype(bf16)                         # (N, L, DD) offset-0 view
    q = jnp.einsum('nld,df->nlf', xb_p, wqk, preferred_element_type=f32)
    s_qk = jnp.einsum('nqe,nke->nqk', q.astype(bf16), xb,
                      preferred_element_type=f32)               # (N, L, T)
    v = jnp.einsum('ntd,df->ntf', xb, wv, preferred_element_type=f32)     # (N, T, DD)

    # ---- anchor + all LV drops in ONE 4D masked softmax (variant 0 = no mask) ----
    logits = s_qk[:, None, :, :] + hit_k[:, :, None, :] * f32(-1e9)       # (N, NV, L, T) f32
    m = jnp.max(logits, axis=-1, keepdims=True)
    e = jnp.exp(logits - m)
    a = e * pl.reciprocal(jnp.sum(e, axis=-1, keepdims=True), approx=True)
    # rank-3 attend with M = NV*L per batch against the SHARED (un-replicated) v
    ctx = jnp.einsum('nqk,nke->nqe', a.reshape(N, NV * L, T).astype(bf16),
                     v.astype(bf16), preferred_element_type=f32)          # (N, NV*L, DD)

    # ---- prediction head: one (N*NV*L, DD) slab matmul + shared residual projection ----
    attn_proj = jnp.dot(ctx.reshape(N * NV * L, DD).astype(bf16), wp,
                        preferred_element_type=f32)                        # (160, DP)
    base_proj = jnp.dot(x_dec[:, :L, :].reshape(N * L, DD).astype(bf16), wp,
                        preferred_element_type=f32) + bp                   # (32, DP)
    pred = base_proj.reshape(N, 1, L, DP) + attn_proj.reshape(N, NV, L, DP)

    # ---- img_metric: mean masked-patch MSE of each drop vs the anchor (variant 0) ----
    diff = pred[:, 1:] - pred[:, 0:1]                           # (N, LV, L, DP)
    err = jnp.mean(diff * diff, axis=-1)                        # (N, LV, L)
    # every sample masks exactly L-LV patches -> constant normalizer
    y_true = jnp.sum(err * maskf[:, None, :], axis=-1) * (1.0 / (L - LV))  # (N, LV)

    # ---- criterion epilogue ----
    # TODO(synk): the original criterion is an external order-sensitive ranking loss;
    # an elementwise MSE stands in, so the shared ids_keep-order pairing of
    # y_pred / y_true is equivalent here but must be matched exactly for the real loss.
    d = y_pred[:, 1:] - y_true
    loss_ref[...] = jnp.mean(d * d).reshape(1, 1)


# ---------------- glue (patchify, masking indices, parameter packing) ----------------
def patchify(imgs):
    n, c, h, w = imgs.shape
    hp, wp_ = h // P, w // P
    x = imgs.reshape(n, c, hp, P, wp_, P)
    x = jnp.einsum('nchpwq->nhwpqc', x)
    return x.reshape(n, hp * wp_, P * P * c)


def init_params(key):
    ks = jax.random.split(key, 12)

    def nrm(k, shape):
        return 0.02 * jax.random.normal(k, shape, jnp.float32)

    return dict(
        # score_net
        s_w1=nrm(ks[0], (DP, HS)), s_b1=jnp.zeros((HS,), jnp.float32),
        s_w2=nrm(ks[1], (HS,)), s_b2=jnp.zeros((1,), jnp.float32),
        # mim encoder
        e_w=nrm(ks[2], (DP, DE)), e_b=jnp.zeros((DE,), jnp.float32),
        cls=nrm(ks[3], (DE,)), enc_pos=nrm(ks[4], (L, DE)),
        # mim decoder
        d_w=nrm(ks[5], (DE, DD)), d_b=jnp.zeros((DD,), jnp.float32),
        mask_token=nrm(ks[6], (DD,)), dec_pos=nrm(ks[7], (T, DD)),
        wq=nrm(ks[8], (DD, DD)), wk=nrm(ks[9], (DD, DD)), wv=nrm(ks[10], (DD, DD)),
        wp=nrm(ks[11], (DD, DP)), bp=jnp.zeros((DP,), jnp.float32),
    )


def pack_params(p):
    """Static parameter preprocessing: pack everything into two padded VMEM buffers
    (+ one SMEM scalar). wq@wk.T (with the attention scale) and the cls decoder embed
    are constant-folded here; dec_pos is rolled so the cls slot is LAST."""
    wqk = (p['wq'] @ p['wk'].T) * _ATTN_SCALE
    xd_cls = p['cls'].reshape(1, DE) @ p['d_w'] + p['d_b'].reshape(1, DD)
    dec_pos_cls_last = jnp.concatenate([p['dec_pos'][1:], p['dec_pos'][:1]], axis=0)
    vec_rows = jnp.stack(
        [p['s_b1'], p['s_w2'], p['e_b'], p['d_b'], p['mask_token'],
         xd_cls.reshape(DD), jnp.zeros((DD,), jnp.float32),
         jnp.zeros((DD,), jnp.float32)], axis=0)

    w32 = jnp.zeros((W32_ROWS, 32), jnp.float32)
    w32 = w32.at[OFF_S_W1:OFF_S_W1 + DP].set(p['s_w1'])
    w32 = w32.at[OFF_E_W:OFF_E_W + DP].set(p['e_w'])
    w32 = w32.at[OFF_D_W:OFF_D_W + DE].set(p['d_w'])
    w32 = w32.at[OFF_WQK:OFF_WQK + DD].set(wqk)
    w32 = w32.at[OFF_WV:OFF_WV + DD].set(p['wv'])
    w32 = w32.at[OFF_ENCPOS:OFF_ENCPOS + L].set(p['enc_pos'])
    w32 = w32.at[OFF_DECPOS:OFF_DECPOS + T].set(dec_pos_cls_last)
    w32 = w32.at[OFF_VECS:OFF_VECS + 8].set(vec_rows)

    w48 = jnp.zeros((W48_ROWS, DP), jnp.float32)
    w48 = w48.at[OFF_WP:OFF_WP + DD].set(p['wp'])
    w48 = w48.at[OFF_BP:OFF_BP + 1].set(p['bp'].reshape(1, DP))
    return w32, w48, p['s_b2'].reshape(1)


def ltrp_forward(imgs, params, noise_key, mask_ratio=MASK_RATIO):
    patches = patchify(imgs)                                     # (N, L, DP)

    # MAE random-masking indices (argsort has no clean Pallas equivalent; tiny XLA op).
    noise = jax.random.uniform(noise_key, (N, L))
    ids_shuffle = jnp.argsort(noise, axis=1)
    ids_keep = ids_shuffle[:, :LV].astype(jnp.int32)             # (N, LV)
    # variant 0 = anchor: sentinel id -> no token masked / nothing gathered.
    ids_ext = jnp.concatenate(
        [jnp.full((N, 1), _SENTINEL, jnp.int32), ids_keep], axis=1)        # (N, NV)

    w32, w48, s_b2 = pack_params(params)

    loss = pl.pallas_call(
        _ltrp_fused_kernel,
        out_shape=jax.ShapeDtypeStruct((1, 1), jnp.float32),
        in_specs=[
            pl.BlockSpec(memory_space=pltpu.MemorySpace.VMEM),   # ids_ext
            pl.BlockSpec(memory_space=pltpu.MemorySpace.VMEM),   # patches
            pl.BlockSpec(memory_space=pltpu.MemorySpace.VMEM),   # packed 32-lane params
            pl.BlockSpec(memory_space=pltpu.MemorySpace.VMEM),   # packed 48-lane params
            pl.BlockSpec(memory_space=pltpu.MemorySpace.SMEM),   # score-net scalar bias
        ],
        out_specs=pl.BlockSpec(memory_space=pltpu.MemorySpace.VMEM),
    )(ids_ext, patches, w32, w48, s_b2)
    return loss[0, 0]


if __name__ == "__main__":
    key = jax.random.PRNGKey(0)
    k_img, k_param, k_noise = jax.random.split(key, 3)
    imgs = jax.random.normal(k_img, (N, C, H, W), jnp.float32)   # NCHW, like PyTorch
    params = init_params(k_param)

    loss = jax.jit(lambda im: ltrp_forward(im, params, k_noise))(imgs)
    loss = jax.block_until_ready(loss)
    assert bool(jnp.isfinite(loss))
    print("KERNEL_OK")
</pallas_src>

<mosaic_0001>
module attributes {stable_mosaic.version = 11 : i64} {
  func.func @_ltrp_fused_kernel(%arg0: memref<2x5xi32, #tpu.memory_space<vmem>>, %arg1: memref<2x16x48xf32, #tpu.memory_space<vmem>>, %arg2: memref<240x32xf32, #tpu.memory_space<vmem>>, %arg3: memref<40x48xf32, #tpu.memory_space<vmem>>, %arg4: memref<1xf32, #tpu.memory_space<smem>>, %arg5: memref<1x1xf32, #tpu.memory_space<vmem>>) attributes {dimension_semantics = [], scalar_prefetch = 0 : i64, scratch_operands = 0 : i64, tpu.core_type = #tpu.core_type<tc>} {
    %c0 = arith.constant 0 : index
    %c0_0 = arith.constant 0 : index
    %0 = vector.load %arg0[%c0, %c0_0] : memref<2x5xi32, #tpu.memory_space<vmem>>, vector<2x5xi32>
    %c0_1 = arith.constant 0 : index
    %c0_2 = arith.constant 0 : index
    %c0_3 = arith.constant 0 : index
    %1 = vector.load %arg1[%c0_1, %c0_2, %c0_3] : memref<2x16x48xf32, #tpu.memory_space<vmem>>, vector<2x16x48xf32>
    %c0_4 = arith.constant 0 : index
    %c0_5 = arith.constant 0 : index
    %2 = vector.load %arg2[%c0_4, %c0_5] : memref<240x32xf32, #tpu.memory_space<vmem>>, vector<48x32xf32>
    %3 = arith.truncf %2 : vector<48x32xf32> to vector<48x32xbf16>
    %c48 = arith.constant 48 : index
    %c0_6 = arith.constant 0 : index
    %4 = vector.load %arg2[%c48, %c0_6] : memref<240x32xf32, #tpu.memory_space<vmem>>, vector<48x32xf32>
    %5 = arith.truncf %4 : vector<48x32xf32> to vector<48x32xbf16>
    %c96 = arith.constant 96 : index
    %c0_7 = arith.constant 0 : index
    %6 = vector.load %arg2[%c96, %c0_7] : memref<240x32xf32, #tpu.memory_space<vmem>>, vector<32x32xf32>
    %7 = arith.truncf %6 : vector<32x32xf32> to vector<32x32xbf16>
    %c128 = arith.constant 128 : index
    %c0_8 = arith.constant 0 : index
    %8 = vector.load %arg2[%c128, %c0_8] : memref<240x32xf32, #tpu.memory_space<vmem>>, vector<32x32xf32>
    %9 = arith.truncf %8 : vector<32x32xf32> to vector<32x32xbf16>
    %c160 = arith.constant 160 : index
    %c0_9 = arith.constant 0 : index
    %10 = vector.load %arg2[%c160, %c0_9] : memref<240x32xf32, #tpu.memory_space<vmem>>, vector<32x32xf32>
    %11 = arith.truncf %10 : vector<32x32xf32> to vector<32x32xbf16>
    %c192 = arith.constant 192 : index
    %c0_10 = arith.constant 0 : index
    %12 = vector.load %arg2[%c192, %c0_10] : memref<240x32xf32, #tpu.memory_space<vmem>>, vector<16x32xf32>
    %c208 = arith.constant 208 : index
    %c0_11 = arith.constant 0 : index
    %13 = vector.load %arg2[%c208, %c0_11] : memref<240x32xf32, #tpu.memory_space<vmem>>, vector<17x32xf32>
    %c232 = arith.constant 232 : index
    %c0_12 = arith.constant 0 : index
    %14 = vector.load %arg2[%c232, %c0_12] : memref<240x32xf32, #tpu.memory_space<vmem>>, vector<8x32xf32>
    %15 = vector.extract_strided_slice %14 {offsets = [0, 0], sizes = [1, 32], strides = [1, 1]} : vector<8x32xf32> to vector<1x32xf32>
    %16 = vector.extract_strided_slice %14 {offsets = [1, 0], sizes = [1, 32], strides = [1, 1]} : vector<8x32xf32> to vector<1x32xf32>
    %17 = vector.extract_strided_slice %14 {offsets = [2, 0], sizes = [1, 32], strides = [1, 1]} : vector<8x32xf32> to vector<1x32xf32>
    %18 = vector.extract_strided_slice %14 {offsets = [3, 0], sizes = [1, 32], strides = [1, 1]} : vector<8x32xf32> to vector<1x32xf32>
    %19 = vector.extract_strided_slice %14 {offsets = [4, 0], sizes = [1, 32], strides = [1, 1]} : vector<8x32xf32> to vector<1x32xf32>
    %20 = vector.extract_strided_slice %14 {offsets = [5, 0], sizes = [1, 32], strides = [1, 1]} : vector<8x32xf32> to vector<1x32xf32>
    %c0_13 = arith.constant 0 : index
    %c0_14 = arith.constant 0 : index
    %21 = vector.load %arg3[%c0_13, %c0_14] : memref<40x48xf32, #tpu.memory_space<vmem>>, vector<32x48xf32>
    %22 = arith.truncf %21 : vector<32x48xf32> to vector<32x48xbf16>
    %c32 = arith.constant 32 : index
    %c0_15 = arith.constant 0 : index
    %23 = vector.load %arg3[%c32, %c0_15] : memref<40x48xf32, #tpu.memory_space<vmem>>, vector<1x48xf32>
    %c0_16 = arith.constant 0 : index
    %24 = memref.load %arg4[%c0_16] : memref<1xf32, #tpu.memory_space<smem>>
    %25 = vector.shape_cast %0 : vector<2x5xi32> to vector<2x5x1xi32>
    %26 = tpu.iota {dimensions = array<i32: 2>} : vector<2x5x16xi32>
    %27 = vector.broadcast %25 : vector<2x5x1xi32> to vector<2x5x16xi32>
    %28 = arith.cmpi eq, %27, %26 : vector<2x5x16xi32>
    %29 = arith.extui %28 : vector<2x5x16xi1> to vector<2x5x16xi32>
    %30 = arith.sitofp %29 : vector<2x5x16xi32> to vector<2x5x16xf32>
    %31 = vector.shape_cast %0 : vector<2x5xi32> to vector<2x5x1xi32>
    %32 = tpu.iota {dimensions = array<i32: 2>} : vector<2x5x17xi32>
    %33 = vector.broadcast %31 : vector<2x5x1xi32> to vector<2x5x17xi32>
    %34 = arith.cmpi eq, %33, %32 : vector<2x5x17xi32>
    %35 = arith.extui %34 : vector<2x5x17xi1> to vector<2x5x17xi32>
    %36 = arith.sitofp %35 : vector<2x5x17xi32> to vector<2x5x17xf32>
    %37 = vector.shape_cast %0 : vector<2x5xi32> to vector<2x1x5xi32>
    %38 = tpu.iota {dimensions = array<i32: 1>} : vector<2x17x5xi32>
    %39 = vector.broadcast %37 : vector<2x1x5xi32> to vector<2x17x5xi32>
    %40 = arith.cmpi eq, %39, %38 : vector<2x17x5xi32>
    %41 = arith.extui %40 : vector<2x17x5xi1> to vector<2x17x5xi32>
    %42 = arith.sitofp %41 : vector<2x17x5xi32> to vector<2x17x5xf32>
    %cst = arith.constant dense<0.000000e+00> : vector<2x16xf32>
    %43 = vector.multi_reduction <add>, %30, %cst [1] : vector<2x5x16xf32> to vector<2x16xf32>
    %cst_17 = arith.constant 1.000000e+00 : f32
    %44 = vector.broadcast %cst_17 : f32 to vector<2x16xf32>
    %45 = arith.subf %44, %43 : vector<2x16xf32>
    %cst_18 = arith.constant dense<0.000000e+00> : vector<2x17xf32>
    %46 = vector.multi_reduction <add>, %42, %cst_18 [2] : vector<2x17x5xf32> to vector<2x17xf32>
    %47 = tpu.iota {dimensions = array<i32: 1>} : vector<2x17xi32>
    %c16_i32 = arith.constant 16 : i32
    %48 = vector.broadcast %c16_i32 : i32 to vector<2x17xi32>
    %49 = arith.cmpi eq, %47, %48 : vector<2x17xi32>
    %50 = arith.extui %49 : vector<2x17xi1> to vector<2x17xi32>
    %51 = arith.sitofp %50 : vector<2x17xi32> to vector<2x17xf32>
    %52 = arith.truncf %30 : vector<2x5x16xf32> to vector<2x5x16xbf16>
    %53 = arith.truncf %1 : vector<2x16x48xf32> to vector<2x16x48xbf16>
    "tpu.trace_start"() <{level = 10 : i32, message = "nil,nld->nid"}> : () -> ()
    %cst_19 = arith.constant dense<0.000000e+00> : vector<2x5x48xf32>
    %54 = tpu.matmul %52, %53, %cst_19 {dimension_numbers = #tpu.dot_dimension_numbers<[2], [1], [1], [2], [0, 0, 0, 1, 1, 2], [0], [0]>} : vector<2x5x16xbf16>, vector<2x16x48xbf16>, vector<2x5x48xf32> -> vector<2x5x48xf32>
    "tpu.trace_stop"() : () -> ()
    %55 = arith.truncf %12 : vector<16x32xf32> to vector<16x32xbf16>
    "tpu.trace_start"() <{level = 10 : i32, message = "nil,le->nie"}> : () -> ()
    %cst_20 = arith.constant dense<0.000000e+00> : vector<2x5x32xf32>
    %56 = tpu.matmul %52, %55, %cst_20 {dimension_numbers = #tpu.dot_dimension_numbers<[2], [0], [0, 1], [1], [0, 0, 0, 1, 1, 1], [], []>} : vector<2x5x16xbf16>, vector<16x32xbf16>, vector<2x5x32xf32> -> vector<2x5x32xf32>
    "tpu.trace_stop"() : () -> ()
    %57 = arith.truncf %54 : vector<2x5x48xf32> to vector<2x5x48xbf16>
    "tpu.trace_start"() <{level = 10 : i32, message = "nid,dh->nih"}> : () -> ()
    %cst_21 = arith.constant dense<0.000000e+00> : vector<2x5x32xf32>
    %58 = tpu.matmul %57, %3, %cst_21 {dimension_numbers = #tpu.dot_dimension_numbers<[2], [0], [0, 1], [1], [0, 0, 0, 1, 1, 1], [], []>} : vector<2x5x48xbf16>, vector<48x32xbf16>, vector<2x5x32xf32> -> vector<2x5x32xf32>
    "tpu.trace_stop"() : () -> ()
    %59 = vector.shape_cast %15 : vector<1x32xf32> to vector<1x1x32xf32>
    %60 = vector.broadcast %59 : vector<1x1x32xf32> to vector<2x5x32xf32>
    %61 = arith.addf %58, %60 : vector<2x5x32xf32>
    %62 = arith.mulf %61, %61 : vector<2x5x32xf32>
    %63 = arith.mulf %61, %62 : vector<2x5x32xf32>
    %cst_22 = arith.constant 4.471500e-02 : f32
    %64 = vector.broadcast %cst_22 : f32 to vector<2x5x32xf32>
    %65 = arith.mulf %64, %63 : vector<2x5x32xf32>
    %66 = arith.addf %61, %65 : vector<2x5x32xf32>
    %cst_23 = arith.constant 0.797884583 : f32
    %67 = vector.broadcast %cst_23 : f32 to vector<2x5x32xf32>
    %68 = arith.mulf %67, %66 : vector<2x5x32xf32>
    %69 = math.tanh %68 : vector<2x5x32xf32>
    %cst_24 = arith.constant 1.000000e+00 : f32
    %70 = vector.broadcast %cst_24 : f32 to vector<2x5x32xf32>
    %71 = arith.addf %70, %69 : vector<2x5x32xf32>
    %cst_25 = arith.constant 5.000000e-01 : f32
    %72 = vector.broadcast %cst_25 : f32 to vector<2x5x32xf32>
    %73 = arith.mulf %72, %71 : vector<2x5x32xf32>
    %74 = arith.mulf %61, %73 : vector<2x5x32xf32>
    %75 = vector.shape_cast %16 : vector<1x32xf32> to vector<1x1x32xf32>
    %76 = vector.broadcast %75 : vector<1x1x32xf32> to vector<2x5x32xf32>
    %77 = arith.mulf %74, %76 : vector<2x5x32xf32>
    %cst_26 = arith.constant dense<0.000000e+00> : vector<2x5xf32>
    %78 = vector.multi_reduction <add>, %77, %cst_26 [2] : vector<2x5x32xf32> to vector<2x5xf32>
    %79 = vector.broadcast %24 : f32 to vector<2x5xf32>
    %80 = arith.addf %78, %79 : vector<2x5xf32>
    %81 = arith.truncf %54 : vector<2x5x48xf32> to vector<2x5x48xbf16>
    "tpu.trace_start"() <{level = 10 : i32, message = "nid,de->nie"}> : () -> ()
    %cst_27 = arith.constant dense<0.000000e+00> : vector<2x5x32xf32>
    %82 = tpu.matmul %81, %5, %cst_27 {dimension_numbers = #tpu.dot_dimension_numbers<[2], [0], [0, 1], [1], [0, 0, 0, 1, 1, 1], [], []>} : vector<2x5x48xbf16>, vector<48x32xbf16>, vector<2x5x32xf32> -> vector<2x5x32xf32>
    "tpu.trace_stop"() : () -> ()
    %83 = vector.shape_cast %17 : vector<1x32xf32> to vector<1x1x32xf32>
    %84 = vector.broadcast %83 : vector<1x1x32xf32> to vector<2x5x32xf32>
    %85 = arith.addf %82, %84 : vector<2x5x32xf32>
    %86 = arith.mulf %85, %85 : vector<2x5x32xf32>
    %87 = arith.mulf %85, %86 : vector<2x5x32xf32>
    %cst_28 = arith.constant 4.471500e-02 : f32
    %88 = vector.broadcast %cst_28 : f32 to vector<2x5x32xf32>
    %89 = arith.mulf %88, %87 : vector<2x5x32xf32>
    %90 = arith.addf %85, %89 : vector<2x5x32xf32>
    %cst_29 = arith.constant 0.797884583 : f32
    %91 = vector.broadcast %cst_29 : f32 to vector<2x5x32xf32>
    %92 = arith.mulf %91, %90 : vector<2x5x32xf32>
    %93 = math.tanh %92 : vector<2x5x32xf32>
    %cst_30 = arith.constant 1.000000e+00 : f32
    %94 = vector.broadcast %cst_30 : f32 to vector<2x5x32xf32>
    %95 = arith.addf %94, %93 : vector<2x5x32xf32>
    %cst_31 = arith.constant 5.000000e-01 : f32
    %96 = vector.broadcast %cst_31 : f32 to vector<2x5x32xf32>
    %97 = arith.mulf %96, %95 : vector<2x5x32xf32>
    %98 = arith.mulf %85, %97 : vector<2x5x32xf32>
    %99 = arith.addf %98, %56 : vector<2x5x32xf32>
    %100 = arith.truncf %99 : vector<2x5x32xf32> to vector<2x5x32xbf16>
    "tpu.trace_start"() <{level = 10 : i32, message = "nie,ef->nif"}> : () -> ()
    %cst_32 = arith.constant dense<0.000000e+00> : vector<2x5x32xf32>
    %101 = tpu.matmul %100, %7, %cst_32 {dimension_numbers = #tpu.dot_dimension_numbers<[2], [0], [0, 1], [1], [0, 0, 0, 1, 1, 1], [], []>} : vector<2x5x32xbf16>, vector<32x32xbf16>, vector<2x5x32xf32> -> vector<2x5x32xf32>
    "tpu.trace_stop"() : () -> ()
    %102 = vector.shape_cast %18 : vector<1x32xf32> to vector<1x1x32xf32>
    %103 = vector.broadcast %102 : vector<1x1x32xf32> to vector<2x5x32xf32>
    %104 = arith.addf %101, %103 : vector<2x5x32xf32>
    %105 = arith.truncf %42 : vector<2x17x5xf32> to vector<2x17x5xbf16>
    %106 = arith.truncf %104 : vector<2x5x32xf32> to vector<2x5x32xbf16>
    "tpu.trace_start"() <{level = 10 : i32, message = "nti,nid->ntd"}> : () -> ()
    %cst_33 = arith.constant dense<0.000000e+00> : vector<2x17x32xf32>
    %107 = tpu.matmul %105, %106, %cst_33 {dimension_numbers = #tpu.dot_dimension_numbers<[2], [1], [1], [2], [0, 0, 0, 1, 1, 2], [0], [0]>} : vector<2x17x5xbf16>, vector<2x5x32xbf16>, vector<2x17x32xf32> -> vector<2x17x32xf32>
    "tpu.trace_stop"() : () -> ()
    %108 = vector.shape_cast %13 : vector<17x32xf32> to vector<1x17x32xf32>
    %109 = vector.broadcast %108 : vector<1x17x32xf32> to vector<2x17x32xf32>
    %110 = arith.addf %109, %107 : vector<2x17x32xf32>
    %111 = vector.shape_cast %51 : vector<2x17xf32> to vector<2x17x1xf32>
    %112 = vector.shape_cast %20 : vector<1x32xf32> to vector<1x1x32xf32>
    %113 = vector.broadcast %111 : vector<2x17x1xf32> to vector<2x17x32xf32>
    %114 = vector.broadcast %112 : vector<1x1x32xf32> to vector<2x17x32xf32>
    %115 = arith.mulf %113, %114 : vector<2x17x32xf32>
    %116 = arith.addf %110, %115 : vector<2x17x32xf32>
    %cst_34 = arith.constant 1.000000e+00 : f32
    %117 = vector.broadcast %cst_34 : f32 to vector<2x17xf32>
    %118 = arith.subf %117, %51 : vector<2x17xf32>
    %119 = arith.subf %118, %46 : vector<2x17xf32>
    %120 = vector.shape_cast %119 : vector<2x17xf32> to vector<2x17x1xf32>
    %121 = vector.shape_cast %19 : vector<1x32xf32> to vector<1x1x32xf32>
    %122 = vector.broadcast %120 : vector<2x17x1xf32> to vector<2x17x32xf32>
    %123 = vector.broadcast %121 : vector<1x1x32xf32> to vector<2x17x32xf32>
    %124 = arith.mulf %122, %123 : vector<2x17x32xf32>
    %125 = arith.addf %116, %124 : vector<2x17x32xf32>
    %126 = arith.truncf %125 : vector<2x17x32xf32> to vector<2x17x32xbf16>
    %127 = vector.extract_strided_slice %125 {offsets = [0, 0, 0], sizes = [2, 16, 32], strides = [1, 1, 1]} : vector<2x17x32xf32> to vector<2x16x32xf32>
    %128 = arith.truncf %127 : vector<2x16x32xf32> to vector<2x16x32xbf16>
    "tpu.trace_start"() <{level = 10 : i32, message = "nld,df->nlf"}> : () -> ()
    %cst_35 = arith.constant dense<0.000000e+00> : vector<2x16x32xf32>
    %129 = tpu.matmul %128, %9, %cst_35 {dimension_numbers = #tpu.dot_dimension_numbers<[2], [0], [0, 1], [1], [0, 0, 0, 1, 1, 1], [], []>} : vector<2x16x32xbf16>, vector<32x32xbf16>, vector<2x16x32xf32> -> vector<2x16x32xf32>
    "tpu.trace_stop"() : () -> ()
    %130 = arith.truncf %129 : vector<2x16x32xf32> to vector<2x16x32xbf16>
    "tpu.trace_start"() <{level = 10 : i32, message = "nqe,nke->nqk"}> : () -> ()
    %cst_36 = arith.constant dense<0.000000e+00> : vector<2x16x17xf32>
    %131 = tpu.matmul %130, %126, %cst_36 {dimension_numbers = #tpu.dot_dimension_numbers<[2], [2], [1], [1], [0, 0, 0, 1, 1, 1], [0], [0]>} : vector<2x16x32xbf16>, vector<2x17x32xbf16>, vector<2x16x17xf32> -> vector<2x16x17xf32>
    "tpu.trace_stop"() : () -> ()
    "tpu.trace_start"() <{level = 10 : i32, message = "ntd,df->ntf"}> : () -> ()
    %cst_37 = arith.constant dense<0.000000e+00> : vector<2x17x32xf32>
    %132 = tpu.matmul %126, %11, %cst_37 {dimension_numbers = #tpu.dot_dimension_numbers<[2], [0], [0, 1], [1], [0, 0, 0, 1, 1, 1], [], []>} : vector<2x17x32xbf16>, vector<32x32xbf16>, vector<2x17x32xf32> -> vector<2x17x32xf32>
    "tpu.trace_stop"() : () -> ()
    %133 = vector.shape_cast %131 : vector<2x16x17xf32> to vector<2x1x16x17xf32>
    %134 = vector.shape_cast %36 : vector<2x5x17xf32> to vector<2x5x1x17xf32>
    %cst_38 = arith.constant -1.000000e+09 : f32
    %135 = vector.broadcast %cst_38 : f32 to vector<2x5x1x17xf32>
    %136 = arith.mulf %134, %135 : vector<2x5x1x17xf32>
    %137 = vector.broadcast %133 : vector<2x1x16x17xf32> to vector<2x5x16x17xf32>
    %138 = vector.broadcast %136 : vector<2x5x1x17xf32> to vector<2x5x16x17xf32>
    %139 = arith.addf %137, %138 : vector<2x5x16x17xf32>
    %cst_39 = arith.constant dense<0xFF800000> : vector<2x5x16xf32>
    %140 = vector.multi_reduction <maximumf>, %139, %cst_39 [3] : vector<2x5x16x17xf32> to vector<2x5x16xf32>
    %141 = vector.shape_cast %140 : vector<2x5x16xf32> to vector<2x5x16x1xf32>
    %142 = vector.broadcast %141 : vector<2x5x16x1xf32> to vector<2x5x16x17xf32>
    %143 = arith.subf %139, %142 : vector<2x5x16x17xf32>
    %144 = math.exp %143 : vector<2x5x16x17xf32>
    %cst_40 = arith.constant dense<0.000000e+00> : vector<2x5x16xf32>
    %145 = vector.multi_reduction <add>, %144, %cst_40 [3] : vector<2x5x16x17xf32> to vector<2x5x16xf32>
    %146 = vector.shape_cast %145 : vector<2x5x16xf32> to vector<2x5x16x1xf32>
    %147 = tpu.reciprocal %146 {approx = true} : vector<2x5x16x1xf32> -> vector<2x5x16x1xf32>
    %148 = vector.broadcast %147 : vector<2x5x16x1xf32> to vector<2x5x16x17xf32>
    %149 = arith.mulf %144, %148 : vector<2x5x16x17xf32>
    %150 = vector.shape_cast %149 : vector<2x5x16x17xf32> to vector<2x80x17xf32>
    %151 = arith.truncf %150 : vector<2x80x17xf32> to vector<2x80x17xbf16>
    %152 = arith.truncf %132 : vector<2x17x32xf32> to vector<2x17x32xbf16>
    "tpu.trace_start"() <{level = 10 : i32, message = "nqk,nke->nqe"}> : () -> ()
    %cst_41 = arith.constant dense<0.000000e+00> : vector<2x80x32xf32>
    %153 = tpu.matmul %151, %152, %cst_41 {dimension_numbers = #tpu.dot_dimension_numbers<[2], [1], [1], [2], [0, 0, 0, 1, 1, 2], [0], [0]>} : vector<2x80x17xbf16>, vector<2x17x32xbf16>, vector<2x80x32xf32> -> vector<2x80x32xf32>
    "tpu.trace_stop"() : () -> ()
    %154 = vector.shape_cast %153 : vector<2x80x32xf32> to vector<160x32xf32>
    %155 = arith.truncf %154 : vector<160x32xf32> to vector<160x32xbf16>
    %cst_42 = arith.constant dense<0.000000e+00> : vector<160x48xf32>
    %156 = tpu.matmul %155, %22, %cst_42 {dimension_numbers = #tpu.dot_dimension_numbers<[1], [0], [0], [1], [0, 0, 1, 1], [], []>} : vector<160x32xbf16>, vector<32x48xbf16>, vector<160x48xf32> -> vector<160x48xf32>
    %157 = vector.extract_strided_slice %125 {offsets = [0, 0, 0], sizes = [2, 16, 32], strides = [1, 1, 1]} : vector<2x17x32xf32> to vector<2x16x32xf32>
    %158 = vector.shape_cast %157 : vector<2x16x32xf32> to vector<32x32xf32>
    %159 = arith.truncf %158 : vector<32x32xf32> to vector<32x32xbf16>
    %cst_43 = arith.constant dense<0.000000e+00> : vector<32x48xf32>
    %160 = tpu.matmul %159, %22, %cst_43 {dimension_numbers = #tpu.dot_dimension_numbers<[1], [0], [0], [1], [0, 0, 1, 1], [], []>} : vector<32x32xbf16>, vector<32x48xbf16>, vector<32x48xf32> -> vector<32x48xf32>
    %161 = vector.broadcast %23 : vector<1x48xf32> to vector<32x48xf32>
    %162 = arith.addf %160, %161 : vector<32x48xf32>
    %163 = vector.shape_cast %162 : vector<32x48xf32> to vector<2x1x16x48xf32>
    %164 = vector.shape_cast %156 : vector<160x48xf32> to vector<2x5x16x48xf32>
    %165 = vector.broadcast %163 : vector<2x1x16x48xf32> to vector<2x5x16x48xf32>
    %166 = arith.addf %165, %164 : vector<2x5x16x48xf32>
    %167 = vector.extract_strided_slice %166 {offsets = [0, 1, 0, 0], sizes = [2, 4, 16, 48], strides = [1, 1, 1, 1]} : vector<2x5x16x48xf32> to vector<2x4x16x48xf32>
    %168 = vector.extract_strided_slice %166 {offsets = [0, 0, 0, 0], sizes = [2, 1, 16, 48], strides = [1, 1, 1, 1]} : vector<2x5x16x48xf32> to vector<2x1x16x48xf32>
    %169 = vector.broadcast %168 : vector<2x1x16x48xf32> to vector<2x4x16x48xf32>
    %170 = arith.subf %167, %169 : vector<2x4x16x48xf32>
    %171 = arith.mulf %170, %170 : vector<2x4x16x48xf32>
    %cst_44 = arith.constant dense<0.000000e+00> : vector<2x4x16xf32>
    %172 = vector.multi_reduction <add>, %171, %cst_44 [3] : vector<2x4x16x48xf32> to vector<2x4x16xf32>
    %cst_45 = arith.constant 4.800000e+01 : f32
    %173 = vector.broadcast %cst_45 : f32 to vector<2x4x16xf32>
    %174 = arith.divf %172, %173 : vector<2x4x16xf32>
    %175 = vector.shape_cast %45 : vector<2x16xf32> to vector<2x1x16xf32>
    %176 = vector.broadcast %175 : vector<2x1x16xf32> to vector<2x4x16xf32>
    %177 = arith.mulf %174, %176 : vector<2x4x16xf32>
    %cst_46 = arith.constant dense<0.000000e+00> : vector<2x4xf32>
    %178 = vector.multi_reduction <add>, %177, %cst_46 [2] : vector<2x4x16xf32> to vector<2x4xf32>
    %cst_47 = arith.constant 0.0833333358 : f32
    %179 = vector.broadcast %cst_47 : f32 to vector<2x4xf32>
    %180 = arith.mulf %178, %179 : vector<2x4xf32>
    %181 = vector.extract_strided_slice %80 {offsets = [0, 1], sizes = [2, 4], strides = [1, 1]} : vector<2x5xf32> to vector<2x4xf32>
    %182 = arith.subf %181, %180 : vector<2x4xf32>
    %183 = arith.mulf %182, %182 : vector<2x4xf32>
    %184 = vector.shape_cast %183 : vector<2x4xf32> to vector<1x2x4xf32>
    %cst_48 = arith.constant dense<0.000000e+00> : vector<1xf32>
    %185 = vector.multi_reduction <add>, %184, %cst_48 [1, 2] : vector<1x2x4xf32> to vector<1xf32>
    %186 = vector.shape_cast %185 : vector<1xf32> to vector<1x1x1xf32>
    %187 = vector.extract %186[0, 0, 0] : f32 from vector<1x1x1xf32>
    %cst_49 = arith.constant 8.000000e+00 : f32
    %188 = arith.divf %187, %cst_49 : f32
    %189 = vector.broadcast %188 : f32 to vector<1x1xf32>
    %c0_50 = arith.constant 0 : index
    %c0_51 = arith.constant 0 : index
    %190 = vector.load %arg5[%c0_50, %c0_51] : memref<1x1xf32, #tpu.memory_space<vmem>>, vector<1x1xf32>
    tpu.vector_store %arg5[%c0_50, %c0_51], %189 {strides = array<i32>} : memref<1x1xf32, #tpu.memory_space<vmem>>, vector<1x1xf32>,
    return
  }
}

</mosaic_0001>

<bundles_post_ra>
// kernel: _lambda_.1
= control target key start
LH: loop header
LB: loop body
LE: loop exit
PB: predicated region body
PF: predicated region fallthrough
CT: control target
= control target key end

     0   :  { %v78_v0 = vlaneseq  ;;  %v5976_v1 = vmov 0.0   ;;  %vm4804_vm0 = vmmov 0   ;;  %s5970_s0 = inlined_call_operand.vmem [shape: s32[2,5], index: 0, kind: input, shape index: {}]   ;;  %s5971_s1 = inlined_call_operand.vmem [shape: f32[2,16,48], index: 1, kind: input, shape index: {}]   ;;  %s5972_s2 = inlined_call_operand.vmem [shape: f32[240,32], index: 2, kind: input, shape index: {}]   ;;  %s5973_s3 = inlined_call_operand.vmem [shape: f32[40,48], index: 3, kind: input, shape index: {}]   ;;  %s5974_s4 = inlined_call_operand.<no memory space> [shape: f32[1], index: 4, kind: input, shape index: {}]   ;;  %s5975_s5 = inlined_call_operand.hbm [shape: f32[1,1], index: 5, kind: output, shape index: {}]  }
   0x1   :  { %4470 = vmatprep.subr.bf16.mxu1 %v5976_v1  ;;  %v24_v2 = vld [vmem:[%s5971_s1] sm:$0xff]  ;;  %v25_v3 = vld [vmem:[%s5971_s1 + $0x8] sm:$0xff]  ;;  %4482 = vmatprep.subr.bf16.mxu0 %v5976_v1 }
   0x2   :  { %v4847_v4 = vshrl.u32 %v78_v0, 7  ;;  %v194_v5 = vpack.c.bf16 %v25_v3, %v24_v2  ;;  %4472 = vmatprep.mubr.msk.bf16.mxu1 %vm4804_vm0, %v5976_v1  ;;  %4484 = vmatprep.mubr.msk.bf16.mxu0 %vm4804_vm0, %v5976_v1 }
   0x4   :  { %5989 = vst [vmem:[#allocation6_spill] sm:$0xff] %v4847_v4 }
   0x5   :  { %11 = vsyncpa [#allocation4], 0  ;;  %v4856_v6 = vld [vmem:[%s5970_s0] sm:$0x3]  ;;  %v4859_v7 = vsub.s32 0, %v4847_v4  ;;  %v4862_v8 = vsub.s32 1, %v4847_v4  ;;  %4471 = vmatpush3.bf16.msra.mxu1 %v194_v5 }
   0x6   :  { %4476 = vmatprep.subr.bf16.mxu1 %v5976_v1  ;;  %v64_v11 = vld [vmem:[%s5972_s2 + $0xc0] sm:$0xff]  ;;  %v65_v12 = vld [vmem:[%s5972_s2 + $0xc8] sm:$0xff]  ;;  %v4805_v14 = vmov 1966171168   ;;  %v4876_v16 = vand.u32 127, %v78_v0  ;;  %v26_v18 = vld [vmem:[%s5971_s1 + $0x10] sm:$0xff] }
   0x7   :  { %v81_v9 = vrot.slane %v4856_v6, %v4859_v7  ;;  %v88_v10 = vrot.slane %v4856_v6, %v4862_v8  ;;  %v283_v13 = vpack.c.bf16 %v65_v12, %v64_v11  ;;  %v101_v15 = vunpack.c.l.s4 %v4805_v14  ;;  %v27_v19 = vld [vmem:[%s5971_s1 + $0x18] sm:$0xff]  ;;  %v28_v53 = vld [vmem:[%s5972_s2] sm:$0xff]  ;;  %v29_v54 = vld [vmem:[%s5972_s2 + $0x8] sm:$0xff] }
   0x8   :  { %5990 = vst [vmem:[#allocation7_spill] sm:$0xff] %v4876_v16  ;;  %vm196_vm2 = vcmask 130048   ;;  %v195_v22 = vpack.c.bf16 %v27_v19, %v26_v18  ;;  %vm152_vm4 = vcmask 126976   ;;  %v37_v55 = vld [vmem:[%s5972_s2 + $0x30] sm:$0xff]  ;;  %v34_v56 = vpack.c.bf16 %v29_v54, %v28_v53  ;;  %v38_v57 = vld [vmem:[%s5972_s2 + $0x38] sm:$0xff]  ;;  %v39_v61 = vld [vmem:[%s5972_s2 + $0x40] sm:$0xff] }
   0x9   :  { %83 = vbcast.lane.b32.xlu0 %v81_v9, 256  ;;  %4483 = vmatpush3.bf16.msra.mxu0 %v283_v13  ;;  %v102_v17 = vunpack.c.0.s8 %v101_v15  ;;  %v43_v58 = vpack.c.bf16 %v38_v57, %v37_v55  ;;  %v30_v59 = vld [vmem:[%s5972_s2 + $0x10] sm:$0xff]  ;;  %v31_v60 = vld [vmem:[%s5972_s2 + $0x18] sm:$0xff]  ;;  %v40_v63 = vld [vmem:[%s5972_s2 + $0x48] sm:$0xff]  ;;  %vm727_vm5 = vcmask 392192   ;;  %vm169_vm6 = vcmask 39936  }
   0xa   :  { %4498 = vmatprep.subr.bf16.mxu0 %v5976_v1  ;;  %v35_v62 = vpack.c.bf16 %v31_v60, %v30_v59  ;;  %v44_v0 = vpack.c.bf16 %v40_v63, %v39_v61  ;;  %v32_v2 = vld [vmem:[%s5972_s2 + $0x20] sm:$0xff]  ;;  %v33_v3 = vld [vmem:[%s5972_s2 + $0x28] sm:$0xff]  ;;  %v41_v5 = vld [vmem:[%s5972_s2 + $0x50] sm:$0xff]  ;;  %vm176_vm12 = vcmask 32768   ;;  %vm1742_vm14 = vcmask 261120  }
   0xb   :  { %v4889_v23 = vsub.s32 %v102_v17, %v4847_v4  ;;  %v36_v9 = vpack.c.bf16 %v33_v3, %v32_v2  ;;  %v46_v55 = vld [vmem:[%s5972_s2 + $0x60] sm:$0xff]  ;;  %v48_v57 = vld [vmem:[%s5972_s2 + $0x70] sm:$0xff]  ;;  %v49_v59 = vld [vmem:[%s5972_s2 + $0x78] sm:$0xff]  ;;  %v124_v3 = vadd.s32 8, %v4847_v4  ;;  %vm189_vm15 = vcmp.eq.s32.totalorder %v4876_v16, 16 }
   0xc   :  { %v51_v60 = vpack.c.bf16 %v49_v59, %v48_v57 }
   0xd   :  { %90 = vbcast.lane.b32.xlu0 %v88_v10, 256  ;;  %v42_v10 = vld [vmem:[%s5972_s2 + $0x58] sm:$0xff]  ;;  %v106_v61 = vrot.slane %v4856_v6, %v4889_v23  ;;  %v5010_v6 = vld [vmem:[%s5972_s2 + $0xe8] sm:$0xff] }
   0xe   :  { %v45_v11 = vpack.c.bf16 %v42_v10, %v41_v5  ;;  %v125_v5 = vadd.s32 16, %v4847_v4  ;;  %v1106_v10 = vsub.s32 2, %v4847_v4 }
   0xf   :  { %v114_v63 = vrot.slane %v106_v61, %v4889_v23 }
  0x11   :  { %v129_v2 = vrot.slane %v114_v63, %v4859_v7 }
  0x13   :  { %vm134_vm7 = vcmp.eq.s32.totalorder %v129_v2, %v4847_v4  ;;  %vm135_vm8 = vcmp.eq.s32.totalorder %v129_v2, %v124_v3  ;;  %vm136_vm10 = vcmp.eq.s32.totalorder %v129_v2, %v125_v5 }
  0x7b   :  { %v84_v20 = vpop.permute.xlu0 %83 }
  0x7c   :  { %vm94_vm1 = vcmp.eq.s32.totalorder %v84_v20, %v4876_v16 }
  0x7d   :  { %v4886_v21 = vsel %vm94_vm1, 1.0, %v5976_v1  ;;  %vm2110_vm1 = vcmask 130112  }
  0x7e   :  { %v192_v24 = vpack.c.bf16 %v4886_v21, %v4886_v21 }
  0x7f   :  { %v91_v25 = vpop.permute.xlu0 %90 }
  0x80   :  { %v292_v26 = vrot.slane %v192_v24, %v4889_v23  ;;  %4473 = vmatmul.mubr.msk.bf16.vlgmr.msra.gmra.mrb[0].mxu1 %vm196_vm2, %v192_v24  ;;  %vm95_vm3 = vcmp.eq.s32.totalorder %v91_v25, %v4876_v16 }
  0x81   :  { %4477 = vmatpush3.bf16.msra.mxu1 %v195_v22  ;;  %4478 = vmatprep.mubr.msk.bf16.mxu1 %vm4804_vm0, %v5976_v1  ;;  %v4899_v27 = vsel %vm95_vm3, 1.0, %v5976_v1  ;;  %vm2133_vm3 = vcmask 1041409  }
  0x82   :  { %4488 = vmatprep.subr.bf16.mxu1 %v5976_v1  ;;  %v293_v28 = vcombine.high %v292_v26, %v292_v26  ;;  %v4904_v29 = vsel %vm152_vm4, %v4899_v27, 0.0  ;;  %v193_v30 = vpack.c.bf16 %v4899_v27, %v4899_v27  ;;  %v300_v31 = vrot.slane %v292_v26, %v4889_v23 }
  0x84   :  { %v315_v32 = vrot.slane %v193_v30, %v4889_v23  ;;  %v307_v33 = vrot.slane %v293_v28, %v4889_v23  ;;  %v308_v36 = vcombine.high %v300_v31, %v300_v31 }
  0x86   :  { %v316_v34 = vcombine.high %v315_v32, %v315_v32  ;;  %v323_v35 = vrot.slane %v315_v32, %v4889_v23  ;;  %v347_v40 = vcombine.low %v300_v31, %v307_v33 }
  0x88   :  { %4479 = vmatmul.mubr.msk.bf16.vlgmr.msra.gmra.mrb[4].mxu1 %vm196_vm2, %v193_v30  ;;  %v330_v37 = vrot.slane %v316_v34, %v4889_v23  ;;  %v331_v38 = vcombine.high %v323_v35, %v323_v35  ;;  %v338_v39 = vunpack.i.h.s16 %v323_v35  ;;  %v4334_v42 = vpack.i.b16 %v323_v35, %v308_v36 }
  0x89   :  { %4494 = vmatprep.mubr.msk.bf16.mxu1 %vm4804_vm0, %v5976_v1  ;;  %v355_v46 = vrot.slane %v347_v40, %v4889_v23  ;;  %4489 = vmatpush3.bf16.msra.mxu1 %v34_v56  ;;  %v47_v56 = vld [vmem:[%s5972_s2 + $0x68] sm:$0xff] }
  0x8a   :  { %v340_v41 = vunpack.i.h.s16 %v330_v37  ;;  %v4335_v43 = vpack.i.b16 %v330_v37, %v338_v39  ;;  %4490 = vmatprep.subr.bf16.mxu1 %v5976_v1 }
  0x8c   :  { %v4336_v44 = vpack.i.b16 %v331_v38, %v340_v41  ;;  %v348_v45 = vcombine.low %v4334_v42, %v4335_v43 }
  0x8d   :  { %4491 = vmatpush3.bf16.msra.mxu1 %v35_v62  ;;  %v107_v62 = vcombine.high %v106_v61, %v106_v61 }
  0x8e   :  { %v362_v47 = vrot.slane %v348_v45, %v4889_v23  ;;  %v369_v48 = vrot.slane %v4336_v44, %v4889_v23  ;;  %4492 = vmatprep.subr.bf16.mxu1 %v5976_v1 }
  0x90   :  { %v370_v49 = vcombine.low %v355_v46, %v362_v47  ;;  %v384_v50 = vrot.slane %v369_v48, %v4889_v23 }
  0x91   :  { %4493 = vmatpush3.bf16.msra.mxu1 %v36_v9 }
  0x92   :  { %v377_v51 = vrot.slane %v370_v49, %v4889_v23  ;;  %4508 = vmatprep.subr.bf16.mxu1 %v5976_v1 }
  0x94   :  { %v385_v52 = vcombine.low %v377_v51, %v384_v50 }
  0x96   :  { %4485 = vmatmul.mubr.msk.bf16.vlgmr.msra.gmra.mrb[0].mxu0 %vm196_vm2, %v385_v52  ;;  %vm2117_vm2 = vcmask 195712  }
  0x97   :  { %4504 = vmatprep.mubr.msk.bf16.mxu0 %vm4804_vm0, %v5976_v1  ;;  %4499 = vmatpush3.bf16.msra.mxu0 %v43_v58  ;;  %v50_v58 = vpack.c.bf16 %v47_v56, %v46_v55 }
  0x98   :  { %4500 = vmatprep.subr.bf16.mxu0 %v5976_v1 }
  0x9b   :  { %4501 = vmatpush3.bf16.msra.mxu0 %v44_v0  ;;  %v121_v0 = vrot.slane %v107_v62, %v4889_v23 }
  0x9c   :  { %4502 = vmatprep.subr.bf16.mxu0 %v5976_v1 }
  0x9d   :  { %v133_v9 = vrot.slane %v121_v0, %v4859_v7 }
  0x9f   :  { %4503 = vmatpush3.bf16.msra.mxu0 %v45_v11  ;;  %v4325_v11 = vsel %vm134_vm7, 1.0, %v5976_v1  ;;  %vm138_vm9 = vcmp.eq.s32.totalorder %v133_v9, %v124_v3  ;;  %vm137_vm11 = vcmp.eq.s32.totalorder %v133_v9, %v4847_v4  ;;  %vm139_vm13 = vcmp.eq.s32.totalorder %v133_v9, %v125_v5 }
  0xa0   :  { %vm1952_vm7 = vcmask 1041408  }
 0x153   :  { %v234_v12 = vpop.f32.mrb[0].mxu1 }
 0x154   :  { %v513_v13 = vpack.c.bf16 %v234_v12, %v234_v12  ;;  %v4474_v14 = vpop.f32.mrb[1].mxu1  ;;  %v4326_v12 = vsel %vm135_vm8, 1.0, %v5976_v1  ;;  %vm1953_vm8 = vcmask 1042432  }
 0x155   :  { %v237_v15 = vpop.f32.mrb[2].mxu1  ;;  %v1860_v14 = vpack.c.bf16 %v4326_v12, %v4325_v11 }
 0x156   :  { %v4475_v17 = vpop.f32.mrb[3].mxu1  ;;  %v527_v18 = vrot.slane %v513_v13, %v4889_v23  ;;  %v170_v13 = vsel %vm169_vm6, %v4325_v11, 0.0  ;;  %v1107_v15 = vrot.slane %v5010_v6, %v1106_v10 }
 0x157   :  { %171 = vadd.xlane.f32.xlu1 %v170_v13  ;;  %v173_v17 = vsel %vm169_vm6, %v4326_v12, 0.0 }
 0x158   :  { %v528_v20 = vcombine.high %v527_v18, %v527_v18  ;;  %v535_v22 = vrot.slane %v527_v18, %v4889_v23  ;;  %v5019_v18 = vsel %vm138_vm9, 1.0, %v5976_v1  ;;  %vm3579_vm9 = vcmask 1040384  }
 0x15a   :  { %v542_v31 = vrot.slane %v528_v20, %v4889_v23  ;;  %v543_v32 = vcombine.high %v535_v22, %v535_v22  ;;  %v5026_v20 = vsel %vm136_vm10, 1.0, %v5976_v1  ;;  %vm1094_vm10 = vcmask 258048  }
 0x15b   :  { %v277_v19 = vpop.f32.mrb[4].mxu1  ;;  %174 = vadd.xlane.f32.xlu1 %v173_v17 }
 0x15c   :  { %v514_v24 = vpack.c.bf16 %v277_v19, %v277_v19  ;;  %v4480_v25 = vpop.f32.mrb[5].mxu1  ;;  %v622_v38 = vcombine.low %v535_v22, %v542_v31  ;;  %v5022_v19 = vsel %vm137_vm11, 1.0, %v5976_v1  ;;  %vm4292_vm11 = vcmask 25600  }
 0x15d   :  { %v280_v26 = vpop.f32.mrb[6].mxu1  ;;  %v180_v22 = vsel %vm169_vm6, %v5022_v19, 0.0  ;;  %v1109_v25 = vcombine.high %v1107_v15, %v1107_v15 }
 0x15e   :  { %v550_v28 = vrot.slane %v514_v24, %v4889_v23  ;;  %v4481_v30 = vpop.f32.mrb[7].mxu1  ;;  %v630_v44 = vrot.slane %v622_v38, %v4889_v23  ;;  %v1862_v24 = vpack.c.bf16 %v5019_v18, %v5022_v19  ;;  %181 = vadd.xlane.f32.xlu0 %v180_v22  ;;  %v1116_v26 = vrot.slane %v1107_v15, %v4889_v23 }
 0x15f   :  { %v1123_v30 = vrot.slane %v1109_v25, %v4889_v23  ;;  %v2105_v19 = vadd.s32 4294967288, %v4876_v16 }
 0x160   :  { %v551_v33 = vcombine.high %v550_v28, %v550_v28  ;;  %v558_v34 = vrot.slane %v550_v28, %v4889_v23  ;;  %v177_v28 = vsel %vm176_vm12, %v5026_v20, 0.0  ;;  %v1124_v31 = vcombine.high %v1116_v26, %v1116_v26 }
 0x161   :  { %178 = vadd.xlane.f32.xlu1 %v177_v28 }
 0x162   :  { %v565_v35 = vrot.slane %v551_v33, %v4889_v23  ;;  %v573_v36 = vunpack.i.h.s16 %v558_v34  ;;  %v4338_v37 = vpack.i.b16 %v558_v34, %v543_v32  ;;  %v566_v39 = vcombine.high %v558_v34, %v558_v34 }
 0x163   :  { %v1131_v32 = vrot.slane %v1116_v26, %v4889_v23  ;;  %v183_v33 = vsel %vm169_vm6, %v5019_v18, 0.0  ;;  %v5040_v34 = vsel %vm139_vm13, 1.0, %v5976_v1  ;;  %v4331_v18 = vsel %vm189_vm15, 1.0, %v5976_v1 }
 0x164   :  { %v575_v40 = vunpack.i.h.s16 %v565_v35  ;;  %v4339_v41 = vpack.i.b16 %v565_v35, %v573_v36  ;;  %v1138_v35 = vrot.slane %v1123_v30, %v4889_v23  ;;  %v1145_v36 = vrot.slane %v1124_v31, %v4889_v23 }
 0x165   :  { %184 = vadd.xlane.f32.xlu1 %v183_v33  ;;  %v186_v38 = vsel %vm176_vm12, %v5040_v34, 0.0  ;;  %vm4307_vm12 = vcmask 0  }
 0x166   :  { %v4340_v42 = vpack.i.b16 %v566_v39, %v575_v40  ;;  %v623_v43 = vcombine.low %v4338_v37, %v4339_v41  ;;  %v1146_v37 = vcombine.high %v1131_v32, %v1131_v32  ;;  %v518_v39 = vrot.slane %v5010_v6, %v4859_v7 }
 0x167   :  { %v1148_v40 = vcombine.low %v1131_v32, %v1145_v36  ;;  %v4343_v41 = vcombine.high %v1131_v32, %v1145_v36  ;;  %v1147_v11 = vcombine.high %v1145_v36, %v1145_v36 }
 0x168   :  { %v637_v45 = vrot.slane %v623_v43, %v4889_v23  ;;  %v644_v46 = vrot.slane %v4340_v42, %v4889_v23  ;;  %v1150_v42 = vcombine.low %v1138_v35, %v1131_v32  ;;  %v1151_v43 = vcombine.low %v1145_v36, %v1146_v37 }
 0x169   :  { %v4974_v48 = vpop.f32.mrb[0].mxu0  ;;  %187 = vadd.xlane.f32.xlu1 %v186_v38  ;;  %v1197_v37 = vcombine.low %v1147_v11, %v1138_v35 }
 0x16a   :  { %v645_v47 = vcombine.low %v630_v44, %v637_v45  ;;  %v4486_v49 = vpop.f32.mrb[1].mxu0  ;;  %v659_v52 = vrot.slane %v644_v46, %v4889_v23  ;;  %v578_v44 = vcombine.high %v518_v39, %v518_v39  ;;  %v585_v45 = vrot.slane %v518_v39, %v4889_v23 }
 0x16b   :  { %v4976_v50 = vpop.f32.mrb[2].mxu0  ;;  %v1158_v46 = vrot.slane %v1148_v40, %v4889_v23  ;;  %v1172_v49 = vrot.slane %v1150_v42, %v4889_v23 }
 0x16c   :  { %v652_v51 = vrot.slane %v645_v47, %v4889_v23  ;;  %v4487_v53 = vpop.f32.mrb[3].mxu0  ;;  %v1165_v47 = vrot.slane %v4343_v41, %v4889_v23 }
 0x16d   :  { %v592_v53 = vrot.slane %v578_v44, %v4889_v23 }
 0x16e   :  { %v660_v54 = vcombine.low %v652_v51, %v659_v52  ;;  %v1179_v51 = vrot.slane %v1151_v43, %v4889_v23  ;;  %v593_v52 = vcombine.high %v585_v45, %v585_v45  ;;  %v1180_v55 = vcombine.low %v1158_v46, %v1165_v47 }
 0x16f   :  { %v1204_v46 = vrot.slane %v1197_v37, %v4889_v23 }
 0x170   :  { %4495 = vmatmul.mubr.msk.bf16.vlgmr.msra.gmra.mrb[8].mxu1 %vm727_vm5, %v660_v54  ;;  %4505 = vmatmul.mubr.msk.bf16.vlgmr.msra.gmra.mrb[4].mxu0 %vm727_vm5, %v660_v54  ;;  %v600_v54 = vrot.slane %v585_v45, %v4889_v23  ;;  %v1181_v56 = vcombine.low %v1172_v49, %v1179_v51  ;;  %v614_v57 = vrot.slane %v593_v52, %v4889_v23 }
 0x171   :  { %4512 = vmatprep.mubr.msk.bf16.mxu1 %vm4804_vm0, %v5976_v1  ;;  %4509 = vmatpush3.bf16.msra.mxu1 %v50_v58  ;;  %v607_v58 = vrot.slane %v592_v53, %v4889_v23 }
 0x172   :  { %4510 = vmatprep.subr.bf16.mxu1 %v5976_v1  ;;  %4518 = vmatprep.mubr.msk.bf16.mxu0 %vm169_vm6, %v1860_v14  ;;  %v615_v59 = vcombine.high %v600_v54, %v600_v54  ;;  %v1195_v61 = vrot.slane %v1181_v56, %v4889_v23  ;;  %v661_v62 = vcombine.low %v600_v54, %v614_v57 }
 0x173   :  { %v4341_v63 = vcombine.high %v600_v54, %v614_v57  ;;  %v663_v0 = vcombine.low %v607_v58, %v600_v54  ;;  %v616_v31 = vcombine.high %v614_v57, %v614_v57 }
 0x174   :  { %v664_v2 = vcombine.low %v614_v57, %v615_v59  ;;  %v671_v5 = vrot.slane %v661_v62, %v4889_v23 }
 0x175   :  { %4511 = vmatpush3.bf16.msra.mxu1 %v51_v60  ;;  %v1188_v60 = vrot.slane %v1180_v55, %v4889_v23  ;;  %v678_v12 = vrot.slane %v4341_v63, %v4889_v23  ;;  %v685_v13 = vrot.slane %v663_v0, %v4889_v23  ;;  %v710_v42 = vcombine.low %v616_v31, %v607_v58 }
 0x176   :  { %v692_v14 = vrot.slane %v664_v2, %v4889_v23  ;;  %v1211_v55 = vrot.slane %v1204_v46, %v4889_v23  ;;  %v432_v2 = vcombine.high %v4974_v48, %v4974_v48 }
 0x177   :  { %v1196_v3 = vcombine.low %v1188_v60, %v1195_v61  ;;  %v693_v38 = vcombine.low %v671_v5, %v678_v12  ;;  %v717_v52 = vrot.slane %v710_v42, %v4889_v23 }
 0x178   :  { %v694_v36 = vcombine.low %v685_v13, %v692_v14 }
 0x179   :  { %v701_v35 = vrot.slane %v693_v38, %v4889_v23  ;;  %v724_v0 = vrot.slane %v717_v52, %v4889_v23 }
 0x17a   :  { %v708_v47 = vrot.slane %v694_v36, %v4889_v23  ;;  %2071 = vbcast.lane.b32.xlu1 %v4331_v18, 256 }
 0x17c   :  { %v709_v56 = vcombine.low %v701_v35, %v708_v47 }
 0x17e   :  { %2075 = vbcast.lane.b32.xlu1 %v4331_v18, 264 }
 0x243   :  { %v765_v9 = vpop.f32.mrb[8].mxu1  ;;  %v1248_v10 = vpop.f32.mrb[4].mxu0 }
 0x244   :  { %v1249_v15 = vadd.f32 %v1248_v10, %v1196_v3  ;;  %v4496_v17 = vpop.f32.mrb[9].mxu1  ;;  %v4506_v22 = vpop.f32.mrb[5].mxu0  ;;  %v5116_v11 = vadd.f32 %v765_v9, %v709_v56 }
 0x245   :  { %v768_v25 = vpop.f32.mrb[10].mxu1  ;;  %v1251_v26 = vpop.f32.mrb[6].mxu0 }
 0x246   :  { %v1257_v28 = vcombine.high %v1249_v15, %v1249_v15  ;;  %v1264_v30 = vrot.slane %v1249_v15, %v4889_v23  ;;  %v4497_v32 = vpop.f32.mrb[11].mxu1  ;;  %v4507_v33 = vpop.f32.mrb[7].mxu0  ;;  %v1252_v10 = vadd.f32 %v1251_v26, %v1211_v55  ;;  %v769_v9 = vadd.f32 %v768_v25, %v724_v0 }
 0x248   :  { %v1271_v39 = vrot.slane %v1257_v28, %v4889_v23  ;;  %v1272_v40 = vcombine.high %v1264_v30, %v1264_v30  ;;  %v5066_v41 = vrot.slane %v1264_v30, %v4889_v23  ;;  %v1312_v38 = vrot.slane %v1252_v10, %v4889_v23 }
 0x249   :  { %v774_v10 = vcombine.high %v5116_v11, %v5116_v11 }
 0x24a   :  { %v1273_v43 = vcombine.high %v1271_v39, %v1271_v39  ;;  %v5069_v44 = vrot.slane %v1271_v39, %v4889_v23  ;;  %v5072_v45 = vrot.slane %v1272_v40, %v4889_v23  ;;  %v5082_v51 = vcombine.high %v5066_v41, %v5066_v41 }
 0x24b   :  { %v1338_v57 = vmul.f32 %v5066_v41, %v5066_v41 }
 0x24c   :  { %v5078_v49 = vrot.slane %v1273_v43, %v4889_v23  ;;  %v5087_v53 = vcombine.high %v5069_v44, %v5069_v44  ;;  %v5091_v54 = vcombine.high %v5072_v45, %v5072_v45  ;;  %v1339_v59 = vmul.f32 %v5072_v45, %v5072_v45 }
 0x24d   :  { %v1340_v60 = vmul.f32 %v5082_v51, %v5082_v51  ;;  %v1342_v62 = vmul.f32 %v5069_v44, %v5069_v44  ;;  %v1348_v5 = vmul.f32 %v1338_v57, %v5066_v41  ;;  %v439_v57 = vrot.slane %v4974_v48, %v4889_v23 }
 0x24e   :  { %v5098_v58 = vcombine.high %v5078_v49, %v5078_v49  ;;  %v1341_v61 = vmul.f32 %v5091_v54, %v5091_v54  ;;  %v1343_v63 = vmul.f32 %v5078_v49, %v5078_v49  ;;  %v1344_v3 = vmul.f32 %v5087_v53, %v5087_v53 }
 0x24f   :  { %v1349_v12 = vmul.f32 %v1339_v59, %v5072_v45  ;;  %v1350_v13 = vmul.f32 %v1340_v60, %v5082_v51  ;;  %v1352_v17 = vmul.f32 %v1342_v62, %v5069_v44  ;;  %v1358_v30 = vmul.f32 0.044715, %v1348_v5 }
 0x250   :  { %v1351_v14 = vmul.f32 %v1341_v61, %v5091_v54  ;;  %v1345_v15 = vmul.f32 %v5098_v58, %v5098_v58  ;;  %v1353_v22 = vmul.f32 %v1343_v63, %v5078_v49  ;;  %v1354_v28 = vmul.f32 %v1344_v3, %v5087_v53 }
 0x251   :  { %v1359_v31 = vmul.f32 0.044715, %v1349_v12  ;;  %v1360_v26 = vmul.f32 0.044715, %v1350_v13  ;;  %v1362_v33 = vmul.f32 0.044715, %v1352_v17  ;;  %v1368_v39 = vadd.f32 %v1358_v30, %v5066_v41 }
 0x252   :  { %v1361_v32 = vmul.f32 0.044715, %v1351_v14  ;;  %v1363_v37 = vmul.f32 0.044715, %v1353_v22  ;;  %v1364_v36 = vmul.f32 0.044715, %v1354_v28  ;;  %v1355_v43 = vmul.f32 %v1345_v15, %v5098_v58 }
 0x253   :  { %v1369_v40 = vadd.f32 %v1359_v31, %v5072_v45  ;;  %v1370_v42 = vadd.f32 %v1360_v26, %v5082_v51  ;;  %v1372_v35 = vadd.f32 %v1362_v33, %v5069_v44  ;;  %v1378_v52 = vmul.f32 0.7978846, %v1368_v39 }
 0x254   :  { %v1371_v46 = vadd.f32 %v1361_v32, %v5091_v54  ;;  %v1373_v25 = vadd.f32 %v1363_v37, %v5078_v49  ;;  %v1374_v47 = vadd.f32 %v1364_v36, %v5087_v53  ;;  %v446_v59 = vrot.slane %v432_v2, %v4889_v23 }
 0x255   :  { %v1379_v55 = vmul.f32 0.7978846, %v1369_v40  ;;  %v1380_v56 = vmul.f32 0.7978846, %v1370_v42  ;;  %v1382_v61 = vmul.f32 0.7978846, %v1372_v35  ;;  %4658 = vtanh.f32 %v1378_v52 }
 0x256   :  { %v1381_v60 = vmul.f32 0.7978846, %v1371_v46  ;;  %v829_v62 = vrot.slane %v769_v9, %v4889_v23  ;;  %v1313_v63 = vcombine.high %v1312_v38, %v1312_v38  ;;  %v1383_v0 = vmul.f32 0.7978846, %v1373_v25 }
 0x257   :  { %4660 = vtanh.f32 %v1379_v55  ;;  %v5140_v3 = vrot.slane %v1312_v38, %v4889_v23  ;;  %v1365_v5 = vmul.f32 0.044715, %v1355_v43  ;;  %v1384_v12 = vmul.f32 0.7978846, %v1374_v47 }
 0x258   :  { %4662 = vtanh.f32 %v1380_v56  ;;  %v5145_v48 = vrot.slane %v1313_v63, %v4889_v23  ;;  %v447_v2 = vcombine.high %v439_v57, %v439_v57  ;;  %v5151_v15 = vrot.slane %v439_v57, %v4889_v23 }
 0x259   :  { %4664 = vtanh.f32 %v1381_v60  ;;  %v1346_v13 = vmul.f32 %v5140_v3, %v5140_v3  ;;  %v1375_v14 = vadd.f32 %v1365_v5, %v5098_v58  ;;  %v830_v17 = vcombine.high %v829_v62, %v829_v62 }
 0x25a   :  { %4666 = vtanh.f32 %v1382_v61  ;;  %v1347_v22 = vmul.f32 %v5145_v48, %v5145_v48  ;;  %v5157_v28 = vrot.slane %v4976_v50, %v4889_v23  ;;  %v448_v26 = vcombine.high %v446_v59, %v446_v59 }
 0x25b   :  { %4668 = vtanh.f32 %v1383_v0  ;;  %v1356_v30 = vmul.f32 %v1346_v13, %v5140_v3  ;;  %v1385_v31 = vmul.f32 0.7978846, %v1375_v14  ;;  %v788_v9 = vrot.slane %v774_v10, %v4889_v23 }
 0x25c   :  { %4670 = vtanh.f32 %v1384_v12  ;;  %v1357_v32 = vmul.f32 %v1347_v22, %v5145_v48  ;;  %v5163_v33 = vrot.slane %v446_v59, %v4889_v23  ;;  %v5166_v37 = vrot.slane %v829_v62, %v4889_v23 }
 0x25d   :  { %v1366_v38 = vmul.f32 0.044715, %v1356_v30  ;;  %4672 = vtanh.f32 %v1385_v31  ;;  %v469_v50 = vrot.slane %v447_v2, %v4889_v23  ;;  %v5170_v36 = vrot.slane %v830_v17, %v4889_v23 }
 0x25e   :  { %v1367_v39 = vmul.f32 0.044715, %v1357_v32  ;;  %v477_v40 = vcombine.high %v5151_v15, %v5151_v15  ;;  %v5176_v46 = vrot.slane %v448_v26, %v4889_v23  ;;  %v488_v35 = vcombine.high %v5157_v28, %v5157_v28 }
 0x25f   :  { %v1376_v42 = vadd.f32 %v1366_v38, %v5140_v3  ;;  %v4659_v43 = vpop.eup %4658  ;;  %v790_v25 = vcombine.high %v788_v9, %v788_v9  ;;  %v478_v55 = vcombine.high %v5163_v33, %v5163_v33  ;;  %v863_v57 = vmul.f32 %v5166_v37, %v5166_v37 }
 0x260   :  { %v1377_v47 = vadd.f32 %v1367_v39, %v5145_v48  ;;  %v1398_v56 = vadd.f32 1.0, %v4659_v43  ;;  %v479_v61 = vcombine.high %v469_v50, %v469_v50  ;;  %v864_v63 = vmul.f32 %v5170_v36, %v5170_v36 }
 0x261   :  { %v4661_v52 = vpop.eup %4660  ;;  %v1386_v59 = vmul.f32 0.7978846, %v1376_v42  ;;  %v5188_v10 = vrot.slane %v788_v9, %v4889_v23  ;;  %v5191_v14 = vrot.slane %v790_v25, %v4889_v23  ;;  %v873_v38 = vmul.f32 %v863_v57, %v5166_v37 }
 0x262   :  { %v4663_v60 = vpop.eup %4662  ;;  %v1399_v62 = vadd.f32 1.0, %v4661_v52  ;;  %v1387_v0 = vmul.f32 0.7978846, %v1377_v47  ;;  %v1408_v2 = vmul.f32 0.5, %v1398_v56  ;;  %v874_v47 = vmul.f32 %v864_v63, %v5170_v36 }
 0x263   :  { %v4665_v5 = vpop.eup %4664  ;;  %v1400_v12 = vadd.f32 1.0, %v4663_v60  ;;  %4674 = vtanh.f32 %v1386_v59 }
 0x264   :  { %v4667_v13 = vpop.eup %4666  ;;  %v1401_v17 = vadd.f32 1.0, %v4665_v5  ;;  %v1409_v22 = vmul.f32 0.5, %v1399_v62  ;;  %4676 = vtanh.f32 %v1387_v0  ;;  %v1418_v32 = vmul.f32 %v1408_v2, %v5066_v41 }
 0x265   :  { %v4669_v30 = vpop.eup %4668  ;;  %v1402_v31 = vadd.f32 1.0, %v4667_v13  ;;  %v1410_v26 = vmul.f32 0.5, %v1400_v12  ;;  %v883_v13 = vmul.f32 0.044715, %v873_v38 }
 0x266   :  { %v4671_v39 = vpop.eup %4670  ;;  %v1403_v9 = vadd.f32 1.0, %v4669_v30  ;;  %v1411_v42 = vmul.f32 0.5, %v1401_v17  ;;  %v1419_v43 = vmul.f32 %v1409_v22, %v5072_v45  ;;  %v1428_v60 = vadd.f32 %v1418_v32, %v5151_v15 }
 0x267   :  { %v4673_v52 = vpop.eup %4672  ;;  %v1404_v25 = vadd.f32 1.0, %v4671_v39  ;;  %v1412_v56 = vmul.f32 0.5, %v1402_v31  ;;  %v1420_v59 = vmul.f32 %v1410_v26, %v5082_v51  ;;  %v480_v51 = vcombine.high %v5176_v46, %v5176_v46 }
 0x268   :  { %v1413_v62 = vmul.f32 0.5, %v1403_v9  ;;  %v1421_v0 = vmul.f32 %v1411_v42, %v5091_v54  ;;  %v1429_v41 = vadd.f32 %v1419_v43, %v469_v50  ;;  %v1405_v5 = vadd.f32 1.0, %v4673_v52 }
 0x269   :  { %v1414_v57 = vmul.f32 0.5, %v1404_v25  ;;  %v1422_v12 = vmul.f32 %v1412_v56, %v5069_v44  ;;  %v1430_v2 = vadd.f32 %v1420_v59, %v477_v40  ;;  %v884_v54 = vmul.f32 0.044715, %v874_v47 }
 0x26a   :  { %v1423_v45 = vmul.f32 %v1413_v62, %v5078_v49  ;;  %v1431_v63 = vadd.f32 %v1421_v0, %v479_v61  ;;  %v1448_v17 = vcombine.low %v1428_v60, %v1429_v41  ;;  %v1415_v22 = vmul.f32 0.5, %v1405_v5 }
 0x26b   :  { %v1424_v15 = vmul.f32 %v1414_v57, %v5087_v53  ;;  %v1432_v30 = vadd.f32 %v1422_v12, %v5163_v33  ;;  %v5208_v50 = vcombine.high %v5188_v10, %v5188_v10  ;;  %v860_v31 = vmul.f32 %v5191_v14, %v5191_v14 }
 0x26c   :  { %v1433_v44 = vadd.f32 %v1423_v45, %v5176_v46  ;;  %v1449_v40 = vcombine.low %v1430_v2, %v1431_v63  ;;  %v1425_v49 = vmul.f32 %v1415_v22, %v5098_v58  ;;  %v1456_v26 = vrot.slane %v1448_v17, %v4889_v23 }
 0x26d   :  { %v4675_v61 = vpop.eup %4674  ;;  %v893_v53 = vadd.f32 %v883_v13, %v5166_v37  ;;  %v1434_v32 = vadd.f32 %v1424_v15, %v478_v55  ;;  %v1470_v39 = vrot.slane %v1432_v30, %v4889_v23  ;;  %v5220_v46 = vcombine.high %v5191_v14, %v5191_v14 }
 0x26e   :  { %v4677_v33 = vpop.eup %4676  ;;  %v1463_v38 = vrot.slane %v1449_v40, %v4889_v23  ;;  %v1406_v9 = vadd.f32 1.0, %v4675_v61  ;;  %v1435_v42 = vadd.f32 %v1425_v49, %v480_v51  ;;  %v894_v58 = vadd.f32 %v884_v54, %v5170_v36 }
 0x26f   :  { %v1407_v43 = vadd.f32 1.0, %v4677_v33  ;;  %v1487_v47 = vcombine.low %v1433_v44, %v1434_v32  ;;  %v495_v55 = vrot.slane %v5157_v28, %v4889_v23  ;;  %v502_v56 = vrot.slane %v488_v35, %v4889_v23 }
 0x270   :  { %v1471_v52 = vcombine.low %v1456_v26, %v1463_v38  ;;  %v1416_v25 = vmul.f32 0.5, %v1406_v9  ;;  %v870_v59 = vmul.f32 %v860_v31, %v5191_v14  ;;  %v1485_v0 = vrot.slane %v1470_v39, %v4889_v23 }
 0x271   :  { %v1417_v60 = vmul.f32 0.5, %v1407_v43  ;;  %v903_v41 = vmul.f32 0.7978846, %v893_v53  ;;  %v904_v57 = vmul.f32 0.7978846, %v894_v58  ;;  %v861_v2 = vmul.f32 %v5208_v50, %v5208_v50 }
 0x272   :  { %v1478_v62 = vrot.slane %v1471_v52, %v4889_v23  ;;  %v1426_v5 = vmul.f32 %v1416_v25, %v5140_v3  ;;  %v862_v28 = vmul.f32 %v5220_v46, %v5220_v46  ;;  %v880_v45 = vmul.f32 0.044715, %v870_v59 }
 0x273   :  { %v1427_v12 = vmul.f32 %v1417_v60, %v5145_v48  ;;  %v871_v17 = vmul.f32 %v861_v2, %v5208_v50  ;;  %4678 = vtanh.f32 %v903_v41  ;;  %v1495_v48 = vrot.slane %v1487_v47, %v4889_v23 }
 0x274   :  { %v1436_v35 = vadd.f32 %v1426_v5, %v495_v55  ;;  %v1486_v13 = vcombine.low %v1478_v62, %v1485_v0  ;;  %4680 = vtanh.f32 %v904_v57  ;;  %v872_v3 = vmul.f32 %v862_v28, %v5220_v46 }
 0x275   :  { %v1437_v63 = vadd.f32 %v1427_v12, %v502_v56  ;;  %v881_v54 = vmul.f32 0.044715, %v871_v17  ;;  %v890_v40 = vadd.f32 %v880_v45, %v5191_v14  ;;  %v948_v38 = vrot.slane %v5010_v6, %v4862_v8 }
 0x276   :  { %v1488_v22 = vcombine.low %v1435_v42, %v1436_v35  ;;  %v1528_v51 = vpack.c.bf16 %v1486_v13, %v1486_v13  ;;  %v882_v44 = vmul.f32 0.044715, %v872_v3 }
 0x277   :  { %v1509_v30 = vrot.slane %v1437_v63, %v4889_v23  ;;  %v891_v31 = vadd.f32 %v881_v54, %v5208_v50  ;;  %v900_v53 = vmul.f32 0.7978846, %v890_v40  ;;  %v957_v55 = vrot.slane %v948_v38, %v4889_v23 }
 0x278   :  { %v1502_v15 = vrot.slane %v1488_v22, %v4889_v23  ;;  %v1542_v61 = vrot.slane %v1528_v51, %v4889_v23  ;;  %v892_v26 = vadd.f32 %v882_v44, %v5220_v46  ;;  %v950_v13 = vcombine.high %v948_v38, %v948_v38 }
 0x279   :  { %v1524_v33 = vrot.slane %v1509_v30, %v4889_v23  ;;  %v901_v39 = vmul.f32 0.7978846, %v891_v31  ;;  %4682 = vtanh.f32 %v900_v53  ;;  %v965_v41 = vcombine.high %v957_v55, %v957_v55 }
 0x27a   :  { %v1510_v49 = vcombine.low %v1495_v48, %v1502_v15  ;;  %v902_v9 = vmul.f32 0.7978846, %v892_v26  ;;  %v1550_v58 = vrot.slane %v1542_v61, %v4889_v23  ;;  %v1543_v43 = vcombine.high %v1542_v61, %v1542_v61 }
 0x27b   :  { %4684 = vtanh.f32 %v901_v39  ;;  %v5258_v48 = vrot.slane %v965_v41, %v4889_v23  ;;  %v5261_v31 = vrot.slane %v957_v55, %v4889_v23  ;;  %v964_v53 = vrot.slane %v950_v13, %v4889_v23 }
 0x27c   :  { %v1517_v32 = vrot.slane %v1510_v49, %v4889_v23  ;;  %4686 = vtanh.f32 %v902_v9  ;;  %v1558_v59 = vcombine.high %v1550_v58, %v1550_v58  ;;  %v1557_v60 = vrot.slane %v1543_v43, %v4889_v23 }
 0x27d   :  { %v4679_v47 = vpop.eup %4678  ;;  %5991 = vst [vmem:[#allocation8_spill] sm:$0xff] %v5261_v31 }
 0x27e   :  { %v1525_v42 = vcombine.low %v1517_v32, %v1524_v33  ;;  %v4681_v25 = vpop.eup %4680  ;;  %v923_v5 = vadd.f32 1.0, %v4679_v47  ;;  %v1637_v45 = vcombine.low %v1550_v58, %v1557_v60  ;;  %v5271_v58 = vcombine.high %v5258_v48, %v5258_v48 }
 0x27f   :  { %v924_v57 = vadd.f32 1.0, %v4681_v25 }
 0x280   :  { %v1529_v52 = vpack.c.bf16 %v1525_v42, %v1525_v42  ;;  %v933_v15 = vmul.f32 0.5, %v923_v5  ;;  %v1645_v26 = vrot.slane %v1637_v45, %v4889_v23 }
 0x281   :  { %v934_v30 = vmul.f32 0.5, %v924_v57 }
 0x282   :  { %v1565_v56 = vrot.slane %v1529_v52, %v4889_v23  ;;  %v943_v42 = vmul.f32 %v933_v15, %v5166_v37 }
 0x283   :  { %v4683_v35 = vpop.eup %4682  ;;  %v944_v47 = vmul.f32 %v934_v30, %v5170_v36  ;;  %v182_v30 = vpop.xlane.xlu0 %181 }
 0x284   :  { %v1566_v62 = vcombine.high %v1565_v56, %v1565_v56  ;;  %v1573_v0 = vrot.slane %v1565_v56, %v4889_v23  ;;  %v920_v51 = vadd.f32 1.0, %v4683_v35  ;;  %v5277_v56 = vrot.slane %v964_v53, %v4889_v23 }
 0x285   :  { %v4685_v3 = vpop.eup %4684 }
 0x286   :  { %v1580_v12 = vrot.slane %v1566_v62, %v4889_v23  ;;  %v1588_v2 = vunpack.i.h.s16 %v1573_v0  ;;  %v4345_v28 = vpack.i.b16 %v1573_v0, %v1558_v59  ;;  %v1581_v63 = vcombine.high %v1573_v0, %v1573_v0  ;;  %v4687_v54 = vpop.eup %4686  ;;  %5992 = vst [vmem:[#allocation9_spill] sm:$0xff] %v5277_v56 }
 0x287   :  { %v921_v49 = vadd.f32 1.0, %v4685_v3  ;;  %v930_v61 = vmul.f32 0.5, %v920_v51  ;;  %v922_v32 = vadd.f32 1.0, %v4687_v54  ;;  %v1002_v62 = vmul.f32 %v5271_v58, %v943_v42 }
 0x288   :  { %v1590_v17 = vunpack.i.h.s16 %v1580_v12  ;;  %v4346_v22 = vpack.i.b16 %v1580_v12, %v1588_v2  ;;  %v1003_v0 = vmul.f32 %v5277_v56, %v944_v47  ;;  %v5315_v51 = vsub.s32 %v2105_v19, %v4847_v4 }
 0x289   :  { %v931_v39 = vmul.f32 0.5, %v921_v49  ;;  %v940_v9 = vmul.f32 %v930_v61, %v5191_v14  ;;  %v932_v43 = vmul.f32 0.5, %v922_v32  ;;  %v5281_v14 = vcombine.high %v5261_v31, %v5261_v31 }
 0x28a   :  { %v4347_v44 = vpack.i.b16 %v1581_v63, %v1590_v17  ;;  %v1638_v40 = vcombine.low %v4345_v28, %v4346_v22  ;;  %v1075_v2 = vrot.slane %v1003_v0, %v4889_v23  ;;  %v172_v63 = vpop.xlane.xlu1 %171  ;;  %v2112_v17 = vadd.s32 4294967280, %v4876_v16  ;;  %5997 = vst [vmem:[#allocation14_spill] sm:$0xff] %v5315_v51 }
 0x28b   :  { %v941_v25 = vmul.f32 %v931_v39, %v5208_v50  ;;  %v999_v55 = vmul.f32 %v5261_v31, %v940_v9  ;;  %5993 = vst [vmem:[#allocation10_spill] sm:$0xff] %v5281_v14  ;;  %v942_v37 = vmul.f32 %v932_v43, %v5220_v46  ;;  %v5312_v22 = vsub.s32 %v4876_v16, %v4847_v4 }
 0x28c   :  { %v1652_v33 = vrot.slane %v1638_v40, %v4889_v23  ;;  %v1659_v38 = vrot.slane %v4347_v44, %v4889_v23  ;;  %v5302_v13 = vrot.slane %v1075_v2, %v4889_v23  ;;  %v2115_v15 = vsub.s32 %v2112_v17, %v4847_v4 }
 0x28d   :  { %v1000_v36 = vmul.f32 %v5258_v48, %v941_v25  ;;  %v1001_v50 = vmul.f32 %v5281_v14, %v942_v37  ;;  %5996 = vst [vmem:[#allocation13_spill] sm:$0xff] %v5312_v22  ;;  %v2104_v54 = vrot.slane %v172_v63, %v5312_v22  ;;  %v2122_v49 = vrot.slane %v182_v30, %v5312_v22 }
 0x28e   :  { %v1660_v52 = vcombine.low %v1645_v26, %v1652_v33  ;;  %v1674_v60 = vrot.slane %v1659_v38, %v4889_v23  ;;  %5995 = vst [vmem:[#allocation12_spill] sm:$0xff] %v5302_v13  ;;  %v2094_v9 = vsub.f32 1.0, %v4331_v18 }
 0x28f   :  { %v1053_v5 = vcombine.low %v999_v55, %v1000_v36  ;;  %v1054_v57 = vcombine.low %v1001_v50, %v1002_v62  ;;  %v1532_v55 = vsub.s32 3, %v4847_v4 }
 0x290   :  { %v1667_v59 = vrot.slane %v1660_v52, %v4889_v23 }
 0x291   :  { %v1061_v46 = vrot.slane %v1053_v5, %v4889_v23  ;;  %v1068_v12 = vrot.slane %v1054_v57, %v4889_v23  ;;  %v1533_v37 = vrot.slane %v5010_v6, %v1532_v55 }
 0x292   :  { %v1675_v41 = vcombine.low %v1667_v59, %v1674_v60 }
 0x293   :  { %v1076_v28 = vcombine.low %v1061_v46, %v1068_v12  ;;  %v1593_v59 = vcombine.high %v1533_v37, %v1533_v37  ;;  %v1600_v60 = vrot.slane %v1533_v37, %v4889_v23 }
 0x294   :  { %4513 = vmatmul.mubr.msk.bf16.vlgmr.msra.gmra.mrb[12].mxu1 %vm1742_vm14, %v1675_v41 }
 0x295   :  { %4524 = vmatprep.mubr.msk.bf16.mxu1 %vm169_vm6, %v1862_v24  ;;  %v5299_v35 = vrot.slane %v1076_v28, %v4889_v23  ;;  %v175_v24 = vpop.xlane.xlu1 %174  ;;  %v1607_v36 = vrot.slane %v1593_v59, %v4889_v23  ;;  %v1608_v50 = vcombine.high %v1600_v60, %v1600_v60  ;;  %v1615_v62 = vrot.slane %v1600_v60, %v4889_v23 }
 0x296   :  { %v2109_v44 = vrot.slane %v175_v24, %v5315_v51 }
 0x297   :  { %5994 = vst [vmem:[#allocation11_spill] sm:$0xff] %v5299_v35  ;;  %v1629_v0 = vrot.slane %v1608_v50, %v4889_v23  ;;  %v1630_v41 = vcombine.high %v1615_v62, %v1615_v62 }
 0x298   :  { %v2111_v53 = vsel %vm2110_vm1, %v2109_v44, %v2104_v54 }
 0x299   :  { %v179_v3 = vpop.xlane.xlu1 %178  ;;  %v1676_v5 = vcombine.low %v1615_v62, %v1629_v0  ;;  %v4348_v57 = vcombine.high %v1615_v62, %v1629_v0  ;;  %v1679_v12 = vcombine.low %v1629_v0, %v1630_v41  ;;  %v1631_v19 = vcombine.high %v1629_v0, %v1629_v0 }
 0x29a   :  { %v2116_v61 = vrot.slane %v179_v3, %v2115_v15 }
 0x29b   :  { %v1686_v2 = vrot.slane %v1676_v5, %v4889_v23  ;;  %v1693_v28 = vrot.slane %v4348_v57, %v4889_v23 }
 0x29c   :  { %v2118_v38 = vsel %vm2117_vm2, %v2116_v61, %v2111_v53 }
 0x29d   :  { %v185_v40 = vpop.xlane.xlu1 %184  ;;  %v1708_v24 = vcombine.low %v1686_v2, %v1693_v28 }
 0x29e   :  { %v2126_v26 = vrot.slane %v185_v40, %v5315_v51 }
 0x2a0   :  { %v2127_v32 = vsel %vm2110_vm1, %v2126_v26, %v2122_v49 }
 0x2a1   :  { %v188_v33 = vpop.xlane.xlu1 %187 }
 0x2a2   :  { %v2131_v39 = vrot.slane %v188_v33, %v2115_v15  ;;  %v1716_v15 = vrot.slane %v1708_v24, %v4889_v23 }
 0x2a4   :  { %v2132_v42 = vsel %vm2117_vm2, %v2131_v39, %v2127_v32 }
 0x2a5   :  { %v2134_v43 = vsel %vm2133_vm3, %v2132_v42, %v2118_v38 }
 0x2a6   :  { %v2136_v47 = vsub.f32 %v2094_v9, %v2134_v43 }
 0x2a8   :  { %v2140_v52 = vrot.slane %v2136_v47, %v4859_v7  ;;  %v2155_v25 = vrot.slane %v2136_v47, %v4862_v8  ;;  %v1622_v8 = vrot.slane %v1607_v36, %v4889_v23 }
 0x2aa   :  { %2146 = vbcast.lane.b32.xlu1 %v2140_v52, 264  ;;  %2142 = vbcast.lane.b32.xlu0 %v2140_v52, 256  ;;  %v1678_v46 = vcombine.low %v1622_v8, %v1615_v62  ;;  %v1725_v3 = vcombine.low %v1631_v19, %v1622_v8 }
 0x2ac   :  { %v1700_v63 = vrot.slane %v1678_v46, %v4889_v23  ;;  %v1732_v54 = vrot.slane %v1725_v3, %v4889_v23 }
 0x2ae   :  { %2157 = vbcast.lane.b32.xlu1 %v2155_v25, 256  ;;  %2165 = vbcast.lane.b32.xlu0 %v2155_v25, 272  ;;  %v1739_v40 = vrot.slane %v1732_v54, %v4889_v23 }
 0x2b2   :  { %2161 = vbcast.lane.b32.xlu1 %v2155_v25, 264 }
 0x2b6   :  { %2079 = vbcast.lane.b32.xlu1 %v4331_v18, 272  ;;  %v1707_v18 = vrot.slane %v1679_v12, %v4889_v23 }
 0x2b8   :  { %v1709_v17 = vcombine.low %v1700_v63, %v1707_v18  ;;  %v4806_v63 = vmov 65535  }
 0x2b9   :  { %v1954_v18 = vsel %vm1952_vm7, 4294967295, %v4806_v63 }
 0x2ba   :  { %2150 = vbcast.lane.b32.xlu1 %v2140_v52, 272  ;;  %v1723_v30 = vrot.slane %v1709_v17, %v4889_v23  ;;  %v1955_v54 = vsel %vm1953_vm8, %v1954_v18, 0 }
 0x2bc   :  { %v1724_v44 = vcombine.low %v1716_v15, %v1723_v30 }
 0x367   :  { %v1780_v49 = vpop.f32.mrb[12].mxu1 }
 0x368   :  { %v1781_v61 = vadd.f32 %v1780_v49, %v1724_v44  ;;  %v4514_v26 = vpop.f32.mrb[13].mxu1 }
 0x369   :  { %v1783_v53 = vpop.f32.mrb[14].mxu1 }
 0x36a   :  { %v1789_v32 = vcombine.high %v1781_v61, %v1781_v61  ;;  %v1796_v33 = vrot.slane %v1781_v61, %v4889_v23  ;;  %v1784_v38 = vadd.f32 %v1783_v53, %v1739_v40  ;;  %v4515_v39 = vpop.f32.mrb[15].mxu1  ;;  %v1861_v53 = vpack.c.bf16 %v5026_v20, %v5026_v20  ;;  %v52_v20 = vld [vmem:[%s5972_s2 + $0x80] sm:$0xff] }
 0x36b   :  { %v53_v39 = vld [vmem:[%s5972_s2 + $0x88] sm:$0xff] }
 0x36c   :  { %v1803_v9 = vrot.slane %v1789_v32, %v4889_v23  ;;  %v1804_v42 = vcombine.high %v1796_v33, %v1796_v33  ;;  %v1844_v43 = vrot.slane %v1784_v38, %v4889_v23  ;;  %v1812_v47 = vrot.slane %v1796_v33, %v4889_v23 }
 0x36d   :  { %v1863_v38 = vpack.c.bf16 %v5040_v34, %v5040_v34  ;;  %v56_v34 = vpack.c.bf16 %v53_v39, %v52_v20 }
 0x36e   :  { %v1805_v52 = vcombine.high %v1803_v9, %v1803_v9  ;;  %v1819_v25 = vrot.slane %v1803_v9, %v4889_v23  ;;  %v1826_v55 = vrot.slane %v1804_v42, %v4889_v23  ;;  %v1845_v37 = vcombine.high %v1844_v43, %v1844_v43  ;;  %v54_v9 = vld [vmem:[%s5972_s2 + $0x90] sm:$0xff]  ;;  %v55_v42 = vld [vmem:[%s5972_s2 + $0x98] sm:$0xff] }
 0x36f   :  { %v1852_v8 = vrot.slane %v1844_v43, %v4889_v23  ;;  %v57_v43 = vpack.c.bf16 %v55_v42, %v54_v9 }
 0x370   :  { %v1833_v59 = vrot.slane %v1805_v52, %v4889_v23  ;;  %v1835_v60 = vcombine.high %v1819_v25, %v1819_v25  ;;  %v1864_v36 = vcombine.low %v1812_v47, %v1826_v55  ;;  %v4350_v50 = vcombine.high %v1812_v47, %v1826_v55  ;;  %v2072_v47 = vpop.permute.xlu1 %2071 }
 0x371   :  { %v1886_v62 = vrot.slane %v1819_v25, %v4889_v23  ;;  %v1859_v0 = vrot.slane %v1845_v37, %v4889_v23  ;;  %v2083_v37 = vsub.s32 5, %v4847_v4 }
 0x372   :  { %v1872_v41 = vrot.slane %v1864_v36, %v4889_v23  ;;  %v1879_v5 = vrot.slane %v4350_v50, %v4889_v23  ;;  %v1903_v57 = vcombine.low %v1833_v59, %v1835_v60  ;;  %v1837_v46 = vcombine.high %v1833_v59, %v1833_v59  ;;  %v66_v50 = vld [vmem:[%s5972_s2 + $0xd0] sm:$0xff] }
 0x373   :  { %v1925_v28 = vrot.slane %v1859_v0, %v4889_v23  ;;  %v1901_v17 = vrot.slane %v1886_v62, %v4889_v23  ;;  %v2084_v60 = vrot.slane %v5010_v6, %v2083_v37  ;;  %v2169_v36 = vsub.s32 4, %v4847_v4  ;;  %v68_v0 = vld [vmem:[%s5972_s2 + $0xe0] sm:$0x1]  ;;  %v4778_v6 = vld [vmem:[%s5972_s2 + $0xe8] sm:$0xff] }
 0x374   :  { %v1904_v12 = vcombine.low %v1837_v46, %v1852_v8  ;;  %v1887_v2 = vcombine.low %v1872_v41, %v1879_v5  ;;  %v1911_v3 = vrot.slane %v1903_v57, %v4889_v23  ;;  %v2076_v52 = vpop.permute.xlu1 %2075  ;;  %v67_v5 = vld [vmem:[%s5972_s2 + $0xd8] sm:$0xff] }
 0x375   :  { %v1940_v49 = vrot.slane %v1925_v28, %v4889_v23  ;;  %v2085_v57 = vmul.f32 %v2084_v60, %v2072_v47  ;;  %v2170_v46 = vrot.slane %v4778_v6, %v2169_v36  ;;  %v2086_v63 = vmul.f32 %v2084_v60, %v2076_v52 }
 0x376   :  { %v1918_v19 = vrot.slane %v1904_v12, %v4889_v23  ;;  %v1894_v24 = vrot.slane %v1887_v2, %v4889_v23  ;;  %v2143_v12 = vpop.permute.xlu0 %2142 }
 0x378   :  { %v1902_v15 = vcombine.low %v1894_v24, %v1901_v17  ;;  %v1926_v30 = vcombine.low %v1911_v3, %v1918_v19  ;;  %v2147_v25 = vpop.permute.xlu1 %2146 }
 0x37a   :  { %v1944_v44 = vpack.c.bf16 %v1902_v15, %v1902_v15  ;;  %v1933_v40 = vrot.slane %v1926_v30, %v4889_v23 }
 0x37c   :  { %v1957_v61 = vand.u32 %v1955_v54, %v1944_v44  ;;  %v1941_v26 = vcombine.low %v1933_v40, %v1940_v49  ;;  %v2158_v55 = vpop.permute.xlu1 %2157  ;;  %v2172_v44 = vmul.f32 %v2170_v46, %v2147_v25  ;;  %v2171_v40 = vmul.f32 %v2170_v46, %v2143_v12 }
 0x37d   :  { %v2174_v37 = vmul.f32 %v2170_v46, %v2158_v55 }
 0x37e   :  { %4516 = vmatprep.subr.bf16.mxu0 %v1957_v61  ;;  %v1945_v32 = vpack.c.bf16 %v1941_v26, %v1941_v26 }
 0x37f   :  { %4517 = vmatpush3.bf16.msra.mxu0 %v1957_v61 }
 0x380   :  { %v2014_v33 = vand.u32 %v1955_v54, %v1945_v32  ;;  %4528 = vmatprep.subr.bf16.mxu0 %v56_v34  ;;  %v2162_v59 = vpop.permute.xlu1 %2161 }
 0x382   :  { %4519 = vmatmul.mubr.msk.bf16.vlgmr.msra.gmra.mrb[8].mxu0 %vm169_vm6, %v1861_v53  ;;  %4522 = vmatprep.subr.bf16.mxu1 %v2014_v33 }
 0x383   :  { %4523 = vmatpush3.bf16.msra.mxu1 %v2014_v33  ;;  %4529 = vmatpush3.bf16.msra.mxu0 %v56_v34  ;;  %v2166_v33 = vpop.permute.xlu0 %2165 }
 0x384   :  { %4536 = vmatprep.subr.bf16.mxu1 %v5976_v1  ;;  %4530 = vmatprep.subr.bf16.mxu0 %v57_v43  ;;  %v2080_v8 = vpop.permute.xlu1 %2079 }
 0x385   :  { %v2087_v19 = vmul.f32 %v2084_v60, %v2080_v8  ;;  %v2176_v60 = vmul.f32 %v2170_v46, %v2166_v33 }
 0x386   :  { %4525 = vmatmul.mubr.msk.bf16.vlgmr.msra.gmra.mrb[16].mxu1 %vm169_vm6, %v1863_v38  ;;  %vm3099_vm6 = vcmask 138240  }
 0x387   :  { %4540 = vmatprep.mubr.msk.bf16.mxu1 %vm4804_vm0, %v5976_v1  ;;  %4531 = vmatpush3.bf16.msra.mxu0 %v57_v43  ;;  %v2175_v43 = vmul.f32 %v2170_v46, %v2162_v59 }
 0x388   :  { %4544 = vmatprep.subr.bf16.mxu0 %v5976_v1  ;;  %v2151_v53 = vpop.permute.xlu1 %2150 }
 0x389   :  { %v2173_v47 = vmul.f32 %v2170_v46, %v2151_v53 }
 0x455   :  { %v4520_v62 = vpop.f32.mrb[8].mxu0 }
 0x456   :  { %v1993_v41 = vpop.f32.mrb[9].mxu0  ;;  %v2066_v24 = vadd.f32 %v4520_v62, %v68_v0 }
 0x457   :  { %v2064_v2 = vadd.f32 %v1993_v41, %v66_v50  ;;  %v4521_v28 = vpop.f32.mrb[10].mxu0 }
 0x458   :  { %v1996_v18 = vpop.f32.mrb[11].mxu0  ;;  %v2090_v38 = vadd.f32 %v2087_v19, %v2066_v24 }
 0x459   :  { %v2088_v17 = vadd.f32 %v2085_v57, %v2064_v2  ;;  %v2065_v3 = vadd.f32 %v1996_v18, %v67_v5  ;;  %v4526_v15 = vpop.f32.mrb[16].mxu1 }
 0x45a   :  { %v2069_v30 = vadd.f32 %v4526_v15, %v68_v0  ;;  %v2050_v54 = vpop.f32.mrb[17].mxu1  ;;  %v2179_v36 = vadd.f32 %v2173_v47, %v2090_v38 }
 0x45b   :  { %v2089_v49 = vadd.f32 %v2086_v63, %v2065_v3  ;;  %v2067_v61 = vadd.f32 %v2050_v54, %v66_v50  ;;  %v4527_v26 = vpop.f32.mrb[18].mxu1  ;;  %v2177_v20 = vadd.f32 %v2171_v40, %v2088_v17 }
 0x45c   :  { %v2053_v32 = vpop.f32.mrb[19].mxu1  ;;  %v2093_v9 = vadd.f32 %v2087_v19, %v2069_v30 }
 0x45d   :  { %v5399_v39 = vadd.f32 %v2172_v44, %v2089_v49  ;;  %v2068_v34 = vadd.f32 %v2053_v32, %v67_v5  ;;  %v2091_v42 = vadd.f32 %v2085_v57, %v2067_v61  ;;  %v2184_v5 = vpack.c.bf16 %v2179_v36, %v2179_v36 }
 0x45e   :  { %v2182_v8 = vadd.f32 %v2176_v60, %v2093_v9 }
 0x45f   :  { %v5402_v52 = vpack.c.bf16 %v5399_v39, %v2177_v20  ;;  %v2092_v25 = vadd.f32 %v2086_v63, %v2068_v34  ;;  %v2180_v0 = vadd.f32 %v2174_v37, %v2091_v42  ;;  %v2397_v18 = vrot.slane %v2184_v5, %v4889_v23 }
 0x460   :  { %v2186_v57 = vpack.c.bf16 %v2182_v8, %v2182_v8  ;;  %v2248_v19 = vsel %vm1742_vm14, %v2184_v5, 0 }
 0x461   :  { %v2181_v50 = vadd.f32 %v2175_v43, %v2092_v25  ;;  %4532 = vmatprep.mubr.msk.bf16.mxu0 %vm1742_vm14, %v5402_v52  ;;  %v2188_v62 = vsel %vm1742_vm14, %v5402_v52, 0  ;;  %v2404_v53 = vrot.slane %v2397_v18, %v4889_v23 }
 0x462   :  { %4537 = vmatpush3.bf16.xpose.msra.mxu1 %v2188_v62  ;;  %v2460_v24 = vrot.slane %v2186_v57, %v4889_v23  ;;  %v2295_v32 = vsel %vm1742_vm14, %v2186_v57, 0 }
 0x463   :  { %4538 = vmatprep.subr.bf16.mxu1 %v5976_v1  ;;  %v5409_v59 = vpack.c.bf16 %v2181_v50, %v2180_v0  ;;  %v4360_v41 = vpack.c.bf16 %v2181_v50, %v2181_v50 }
 0x464   :  { %v2467_v38 = vrot.slane %v2460_v24, %v4889_v23  ;;  %v2349_v24 = vrot.slane %v5402_v52, %v4889_v23 }
 0x465   :  { %v2412_v55 = vrot.slane %v5409_v59, %v4889_v23  ;;  %v2419_v6 = vrot.slane %v4360_v41, %v4889_v23  ;;  %4533 = vmatmul.mubr.msk.bf16.vlgmr.msra.gmra.mrb[12].mxu0 %vm1742_vm14, %v5409_v59  ;;  %v2191_v46 = vsel %vm1742_vm14, %v5409_v59, 0 }
 0x466   :  { %4545 = vmatpush3.bf16.xpose.msra.mxu0 %v2191_v46  ;;  %4548 = vmatprep.mubr.msk.bf16.mxu0 %vm4804_vm0, %v5976_v1 }
 0x467   :  { %v2420_v12 = vcombine.high %v2412_v55, %v2412_v55  ;;  %v2421_v2 = vcombine.high %v2419_v6, %v2419_v6  ;;  %v2428_v28 = vrot.slane %v2412_v55, %v4889_v23  ;;  %v2435_v63 = vrot.slane %v2419_v6, %v4889_v23  ;;  %4546 = vmatprep.subr.bf16.mxu0 %v5976_v1 }
 0x469   :  { %v2442_v17 = vrot.slane %v2420_v12, %v4889_v23  ;;  %v2449_v3 = vrot.slane %v2421_v2, %v4889_v23  ;;  %v2451_v15 = vcombine.high %v2435_v63, %v2435_v63  ;;  %v2494_v30 = vunpack.i.h.s16 %v2435_v63 }
 0x46a   :  { %4539 = vmatpush3.bf16.xpose.msra.mxu1 %v2248_v19  ;;  %v2450_v54 = vcombine.high %v2428_v28, %v2428_v28  ;;  %v2486_v44 = vunpack.i.h.s16 %v2428_v28  ;;  %v4361_v42 = vpack.i.b16 %v2428_v28, %v2404_v53  ;;  %v4359_v19 = vpack.c.bf16 %v5399_v39, %v5399_v39 }
 0x46b   :  { %4552 = vmatprep.subr.bf16.mxu1 %v5976_v1  ;;  %v2452_v40 = vcombine.high %v2442_v17, %v2442_v17  ;;  %v2453_v49 = vcombine.high %v2449_v3, %v2449_v3  ;;  %v2496_v61 = vunpack.i.h.s16 %v2449_v3  ;;  %v2498_v26 = vunpack.i.h.s16 %v2451_v15 }
 0x46c   :  { %v2488_v33 = vunpack.i.h.s16 %v2442_v17  ;;  %v2490_v9 = vunpack.i.h.s16 %v2450_v54  ;;  %v4362_v43 = vpack.i.b16 %v2442_v17, %v2486_v44  ;;  %v4366_v60 = vpack.i.b16 %v2449_v3, %v2494_v30 }
 0x46d   :  { %v2492_v20 = vunpack.i.h.s16 %v2452_v40  ;;  %v4367_v34 = vpack.i.b16 %v2451_v15, %v2496_v61  ;;  %v4368_v25 = vpack.i.b16 %v2453_v49, %v2498_v26  ;;  %v2500_v50 = vunpack.i.h.s16 %v2453_v49 }
 0x46e   :  { %4547 = vmatpush3.bf16.xpose.msra.mxu0 %v2295_v32  ;;  %v4363_v47 = vpack.i.b16 %v2450_v54, %v2488_v33  ;;  %v4364_v36 = vpack.i.b16 %v2452_v40, %v2490_v9  ;;  %v2568_v62 = vcombine.low %v4361_v42, %v4362_v43  ;;  %v2356_v17 = vrot.slane %v4359_v19, %v4889_v23 }
 0x46f   :  { %v4365_v37 = vpack.i.b16 %v2435_v63, %v2492_v20  ;;  %4568 = vmatprep.subr.bf16.mxu0 %v5976_v1  ;;  %v2571_v8 = vcombine.low %v4367_v34, %v4368_v25  ;;  %v4369_v5 = vpack.i.b16 %v2467_v38, %v2500_v50  ;;  %v2357_v3 = vcombine.high %v2349_v24, %v2349_v24  ;;  %v58_v38 = vld [vmem:[%s5972_s2 + $0xa0] sm:$0xff]  ;;  %v59_v20 = vld [vmem:[%s5972_s2 + $0xa8] sm:$0xff]  ;;  %v61_v50 = vld [vmem:[%s5972_s2 + $0xb8] sm:$0xff] }
 0x470   :  { %v2569_v0 = vcombine.low %v4363_v47, %v4364_v36  ;;  %v2578_v57 = vrot.slane %v2568_v62, %v4889_v23  ;;  %v2358_v15 = vcombine.high %v2356_v17, %v2356_v17  ;;  %v2365_v44 = vrot.slane %v2349_v24, %v4889_v23  ;;  %v60_v36 = vld [vmem:[%s5972_s2 + $0xb0] sm:$0xff] }
 0x471   :  { %v2570_v41 = vcombine.low %v4365_v37, %v4366_v60  ;;  %v2599_v46 = vrot.slane %v2571_v8, %v4889_v23  ;;  %v2379_v30 = vrot.slane %v2357_v3, %v4889_v23  ;;  %v2372_v40 = vrot.slane %v2356_v17, %v4889_v23 }
 0x472   :  { %v2585_v55 = vrot.slane %v2569_v0, %v4889_v23  ;;  %v2386_v54 = vrot.slane %v2358_v15, %v4889_v23  ;;  %v62_v37 = vpack.c.bf16 %v59_v20, %v58_v38  ;;  %v63_v0 = vpack.c.bf16 %v61_v50, %v60_v36 }
 0x473   :  { %v2592_v6 = vrot.slane %v2570_v41, %v4889_v23  ;;  %v2519_v49 = vcombine.low %v2365_v44, %v2379_v30  ;;  %v4370_v61 = vcombine.high %v2365_v44, %v2379_v30  ;;  %v2921_v24 = vcombine.high %v4886_v21, %v4886_v21 }
 0x474   :  { %v2600_v12 = vcombine.low %v2578_v57, %v2585_v55  ;;  %v2521_v26 = vcombine.low %v2372_v40, %v2386_v54  ;;  %v4371_v53 = vcombine.high %v2372_v40, %v2386_v54  ;;  %v2960_v15 = vcombine.high %v4899_v27, %v4899_v27 }
 0x475   :  { %v2601_v2 = vcombine.low %v2592_v6, %v2599_v46  ;;  %v2529_v34 = vrot.slane %v2519_v49, %v4889_v23  ;;  %v2536_v9 = vrot.slane %v4370_v61, %v4889_v23  ;;  %v2623_v6 = vrot.slane %v4369_v5, %v4889_v23 }
 0x476   :  { %v2608_v28 = vrot.slane %v2600_v12, %v4889_v23  ;;  %v2543_v39 = vrot.slane %v2521_v26, %v4889_v23  ;;  %v2550_v32 = vrot.slane %v4371_v53, %v4889_v23  ;;  %v4807_v12 = vmov 0  }
 0x477   :  { %v2615_v63 = vrot.slane %v2601_v2, %v4889_v23  ;;  %v2551_v62 = vcombine.low %v2529_v34, %v2536_v9  ;;  %v2630_v46 = vrot.slane %v2623_v6, %v4889_v23  ;;  %4656 = vset.pattern.permute.xlu1 %v4807_v12  ;;  %4657 = vset.pattern.permute.xlu0 %v4807_v12 }
 0x478   :  { %v2552_v8 = vcombine.low %v2543_v39, %v2550_v32  ;;  %v2967_v2 = vrot.slane %v4899_v27, %v4889_v23  ;;  %v2935_v44 = vrot.slane %v2921_v24, %v4889_v23  ;;  %v2974_v39 = vrot.slane %v2960_v15, %v4889_v23 }
 0x479   :  { %v2616_v18 = vcombine.low %v2608_v28, %v2615_v63  ;;  %v2559_v41 = vrot.slane %v2551_v62, %v4889_v23  ;;  %v2928_v28 = vrot.slane %v4886_v21, %v4889_v23 }
 0x47a   :  { %v2566_v57 = vrot.slane %v2552_v8, %v4889_v23  ;;  %v2975_v63 = vcombine.high %v2967_v2, %v2967_v2  ;;  %v2950_v9 = vrot.slane %v2935_v44, %v4889_v23 }
 0x47b   :  { %v2936_v5 = vcombine.high %v2928_v28, %v2928_v28  ;;  %v2943_v17 = vrot.slane %v2928_v28, %v4889_v23 }
 0x47c   :  { %v2567_v55 = vcombine.low %v2559_v41, %v2566_v57  ;;  %v2996_v19 = vrot.slane %v2975_v63, %v4889_v23  ;;  %v3013_v8 = vmul.f32 -1e+09, %v2950_v9 }
 0x47d   :  { %v2957_v3 = vrot.slane %v2936_v5, %v4889_v23  ;;  %v2958_v40 = vcombine.high %v2943_v17, %v2943_v17  ;;  %v3009_v61 = vmul.f32 -1e+09, %v2943_v17 }
 0x47e   :  { %v2998_v54 = vcombine.high %v2996_v19, %v2996_v19  ;;  %v3015_v32 = vmul.f32 -1e+09, %v2996_v19 }
 0x47f   :  { %v2959_v49 = vcombine.high %v2957_v3, %v2957_v3  ;;  %v3010_v26 = vmul.f32 -1e+09, %v2957_v3  ;;  %v3011_v20 = vmul.f32 -1e+09, %v2958_v40  ;;  %v3032_v27 = vrot.slane %v3009_v61, %v4859_v7 }
 0x480   :  { %v3017_v38 = vmul.f32 -1e+09, %v2998_v54 }
 0x481   :  { %v3012_v34 = vmul.f32 -1e+09, %v2959_v49  ;;  %v3040_v50 = vrot.slane %v3011_v20, %v4859_v7 }
 0x483   :  { %v3044_v62 = vrot.slane %v3012_v34, %v4859_v7 }
 0x538   :  { %v4534_v33 = vpop.f32.mrb[12].mxu0 }
 0x539   :  { %v2227_v42 = vpop.f32.mrb[13].mxu0 }
 0x53a   :  { %v4535_v43 = vpop.f32.mrb[14].mxu0 }
 0x53b   :  { %v2243_v47 = vpack.c.bf16 %v4535_v43, %v4534_v33  ;;  %v2230_v25 = vpop.f32.mrb[15].mxu0 }
 0x53c   :  { %v2242_v60 = vpack.c.bf16 %v2230_v25, %v2227_v42  ;;  %v3036_v42 = vrot.slane %v3010_v26, %v4859_v7 }
 0x53d   :  { %4549 = vmatmul.mubr.msk.bf16.vlgmr.msra.gmra.mrb[16].mxu0 %vm1742_vm14, %v2243_v47  ;;  %v3056_v47 = vrot.slane %v3015_v32, %v4859_v7 }
 0x53e   :  { %4541 = vmatmul.mubr.msk.bf16.vlgmr.msra.gmra.mrb[20].mxu1 %vm1742_vm14, %v2242_v60  ;;  %4572 = vmatprep.mubr.msk.bf16.mxu0 %vm4804_vm0, %v5976_v1  ;;  %v2989_v60 = vrot.slane %v2974_v39, %v4889_v23 }
 0x53f   :  { %4553 = vmatpush3.bf16.msra.mxu1 %v62_v37  ;;  %4556 = vmatprep.mubr.msk.bf16.mxu1 %vm4804_vm0, %v5976_v1  ;;  %v3064_v37 = vrot.slane %v3017_v38, %v4859_v7 }
 0x540   :  { %4554 = vmatprep.subr.bf16.mxu1 %v5976_v1 }
 0x543   :  { %4555 = vmatpush3.bf16.msra.mxu1 %v63_v0 }
 0x544   :  { %4592 = vmatprep.subr.bf16.mxu1 %v5976_v1 }
 0x546   :  { %4557 = vmatmul.mubr.msk.bf16.vlgmr.msra.gmra.mrb[24].mxu1 %vm1742_vm14, %v2567_v55 }
 0x547   :  { %4560 = vmatprep.mubr.msk.bf16.mxu1 %vm4804_vm0, %v5976_v1 }
 0x54e   :  { %4561 = vmatmul.mubr.msk.bf16.gmra.mrb[28].mxu1 %vm1742_vm14, %v2616_v18  ;;  %v2982_v18 = vrot.slane %v2967_v2, %v4889_v23 }
 0x54f   :  { %4564 = vmatprep.mubr.msk.bf16.mxu1 %vm4804_vm0, %v5976_v1 }
 0x550   :  { %v2997_v30 = vcombine.high %v2982_v18, %v2982_v18  ;;  %v3014_v53 = vmul.f32 -1e+09, %v2982_v18 }
 0x552   :  { %v3016_v33 = vmul.f32 -1e+09, %v2997_v30  ;;  %v3052_v43 = vrot.slane %v3014_v53, %v4859_v7  ;;  %v3018_v30 = vmul.f32 -1e+09, %v2989_v60  ;;  %v3048_v53 = vrot.slane %v3013_v8, %v4859_v7 }
 0x554   :  { %v3060_v25 = vrot.slane %v3016_v33, %v4859_v7  ;;  %v3068_v38 = vrot.slane %v3018_v30, %v4859_v7 }
 0x556   :  { %4565 = vmatmul.mubr.msk.bf16.gmra.mrb[32].mxu1 %vm1742_vm14, %v2630_v46 }
 0x557   :  { %4596 = vmatprep.mubr.msk.bf16.mxu1 %vm4804_vm0, %v5976_v1 }
 0x610   :  { %v2331_v36 = vpop.f32.mrb[16].mxu0 }
 0x611   :  { %v2284_v0 = vpop.f32.mrb[20].mxu1  ;;  %v4550_v41 = vpop.f32.mrb[17].mxu0  ;;  %v5511_v57 = vadd.f32 %v3052_v43, %v2331_v36  ;;  %v5513_v55 = vadd.f32 %v3056_v47, %v2331_v36  ;;  %v5515_v6 = vadd.f32 %v3060_v25, %v2331_v36  ;;  %v5517_v46 = vadd.f32 %v3064_v37, %v2331_v36 }
 0x612   :  { %v4542_v2 = vpop.f32.mrb[21].mxu1  ;;  %v2334_v28 = vpop.f32.mrb[18].mxu0  ;;  %v5519_v63 = vadd.f32 %v3032_v27, %v2284_v0  ;;  %v5521_v5 = vadd.f32 %v3036_v42, %v2284_v0  ;;  %v5523_v18 = vadd.f32 %v3040_v50, %v2284_v0  ;;  %v5525_v19 = vadd.f32 %v3044_v62, %v2284_v0 }
 0x613   :  { %v2287_v24 = vpop.f32.mrb[22].mxu1  ;;  %v4551_v17 = vpop.f32.mrb[19].mxu0  ;;  %v5527_v3 = vadd.f32 %v3052_v43, %v2334_v28  ;;  %v5529_v15 = vadd.f32 %v3056_v47, %v2334_v28  ;;  %v5546_v33 = vadd.f32 %v3048_v53, %v2284_v0  ;;  %v5551_v34 = vadd.f32 %v3060_v25, %v2334_v28 }
 0x614   :  { %v4543_v54 = vpop.f32.mrb[23].mxu1  ;;  %v3100_v44 = vsel %vm3099_vm6, %v5519_v63, -inf  ;;  %v5533_v40 = vadd.f32 %v3032_v27, %v2287_v24  ;;  %v5535_v49 = vadd.f32 %v3036_v42, %v2287_v24  ;;  %v5537_v61 = vadd.f32 %v3040_v50, %v2287_v24 }
 0x615   :  { %3101 = vmax.xlane.f32.xlu1 %v3100_v44  ;;  %v5539_v26 = vadd.f32 %v3044_v62, %v2287_v24  ;;  %v5544_v32 = vadd.f32 %v3048_v53, %v2287_v24  ;;  %v5553_v9 = vadd.f32 %v3064_v37, %v2334_v28  ;;  %v5556_v42 = vsel %vm3579_vm9, 65535, %v4807_v12 }
 0x616   :  { %v3103_v39 = vsel %vm3099_vm6, %v5533_v40, -inf  ;;  %v3109_v20 = vsel %vm3099_vm6, %v5535_v49, -inf  ;;  %v5558_v43 = vadd.f32 %v3068_v38, %v2334_v28  ;;  %v5560_v47 = vadd.f32 %v3068_v38, %v2331_v36 }
 0x617   :  { %3104 = vmax.xlane.f32.xlu0 %v3103_v39  ;;  %v3106_v62 = vsel %vm3099_vm6, %v5521_v5, -inf  ;;  %v3130_v25 = vsel %vm3099_vm6, %v5511_v57, -inf  ;;  %v3112_v12 = vsel %vm3099_vm6, %v5523_v18, -inf  ;;  %v3133_v8 = vsel %vm3099_vm6, %v5527_v3, -inf }
 0x618   :  { %v3118_v36 = vsel %vm3099_vm6, %v5525_v19, -inf  ;;  %v5575_v0 = vsel %vm3099_vm6, %v5513_v55, -inf  ;;  %v3115_v17 = vsel %vm3099_vm6, %v5537_v61, -inf  ;;  %v3121_v54 = vsel %vm3099_vm6, %v5539_v26, -inf }
 0x619   :  { %3110 = vmax.xlane.f32.xlu1 %v3109_v20  ;;  %v2674_v27 = vpop.f32.mrb[24].mxu1  ;;  %v3139_v44 = vsel %vm3099_vm6, %v5529_v15, -inf  ;;  %v5587_v53 = vsel %vm3099_vm6, %v5515_v6, -inf  ;;  %v5607_v1 = vsel %vm3099_vm6, %v5551_v34, -inf }
 0x61a   :  { %v2701_v60 = vcombine.high %v2674_v27, %v2674_v27  ;;  %v2708_v50 = vrot.slane %v2674_v27, %v4889_v23  ;;  %v4558_v7 = vpop.f32.mrb[25].mxu1 }
 0x61b   :  { %3107 = vmax.xlane.f32.xlu0 %v3106_v62  ;;  %v2677_v37 = vpop.f32.mrb[26].mxu1  ;;  %v5595_v62 = vsel %vm3099_vm6, %v5544_v32, -inf }
 0x61c   :  { %v2715_v41 = vrot.slane %v2701_v60, %v4889_v23  ;;  %v2716_v2 = vcombine.high %v2708_v50, %v2708_v50  ;;  %v2750_v28 = vcombine.high %v2677_v37, %v2677_v37  ;;  %v4559_v24 = vpop.f32.mrb[27].mxu1  ;;  %v2757_v30 = vrot.slane %v2677_v37, %v4889_v23 }
 0x61d   :  { %3116 = vmax.xlane.f32.xlu1 %v3115_v17  ;;  %v2724_v38 = vrot.slane %v2708_v50, %v4889_v23  ;;  %v5599_v37 = vsel %vm3099_vm6, %v5546_v33, -inf }
 0x61e   :  { %v2717_v39 = vcombine.high %v2715_v41, %v2715_v41  ;;  %v2738_v20 = vrot.slane %v2716_v2, %v4889_v23  ;;  %v2764_v27 = vrot.slane %v2750_v28, %v4889_v23  ;;  %v2731_v60 = vrot.slane %v2715_v41, %v4889_v23 }
 0x61f   :  { %v2765_v7 = vcombine.high %v2757_v30, %v2757_v30  ;;  %3113 = vmax.xlane.f32.xlu0 %v3112_v12  ;;  %v2773_v2 = vrot.slane %v2757_v30, %v4889_v23 }
 0x620   :  { %v2745_v24 = vrot.slane %v2717_v39, %v4889_v23  ;;  %v3330_v17 = vcombine.low %v2724_v38, %v2738_v20  ;;  %v4375_v50 = vcombine.high %v2724_v38, %v2738_v20  ;;  %v2766_v45 = vcombine.high %v2764_v27, %v2764_v27 }
 0x621   :  { %v2780_v28 = vrot.slane %v2764_v27, %v4889_v23  ;;  %v2787_v41 = vrot.slane %v2765_v7, %v4889_v23  ;;  %v2682_v12 = vpop.f32.mrb[28].mxu1  ;;  %3134 = vmax.xlane.f32.xlu1 %v3133_v8 }
 0x622   :  { %v3332_v4 = vcombine.low %v2731_v60, %v2745_v24  ;;  %v4376_v16 = vcombine.high %v2731_v60, %v2745_v24  ;;  %v5610_v13 = vrot.slane %v3330_v17, %v4889_v23  ;;  %v5613_v39 = vrot.slane %v4375_v50, %v4889_v23  ;;  %v4562_v38 = vpop.f32.mrb[29].mxu1 }
 0x623   :  { %v2794_v30 = vrot.slane %v2766_v45, %v4889_v23  ;;  %v3379_v20 = vcombine.low %v2773_v2, %v2787_v41  ;;  %v4377_v27 = vcombine.high %v2773_v2, %v2787_v41  ;;  %v2799_v7 = vcombine.high %v2682_v12, %v2682_v12  ;;  %v2685_v35 = vpop.f32.mrb[30].mxu1  ;;  %3131 = vmax.xlane.f32.xlu0 %v3130_v25 }
 0x624   :  { %v5617_v8 = vrot.slane %v3332_v4, %v4889_v23  ;;  %v5620_v22 = vrot.slane %v4376_v16, %v4889_v23  ;;  %v2806_v60 = vrot.slane %v2682_v12, %v4889_v23  ;;  %v4563_v24 = vpop.f32.mrb[31].mxu1  ;;  %v5625_v17 = vsel %vm3099_vm6, %v5553_v9, -inf }
 0x625   :  { %v3381_v50 = vcombine.low %v2780_v28, %v2794_v30  ;;  %v4378_v45 = vcombine.high %v2780_v28, %v2794_v30  ;;  %v5628_v2 = vrot.slane %v3379_v20, %v4889_v23  ;;  %v5631_v25 = vrot.slane %v4377_v27, %v4889_v23  ;;  %3122 = vmax.xlane.f32.xlu1 %v3121_v54 }
 0x626   :  { %v3362_v4 = vcombine.low %v5610_v13, %v5613_v39  ;;  %v2813_v16 = vrot.slane %v2799_v7, %v4889_v23  ;;  %v2814_v41 = vcombine.high %v2806_v60, %v2806_v60  ;;  %v2822_v12 = vrot.slane %v2806_v60, %v4889_v23 }
 0x627   :  { %v3363_v38 = vcombine.low %v5617_v8, %v5620_v22  ;;  %v5640_v28 = vrot.slane %v3381_v50, %v4889_v23  ;;  %v5643_v30 = vrot.slane %v4378_v45, %v4889_v23  ;;  %v2848_v20 = vcombine.high %v2685_v35, %v2685_v35  ;;  %3119 = vmax.xlane.f32.xlu0 %v3118_v36 }
 0x628   :  { %v2815_v54 = vcombine.high %v2813_v16, %v2813_v16  ;;  %v2829_v27 = vrot.slane %v2813_v16, %v4889_v23  ;;  %v2836_v13 = vrot.slane %v2814_v41, %v4889_v23  ;;  %v2844_v39 = vcombine.high %v2822_v12, %v2822_v12 }
 0x629   :  { %v3411_v7 = vcombine.low %v5628_v2, %v5631_v25  ;;  %v3434_v60 = vrot.slane %v2822_v12, %v4889_v23  ;;  %v2855_v22 = vrot.slane %v2685_v35, %v4889_v23  ;;  %v2862_v8 = vrot.slane %v2848_v20, %v4889_v23  ;;  %v2690_v24 = vpop.f32.mrb[32].mxu1  ;;  %3140 = vmax.xlane.f32.xlu1 %v3139_v44 }
 0x62a   :  { %v2843_v50 = vrot.slane %v2815_v54, %v4889_v23  ;;  %v2845_v36 = vcombine.high %v2829_v27, %v2829_v27  ;;  %v2846_v45 = vcombine.high %v2836_v13, %v2836_v13  ;;  %v3442_v56 = vcombine.low %v2836_v13, %v2844_v39  ;;  %v4566_v16 = vpop.f32.mrb[33].mxu1 }
 0x62b   :  { %v3441_v41 = vrot.slane %v3434_v60, %v4889_v23  ;;  %v2863_v51 = vcombine.high %v2855_v22, %v2855_v22  ;;  %v2864_v31 = vcombine.high %v2862_v8, %v2862_v8  ;;  %v2871_v2 = vrot.slane %v2855_v22, %v4889_v23  ;;  %v2693_v25 = vpop.f32.mrb[34].mxu1  ;;  %3137 = vmax.xlane.f32.xlu0 %v5575_v0 }
 0x62c   :  { %v3412_v35 = vcombine.low %v5640_v28, %v5643_v30  ;;  %v3443_v12 = vcombine.low %v2846_v45, %v2829_v27  ;;  %v3444_v44 = vcombine.low %v2843_v50, %v2845_v36  ;;  %v2847_v20 = vcombine.high %v2843_v50, %v2843_v50  ;;  %v4567_v54 = vpop.f32.mrb[35].mxu1 }
 0x62d   :  { %v3452_v14 = vrot.slane %v3442_v56, %v4889_v23  ;;  %v2878_v13 = vrot.slane %v2862_v8, %v4889_v23  ;;  %v2885_v39 = vrot.slane %v2863_v51, %v4889_v23  ;;  %v2892_v60 = vrot.slane %v2864_v31, %v4889_v23  ;;  %3128 = vmax.xlane.f32.xlu1 %v5595_v62 }
 0x62e   :  { %v3459_v22 = vrot.slane %v3443_v12, %v4889_v23  ;;  %v3561_v0 = vpack.c.bf16 %v3441_v41, %v3441_v41  ;;  %v2893_v16 = vcombine.high %v2871_v2, %v2871_v2  ;;  %v3445_v25 = vcombine.low %v2847_v20, %v2871_v2 }
 0x62f   :  { %v2894_v28 = vcombine.high %v2878_v13, %v2878_v13  ;;  %v2895_v30 = vcombine.high %v2885_v39, %v2885_v39  ;;  %v2896_v27 = vcombine.high %v2892_v60, %v2892_v60  ;;  %v2903_v50 = vrot.slane %v2690_v24, %v4889_v23  ;;  %3125 = vmax.xlane.f32.xlu0 %v5599_v37 }
 0x630   :  { %v3474_v56 = vcombine.low %v3452_v14, %v3459_v22  ;;  %v3466_v8 = vrot.slane %v3444_v44, %v4889_v23  ;;  %v3473_v51 = vrot.slane %v3445_v25, %v4889_v23  ;;  %v3491_v31 = vcombine.low %v2885_v39, %v2893_v16 }
 0x631   :  { %v3492_v36 = vcombine.low %v2895_v30, %v2878_v13  ;;  %v3493_v62 = vcombine.low %v2892_v60, %v2894_v28  ;;  %v2904_v45 = vcombine.high %v2903_v50, %v2903_v50  ;;  %v2911_v41 = vrot.slane %v2903_v50, %v4889_v23  ;;  %3146 = vmax.xlane.f32.xlu1 %v5607_v1 }
 0x632   :  { %v3475_v2 = vcombine.low %v3466_v8, %v3473_v51  ;;  %v3501_v12 = vrot.slane %v3491_v31, %v4889_v23  ;;  %v3370_v24 = vrot.slane %v3362_v4, %v4889_v23  ;;  %v3377_v37 = vrot.slane %v3363_v38, %v4889_v23 }
 0x633   :  { %v3508_v14 = vrot.slane %v3492_v36, %v4889_v23  ;;  %v2918_v44 = vrot.slane %v2904_v45, %v4889_v23  ;;  %v3494_v20 = vcombine.low %v2896_v27, %v2911_v41  ;;  %v3419_v54 = vrot.slane %v3411_v7, %v4889_v23  ;;  %3143 = vmax.xlane.f32.xlu0 %v5587_v53 }
 0x634   :  { %v3515_v13 = vrot.slane %v3493_v62, %v4889_v23  ;;  %v3426_v1 = vrot.slane %v3412_v35, %v4889_v23  ;;  %v3583_v39 = vand.u32 %v5556_v42, %v3561_v0  ;;  %v3482_v60 = vrot.slane %v3474_v56, %v4889_v23 }
 0x635   :  { %v3523_v4 = vcombine.low %v3501_v12, %v3508_v14  ;;  %v3522_v38 = vrot.slane %v3494_v20, %v4889_v23  ;;  %v3546_v22 = vrot.slane %v2918_v44, %v4889_v23  ;;  %3152 = vmax.xlane.f32.xlu1 %v5625_v17  ;;  %v3489_v16 = vrot.slane %v3475_v2, %v4889_v23 }
 0x636   :  { %v3378_v7 = vcombine.low %v3370_v24, %v3377_v37  ;;  %v3427_v25 = vcombine.low %v3419_v54, %v3426_v1  ;;  %v3148_v53 = vsel %vm3099_vm6, %v5517_v46, -inf  ;;  %v3157_v27 = vsel %vm3099_vm6, %v5558_v43, -inf }
 0x637   :  { %v3524_v28 = vcombine.low %v3515_v13, %v3522_v38  ;;  %v3553_v35 = vrot.slane %v3546_v22, %v4889_v23  ;;  %3149 = vmax.xlane.f32.xlu0 %v3148_v53  ;;  %v3490_v0 = vcombine.low %v3482_v60, %v3489_v16  ;;  %v3531_v17 = vrot.slane %v3523_v4, %v4889_v23 }
 0x638   :  { %v3560_v30 = vpack.c.bf16 %v3427_v25, %v3378_v7  ;;  %v3154_v8 = vsel %vm3099_vm6, %v5560_v47, -inf  ;;  %v5998_v51 = vmov 0.0  }
 0x639   :  { %v3538_v50 = vrot.slane %v3524_v28, %v4889_v23  ;;  %v3563_v56 = vpack.c.bf16 %v3553_v35, %v3553_v35  ;;  %3158 = vmax.xlane.f32.xlu1 %v3157_v27 }
 0x63a   :  { %4569 = vmatpush3.bf16.msra.mxu0 %v3560_v30 }
 0x63b   :  { %4570 = vmatprep.subr.bf16.mxu0 %v5998_v51  ;;  %v3539_v31 = vcombine.low %v3531_v17, %v3538_v50  ;;  %3155 = vmax.xlane.f32.xlu0 %v3154_v8  ;;  %v3674_v36 = vand.u32 %v5556_v42, %v3563_v56 }
 0x63d   :  { %v3562_v62 = vpack.c.bf16 %v3539_v31, %v3490_v0 }
 0x63e   :  { %4571 = vmatpush3.bf16.msra.mxu0 %v3583_v39 }
 0x63f   :  { %4593 = vmatpush3.bf16.msra.mxu1 %v3562_v62 }
 0x640   :  { %4594 = vmatprep.subr.bf16.mxu1 %v5998_v51 }
 0x643   :  { %4595 = vmatpush3.bf16.msra.mxu1 %v3674_v36 }
 0x6a2   :  { %v3102_v45 = vpop.xlane.xlu1 %3101 }
 0x6a3   :  { %v3160_v41 = vsub.f32 %v5519_v63, %v3102_v45 }
 0x6a4   :  { %v3105_v2 = vpop.xlane.xlu0 %3104 }
 0x6a5   :  { %v3180_v12 = vmul.f32 1.442695, %v3160_v41  ;;  %v3161_v24 = vsub.f32 %v5533_v40, %v3105_v2 }
 0x6a6   :  { %v3111_v37 = vpop.xlane.xlu1 %3110 }
 0x6a7   :  { %4688 = vpow2.f32 %v3180_v12  ;;  %v3182_v14 = vmul.f32 1.442695, %v3161_v24  ;;  %v3163_v44 = vsub.f32 %v5535_v49, %v3111_v37 }
 0x6a8   :  { %v3108_v20 = vpop.xlane.xlu0 %3107 }
 0x6a9   :  { %4690 = vpow2.f32 %v3182_v14  ;;  %v3186_v42 = vmul.f32 1.442695, %v3163_v44  ;;  %v3162_v54 = vsub.f32 %v5521_v5, %v3108_v20 }
 0x6aa   :  { %v3117_v13 = vpop.xlane.xlu1 %3116 }
 0x6ab   :  { %4692 = vpow2.f32 %v3186_v42  ;;  %v3184_v1 = vmul.f32 1.442695, %v3162_v54  ;;  %v3165_v39 = vsub.f32 %v5537_v61, %v3117_v13 }
 0x6ac   :  { %v3114_v63 = vpop.xlane.xlu0 %3113 }
 0x6ad   :  { %4694 = vpow2.f32 %v3184_v1  ;;  %v3190_v60 = vmul.f32 1.442695, %v3165_v39  ;;  %v3164_v40 = vsub.f32 %v5523_v18, %v3114_v63 }
 0x6ae   :  { %v3135_v4 = vpop.xlane.xlu1 %3134 }
 0x6af   :  { %4696 = vpow2.f32 %v3190_v60  ;;  %v3188_v38 = vmul.f32 1.442695, %v3164_v40  ;;  %v3171_v49 = vsub.f32 %v5527_v3, %v3135_v4 }
 0x6b0   :  { %v3132_v22 = vpop.xlane.xlu0 %3131 }
 0x6b1   :  { %v5704_v16 = vpop.eup %4688  ;;  %4698 = vpow2.f32 %v3188_v38  ;;  %v3202_v5 = vmul.f32 1.442695, %v3171_v49  ;;  %v3170_v7 = vsub.f32 %v5511_v57, %v3132_v22 }
 0x6b2   :  { %v3123_v25 = vpop.xlane.xlu1 %3122  ;;  %v3220_v61 = vsel %vm3099_vm6, %v5704_v16, 0.0 }
 0x6b3   :  { %v5709_v53 = vpop.eup %4690  ;;  %4700 = vpow2.f32 %v3202_v5  ;;  %v3200_v18 = vmul.f32 1.442695, %v3170_v7  ;;  %v3167_v28 = vsub.f32 %v5539_v26, %v3123_v25  ;;  %3221 = vadd.xlane.f32.xlu0 %v3220_v61 }
 0x6b4   :  { %v3120_v35 = vpop.xlane.xlu0 %3119  ;;  %v3223_v3 = vsel %vm3099_vm6, %v5709_v53, 0.0 }
 0x6b5   :  { %v5714_v0 = vpop.eup %4692  ;;  %4702 = vpow2.f32 %v3200_v18  ;;  %v3194_v30 = vmul.f32 1.442695, %v3167_v28  ;;  %v3166_v57 = vsub.f32 %v5525_v19, %v3120_v35  ;;  %3224 = vadd.xlane.f32.xlu1 %v3223_v3 }
 0x6b6   :  { %v3141_v27 = vpop.xlane.xlu1 %3140  ;;  %v3229_v8 = vsel %vm3099_vm6, %v5714_v0, 0.0 }
 0x6b7   :  { %v5717_v50 = vpop.eup %4694  ;;  %4704 = vpow2.f32 %v3194_v30  ;;  %v3192_v56 = vmul.f32 1.442695, %v3166_v57  ;;  %v3173_v17 = vsub.f32 %v5529_v15, %v3141_v27 }
 0x6b8   :  { %v3138_v26 = vpop.xlane.xlu0 %3137  ;;  %v3226_v31 = vsel %vm3099_vm6, %v5717_v50, 0.0 }
 0x6b9   :  { %v5724_v36 = vpop.eup %4696  ;;  %4706 = vpow2.f32 %v3192_v56  ;;  %v3206_v62 = vmul.f32 1.442695, %v3173_v17  ;;  %v3172_v19 = vsub.f32 %v5513_v55, %v3138_v26  ;;  %3230 = vadd.xlane.f32.xlu1 %v3229_v8  ;;  %3227 = vadd.xlane.f32.xlu0 %v3226_v31  ;;  %v153_v31 = vsel %vm152_vm4, %v4886_v21, 0.0 }
 0x6ba   :  { %v3129_v45 = vpop.xlane.xlu1 %3128  ;;  %v3235_v24 = vsel %vm3099_vm6, %v5724_v36, 0.0  ;;  %vm4247_vm4 = vcmask 1043459  }
 0x6bb   :  { %v5727_v41 = vpop.eup %4698  ;;  %4708 = vpow2.f32 %v3206_v62  ;;  %v3204_v15 = vmul.f32 1.442695, %v3172_v19  ;;  %v3169_v2 = vsub.f32 %v5544_v32, %v3129_v45  ;;  %v154_v62 = vrot.slane %v153_v31, 4 }
 0x6bc   :  { %v3126_v12 = vpop.xlane.xlu0 %3125  ;;  %v3232_v37 = vsel %vm3099_vm6, %v5727_v41, 0.0 }
 0x6bd   :  { %v5734_v14 = vpop.eup %4700  ;;  %4710 = vpow2.f32 %v3204_v15  ;;  %v3198_v55 = vmul.f32 1.442695, %v3169_v2  ;;  %v3168_v44 = vsub.f32 %v5546_v33, %v3126_v12  ;;  %3236 = vadd.xlane.f32.xlu1 %v3235_v24  ;;  %3233 = vadd.xlane.f32.xlu0 %v3232_v37  ;;  %v155_v24 = vadd.f32 %v154_v62, %v153_v31 }
 0x6be   :  { %v3147_v20 = vpop.xlane.xlu1 %3146  ;;  %v3253_v1 = vsel %vm3099_vm6, %v5734_v14, 0.0 }
 0x6bf   :  { %v5737_v42 = vpop.eup %4702  ;;  %4712 = vpow2.f32 %v3198_v55  ;;  %v3196_v32 = vmul.f32 1.442695, %v3168_v44  ;;  %v3175_v54 = vsub.f32 %v5551_v34, %v3147_v20 }
 0x6c0   :  { %v3144_v13 = vpop.xlane.xlu0 %3143  ;;  %v3250_v39 = vsel %vm3099_vm6, %v5737_v42, 0.0 }
 0x6c1   :  { %v5744_v63 = vpop.eup %4704  ;;  %4714 = vpow2.f32 %v3196_v32  ;;  %v3210_v33 = vmul.f32 1.442695, %v3175_v54  ;;  %v3174_v60 = vsub.f32 %v5515_v6, %v3144_v13  ;;  %3254 = vadd.xlane.f32.xlu1 %v3253_v1  ;;  %3251 = vadd.xlane.f32.xlu0 %v3250_v39  ;;  %v156_v32 = vrot.slane %v155_v24, 2 }
 0x6c2   :  { %v3153_v40 = vpop.xlane.xlu1 %3152  ;;  %v3241_v22 = vsel %vm3099_vm6, %v5744_v63, 0.0 }
 0x6c3   :  { %v5747_v4 = vpop.eup %4706  ;;  %4716 = vpow2.f32 %v3210_v33  ;;  %v3208_v34 = vmul.f32 1.442695, %v3174_v60  ;;  %v3177_v38 = vsub.f32 %v5553_v9, %v3153_v40  ;;  %v157_v54 = vadd.f32 %v156_v32, %v155_v24  ;;  %v70_v33 = vld [vmem:[%s5973_s3] sm:$0xff]  ;;  %v71_v60 = vld [vmem:[%s5973_s3 + $0x8] sm:$0xff] }
 0x6c4   :  { %v3150_v49 = vpop.xlane.xlu0 %3149  ;;  %v3238_v5 = vsel %vm3099_vm6, %v5747_v4, 0.0  ;;  %v5805_v40 = vpack.c.bf16 %v71_v60, %v70_v33 }
 0x6c5   :  { %v5754_v7 = vpop.eup %4708  ;;  %4718 = vpow2.f32 %v3208_v34  ;;  %v3214_v6 = vmul.f32 1.442695, %v3177_v38  ;;  %v3176_v25 = vsub.f32 %v5517_v46, %v3150_v49  ;;  %3242 = vadd.xlane.f32.xlu1 %v3241_v22  ;;  %3239 = vadd.xlane.f32.xlu0 %v3238_v5  ;;  %v158_v13 = vrot.slane %v157_v54, 1 }
 0x6c6   :  { %v3159_v61 = vpop.xlane.xlu1 %3158  ;;  %v3259_v3 = vsel %vm3099_vm6, %v5754_v7, 0.0  ;;  %4640 = vmatprep.subr.bf16.mxu1 %v5805_v40  ;;  %4616 = vmatprep.subr.bf16.mxu0 %v5805_v40 }
 0x6c7   :  { %v5757_v18 = vpop.eup %4710  ;;  %4720 = vpow2.f32 %v3214_v6  ;;  %v3212_v9 = vmul.f32 1.442695, %v3176_v25  ;;  %v3179_v28 = vsub.f32 %v5558_v43, %v3159_v61  ;;  %v159_v1 = vadd.f32 %v158_v13, %v157_v54 }
 0x6c8   :  { %v3156_v35 = vpop.xlane.xlu0 %3155  ;;  %v3256_v30 = vsel %vm3099_vm6, %v5757_v18, 0.0 }
 0x6c9   :  { %v5764_v57 = vpop.eup %4712  ;;  %4722 = vpow2.f32 %v3212_v9  ;;  %v3218_v46 = vmul.f32 1.442695, %v3179_v28  ;;  %v3178_v27 = vsub.f32 %v5560_v47, %v3156_v35  ;;  %3260 = vadd.xlane.f32.xlu1 %v3259_v3  ;;  %3257 = vadd.xlane.f32.xlu0 %v3256_v30  ;;  %v167_v39 = vsub.f32 1.0, %v159_v1  ;;  %v72_v30 = vld [vmem:[%s5973_s3 + $0x10] sm:$0xff] }
 0x6ca   :  { %v3247_v43 = vsel %vm3099_vm6, %v5764_v57, 0.0 }
 0x6cb   :  { %v5767_v56 = vpop.eup %4714  ;;  %4724 = vpow2.f32 %v3218_v46  ;;  %v3216_v17 = vmul.f32 1.442695, %v3178_v27  ;;  %v73_v46 = vld [vmem:[%s5973_s3 + $0x18] sm:$0xff] }
 0x6cc   :  { %v3244_v26 = vsel %vm3099_vm6, %v5767_v56, 0.0 }
 0x6cd   :  { %v5773_v8 = vpop.eup %4716  ;;  %4726 = vpow2.f32 %v3216_v17  ;;  %3248 = vadd.xlane.f32.xlu1 %v3247_v43  ;;  %3245 = vadd.xlane.f32.xlu0 %v3244_v26 }
 0x6ce   :  { %v3265_v19 = vsel %vm3099_vm6, %v5773_v8, 0.0 }
 0x6cf   :  { %v5777_v47 = vpop.eup %4718 }
 0x6d0   :  { %v3262_v45 = vsel %vm3099_vm6, %v5777_v47, 0.0 }
 0x6d1   :  { %v5783_v15 = vpop.eup %4720  ;;  %3266 = vadd.xlane.f32.xlu1 %v3265_v19  ;;  %3263 = vadd.xlane.f32.xlu0 %v3262_v45 }
 0x6d2   :  { %v3271_v21 = vsel %vm3099_vm6, %v5783_v15, 0.0 }
 0x6d3   :  { %v5785_v2 = vpop.eup %4722 }
 0x6d4   :  { %v3268_v12 = vsel %vm3099_vm6, %v5785_v2, 0.0 }
 0x6d5   :  { %v5791_v37 = vpop.eup %4724  ;;  %3272 = vadd.xlane.f32.xlu1 %v3271_v21  ;;  %3269 = vadd.xlane.f32.xlu0 %v3268_v12 }
 0x6d6   :  { %v3277_v44 = vsel %vm3099_vm6, %v5791_v37, 0.0 }
 0x6d7   :  { %v5793_v55 = vpop.eup %4726 }
 0x6d8   :  { %v3274_v20 = vsel %vm3099_vm6, %v5793_v55, 0.0 }
 0x6d9   :  { %3278 = vadd.xlane.f32.xlu1 %v3277_v44  ;;  %3275 = vadd.xlane.f32.xlu0 %v3274_v20 }
 0x6ea   :  { %4079 = vbcast.lane.b32.xlu1 %v167_v39, 264 }
 0x6ef   :  { %4075 = vbcast.lane.b32.xlu0 %v167_v39, 256 }
 0x740   :  { %v3222_v34 = vpop.xlane.xlu0 %3221 }
 0x741   :  { %4728 = vrcp.f32 %v3222_v34 }
 0x742   :  { %v3225_v38 = vpop.xlane.xlu1 %3224 }
 0x743   :  { %4730 = vrcp.f32 %v3225_v38 }
 0x746   :  { %v3231_v49 = vpop.xlane.xlu1 %3230  ;;  %v3228_v22 = vpop.xlane.xlu0 %3227 }
 0x747   :  { %4732 = vrcp.f32 %v3231_v49 }
 0x748   :  { %4734 = vrcp.f32 %v3228_v22 }
 0x74a   :  { %v3237_v5 = vpop.xlane.xlu1 %3236  ;;  %v3234_v6 = vpop.xlane.xlu0 %3233 }
 0x74b   :  { %v4729_v25 = vpop.eup %4728  ;;  %4736 = vrcp.f32 %v3237_v5 }
 0x74c   :  { %v3300_v9 = vmul.f32 %v4729_v25, %v5704_v16  ;;  %4738 = vrcp.f32 %v3234_v6 }
 0x74d   :  { %v4731_v61 = vpop.eup %4730 }
 0x74e   :  { %v3301_v28 = vmul.f32 %v4731_v61, %v5709_v53  ;;  %v3255_v35 = vpop.xlane.xlu1 %3254  ;;  %v3252_v3 = vpop.xlane.xlu0 %3251  ;;  %v75_v53 = vpack.c.bf16 %v73_v46, %v72_v30 }
 0x74f   :  { %4740 = vrcp.f32 %v3255_v35 }
 0x750   :  { %4742 = vrcp.f32 %v3252_v3  ;;  %v3320_v27 = vpack.c.bf16 %v3301_v28, %v3300_v9 }
 0x751   :  { %v4733_v17 = vpop.eup %4732 }
 0x752   :  { %v4735_v43 = vpop.eup %4734  ;;  %v3243_v26 = vpop.xlane.xlu1 %3242  ;;  %4573 = vmatmul.mubr.msk.bf16.vlgmr.msra.gmra.mrb[20].mxu0 %vm3099_vm6, %v3320_v27  ;;  %v3303_v62 = vmul.f32 %v4733_v17, %v5714_v0 }
 0x753   :  { %v3240_v16 = vpop.xlane.xlu0 %3239  ;;  %4576 = vmatprep.mubr.msk.bf16.mxu0 %vm4804_vm0, %v5998_v51  ;;  %4617 = vmatpush3.bf16.msra.mxu0 %v5805_v40  ;;  %v3302_v31 = vmul.f32 %v4735_v43, %v5717_v50  ;;  %4744 = vrcp.f32 %v3243_v26 }
 0x754   :  { %4618 = vmatprep.subr.bf16.mxu0 %v75_v53  ;;  %4746 = vrcp.f32 %v3240_v16 }
 0x755   :  { %v4737_v21 = vpop.eup %4736  ;;  %v3321_v24 = vpack.c.bf16 %v3303_v62, %v3302_v31 }
 0x756   :  { %v3261_v19 = vpop.xlane.xlu1 %3260  ;;  %v4739_v12 = vpop.eup %4738  ;;  %v3305_v1 = vmul.f32 %v4737_v21, %v5724_v36 }
 0x757   :  { %v3258_v45 = vpop.xlane.xlu0 %3257  ;;  %4748 = vrcp.f32 %v3261_v19  ;;  %4619 = vmatpush3.bf16.msra.mxu0 %v75_v53  ;;  %v3304_v13 = vmul.f32 %v4739_v12, %v5727_v41 }
 0x758   :  { %4750 = vrcp.f32 %v3258_v45 }
 0x759   :  { %v4741_v44 = vpop.eup %4740  ;;  %v3322_v38 = vpack.c.bf16 %v3305_v1, %v3304_v13 }
 0x75a   :  { %v4743_v20 = vpop.eup %4742  ;;  %v3311_v32 = vmul.f32 %v4741_v44, %v5734_v14  ;;  %v3249_v54 = vpop.xlane.xlu1 %3248  ;;  %4577 = vmatmul.mubr.msk.bf16.gmra.mrb[24].mxu0 %vm3099_vm6, %v3321_v24 }
 0x75b   :  { %v3246_v50 = vpop.xlane.xlu0 %3245  ;;  %v3310_v0 = vmul.f32 %v4743_v20, %v5737_v42  ;;  %4580 = vmatprep.mubr.msk.bf16.mxu0 %vm4804_vm0, %v5998_v51  ;;  %4752 = vrcp.f32 %v3249_v54 }
 0x75c   :  { %4754 = vrcp.f32 %v3246_v50 }
 0x75d   :  { %v3325_v39 = vpack.c.bf16 %v3311_v32, %v3310_v0  ;;  %v4745_v34 = vpop.eup %4744 }
 0x75e   :  { %v3267_v33 = vpop.xlane.xlu1 %3266  ;;  %v4747_v14 = vpop.eup %4746 }
 0x75f   :  { %v3264_v60 = vpop.xlane.xlu0 %3263  ;;  %4756 = vrcp.f32 %v3267_v33  ;;  %4597 = vmatmul.mubr.msk.bf16.vlgmr.msra.gmra.mrb[36].mxu1 %vm3099_vm6, %v3325_v39  ;;  %v3306_v6 = vmul.f32 %v4747_v14, %v5747_v4 }
 0x760   :  { %4758 = vrcp.f32 %v3264_v60  ;;  %4600 = vmatprep.mubr.msk.bf16.mxu1 %vm4804_vm0, %v5998_v51  ;;  %4641 = vmatpush3.bf16.msra.mxu1 %v5805_v40  ;;  %v3307_v40 = vmul.f32 %v4745_v34, %v5744_v63 }
 0x761   :  { %v4749_v41 = vpop.eup %4748  ;;  %4642 = vmatprep.subr.bf16.mxu1 %v75_v53 }
 0x762   :  { %v4751_v36 = vpop.eup %4750  ;;  %v3273_v42 = vpop.xlane.xlu1 %3272  ;;  %4581 = vmatmul.mubr.msk.bf16.gmra.mrb[28].mxu0 %vm3099_vm6, %v3322_v38  ;;  %v3313_v22 = vmul.f32 %v4749_v41, %v5754_v7  ;;  %v3323_v35 = vpack.c.bf16 %v3307_v40, %v3306_v6 }
 0x763   :  { %v3270_v49 = vpop.xlane.xlu0 %3269  ;;  %4760 = vrcp.f32 %v3273_v42  ;;  %v3312_v5 = vmul.f32 %v4751_v36, %v5757_v18  ;;  %4584 = vmatprep.mubr.msk.bf16.mxu0 %vm4804_vm0, %v5998_v51 }
 0x764   :  { %4762 = vrcp.f32 %v3270_v49  ;;  %4643 = vmatpush3.bf16.msra.mxu1 %v75_v53 }
 0x765   :  { %v3326_v25 = vpack.c.bf16 %v3313_v22, %v3312_v5  ;;  %v4753_v61 = vpop.eup %4752 }
 0x766   :  { %v4755_v9 = vpop.eup %4754  ;;  %v3279_v28 = vpop.xlane.xlu1 %3278  ;;  %v3309_v46 = vmul.f32 %v4753_v61, %v5764_v57 }
 0x767   :  { %4601 = vmatmul.mubr.msk.bf16.gmra.mrb[40].mxu1 %vm3099_vm6, %v3326_v25  ;;  %v3276_v18 = vpop.xlane.xlu0 %3275  ;;  %4764 = vrcp.f32 %v3279_v28  ;;  %v3308_v30 = vmul.f32 %v4755_v9, %v5767_v56 }
 0x768   :  { %4604 = vmatprep.mubr.msk.bf16.mxu1 %vm4804_vm0, %v5998_v51  ;;  %4766 = vrcp.f32 %v3276_v18 }
 0x769   :  { %v4757_v7 = vpop.eup %4756  ;;  %v3324_v26 = vpack.c.bf16 %v3309_v46, %v3308_v30 }
 0x76a   :  { %v4759_v3 = vpop.eup %4758  ;;  %4585 = vmatmul.mubr.msk.bf16.gmra.mrb[32].mxu0 %vm3099_vm6, %v3323_v35  ;;  %v3315_v4 = vmul.f32 %v4757_v7, %v5773_v8 }
 0x76b   :  { %v3314_v63 = vmul.f32 %v4759_v3, %v5777_v47  ;;  %4588 = vmatprep.mubr.msk.bf16.mxu0 %vm4804_vm0, %v5998_v51 }
 0x76d   :  { %v4761_v27 = vpop.eup %4760  ;;  %v3327_v17 = vpack.c.bf16 %v3315_v4, %v3314_v63 }
 0x76e   :  { %v4763_v43 = vpop.eup %4762  ;;  %v3317_v47 = vmul.f32 %v4761_v27, %v5783_v15 }
 0x76f   :  { %4605 = vmatmul.mubr.msk.bf16.gmra.mrb[44].mxu1 %vm3099_vm6, %v3327_v17  ;;  %v3316_v8 = vmul.f32 %v4763_v43, %v5785_v2 }
 0x770   :  { %4608 = vmatprep.mubr.msk.bf16.mxu1 %vm4804_vm0, %v5998_v51 }
 0x771   :  { %v4765_v16 = vpop.eup %4764  ;;  %v3328_v53 = vpack.c.bf16 %v3317_v47, %v3316_v8 }
 0x772   :  { %4589 = vmatmul.mubr.msk.bf16.gmra.mrb[36].mxu0 %vm3099_vm6, %v3324_v26  ;;  %v4767_v56 = vpop.eup %4766  ;;  %v3319_v31 = vmul.f32 %v4765_v16, %v5791_v37 }
 0x773   :  { %v3318_v57 = vmul.f32 %v4767_v56, %v5793_v55  ;;  %v4399_v56 = vld [vmem:[%s5973_s3 + $0x20] ss:$0 sm:$0xff] }
 0x775   :  { %v3329_v62 = vpack.c.bf16 %v3319_v31, %v3318_v57 }
 0x777   :  { %4609 = vmatmul.mubr.msk.bf16.gmra.mrb[48].mxu1 %vm3099_vm6, %v3328_v53 }
 0x778   :  { %4612 = vmatprep.mubr.msk.bf16.mxu1 %vm4804_vm0, %v5998_v51  ;;  %vm4245_vm0 = vcmask 1042434  }
 0x77f   :  { %4613 = vmatmul.mubr.msk.bf16.gmra.mrb[52].mxu1 %vm3099_vm6, %v3329_v62 }
 0x780   :  { %4644 = vmatprep.mubr.msk.bf16.mxu1 %vm1742_vm14, %v5402_v52 }
 0x787   :  { %4645 = vmatmul.mubr.msk.bf16.vlgmr.msra.gmra.mrb[56].mxu1 %vm1742_vm14, %v5409_v59 }
 0x825   :  { %v3619_v15 = vpop.f32.mrb[20].mxu0 }
 0x826   :  { %v4574_v2 = vpop.f32.mrb[21].mxu0 }
 0x827   :  { %v3622_v19 = vpop.f32.mrb[22].mxu0 }
 0x828   :  { %v3749_v45 = vpack.c.bf16 %v3622_v19, %v3619_v15  ;;  %v4575_v21 = vpop.f32.mrb[23].mxu0 }
 0x82a   :  { %4620 = vmatprep.mubr.msk.bf16.mxu0 %vm1742_vm14, %v3749_v45 }
 0x82d   :  { %v3627_v51 = vpop.f32.mrb[24].mxu0 }
 0x82e   :  { %v4578_v55 = vpop.f32.mrb[25].mxu0 }
 0x82f   :  { %v3630_v12 = vpop.f32.mrb[26].mxu0 }
 0x830   :  { %v3750_v37 = vpack.c.bf16 %v3630_v12, %v3627_v51  ;;  %v4579_v24 = vpop.f32.mrb[27].mxu0 }
 0x832   :  { %v3710_v44 = vpop.f32.mrb[36].mxu1  ;;  %4621 = vmatmul.mubr.msk.bf16.vlgmr.msra.gmra.mrb[40].mxu0 %vm1742_vm14, %v3750_v37 }
 0x833   :  { %v4598_v20 = vpop.f32.mrb[37].mxu1 }
 0x834   :  { %v3713_v52 = vpop.f32.mrb[38].mxu1 }
 0x835   :  { %v3754_v32 = vpack.c.bf16 %v3713_v52, %v3710_v44  ;;  %v4599_v54 = vpop.f32.mrb[39].mxu1  ;;  %v3635_v59 = vpop.f32.mrb[28].mxu0 }
 0x836   :  { %v4582_v50 = vpop.f32.mrb[29].mxu0 }
 0x837   :  { %v3638_v0 = vpop.f32.mrb[30].mxu0 }
 0x838   :  { %v3751_v13 = vpack.c.bf16 %v3638_v0, %v3635_v59  ;;  %v4583_v1 = vpop.f32.mrb[31].mxu0 }
 0x83a   :  { %v3718_v39 = vpop.f32.mrb[40].mxu1  ;;  %4624 = vmatprep.mubr.msk.bf16.mxu0 %vm1742_vm14, %v3751_v13 }
 0x83b   :  { %v4602_v33 = vpop.f32.mrb[41].mxu1 }
 0x83c   :  { %v3721_v60 = vpop.f32.mrb[42].mxu1 }
 0x83d   :  { %v3755_v34 = vpack.c.bf16 %v3721_v60, %v3718_v39  ;;  %v4603_v14 = vpop.f32.mrb[43].mxu1  ;;  %v3643_v38 = vpop.f32.mrb[32].mxu0 }
 0x83e   :  { %v4586_v41 = vpop.f32.mrb[33].mxu0 }
 0x83f   :  { %v3646_v36 = vpop.f32.mrb[34].mxu0 }
 0x840   :  { %v3752_v42 = vpack.c.bf16 %v3646_v36, %v3643_v38  ;;  %v4587_v49 = vpop.f32.mrb[35].mxu0 }
 0x842   :  { %v3726_v22 = vpop.f32.mrb[44].mxu1  ;;  %4625 = vmatmul.mubr.msk.bf16.gmra.mrb[44].mxu0 %vm1742_vm14, %v3752_v42 }
 0x843   :  { %v4606_v5 = vpop.f32.mrb[45].mxu1 }
 0x844   :  { %v3729_v6 = vpop.f32.mrb[46].mxu1 }
 0x845   :  { %v3756_v40 = vpack.c.bf16 %v3729_v6, %v3726_v22  ;;  %v4607_v25 = vpop.f32.mrb[47].mxu1  ;;  %v3651_v61 = vpop.f32.mrb[36].mxu0 }
 0x846   :  { %v4590_v9 = vpop.f32.mrb[37].mxu0 }
 0x847   :  { %v3654_v28 = vpop.f32.mrb[38].mxu0 }
 0x848   :  { %v3753_v35 = vpack.c.bf16 %v3654_v28, %v3651_v61  ;;  %v4591_v7 = vpop.f32.mrb[39].mxu0 }
 0x84a   :  { %v3734_v18 = vpop.f32.mrb[48].mxu1  ;;  %4628 = vmatprep.mubr.msk.bf16.mxu0 %vm1742_vm14, %v3753_v35 }
 0x84b   :  { %v4610_v3 = vpop.f32.mrb[49].mxu1  ;;  %4629 = vmatmul.mubr.msk.bf16.gmra.mrb[48].mxu0 %vm1742_vm14, %v3754_v32 }
 0x84c   :  { %v3737_v4 = vpop.f32.mrb[50].mxu1  ;;  %4632 = vmatprep.mubr.msk.bf16.mxu0 %vm1742_vm14, %v3755_v34 }
 0x84d   :  { %v3757_v63 = vpack.c.bf16 %v3737_v4, %v3734_v18  ;;  %v4611_v30 = vpop.f32.mrb[51].mxu1 }
 0x852   :  { %v3742_v46 = vpop.f32.mrb[52].mxu1 }
 0x853   :  { %v4614_v27 = vpop.f32.mrb[53].mxu1  ;;  %4633 = vmatmul.mubr.msk.bf16.gmra.mrb[52].mxu0 %vm1742_vm14, %v3756_v40 }
 0x854   :  { %v3745_v17 = vpop.f32.mrb[54].mxu1  ;;  %4636 = vmatprep.mubr.msk.bf16.mxu0 %vm1742_vm14, %v3757_v63 }
 0x855   :  { %v3758_v43 = vpack.c.bf16 %v3745_v17, %v3742_v46  ;;  %v4615_v26 = vpop.f32.mrb[55].mxu1 }
 0x85a   :  { %v4646_v8 = vpop.f32.mrb[56].mxu1 }
 0x85b   :  { %v3940_v47 = vpop.f32.mrb[57].mxu1  ;;  %4637 = vmatmul.mubr.msk.bf16.gmra.mrb[56].mxu0 %vm1742_vm14, %v3758_v43  ;;  %v3949_v49 = vadd.f32 %v4646_v8, %v4399_v56 }
 0x85c   :  { %v4647_v16 = vpop.f32.mrb[58].mxu1  ;;  %v3941_v57 = vadd.f32 %v4399_v56, %v3940_v47 }
 0x85d   :  { %v3943_v53 = vpop.f32.mrb[59].mxu1  ;;  %v3952_v40 = vadd.f32 %v4647_v16, %v4399_v56 }
 0x85e   :  { %v3944_v62 = vadd.f32 %v4399_v56, %v3943_v53 }
 0x905   :  { %v4622_v31 = vpop.f32.mrb[40].mxu0 }
 0x906   :  { %v3957_v15 = vadd.f32 %v4622_v31, %v3941_v57  ;;  %v3823_v2 = vpop.f32.mrb[41].mxu0 }
 0x907   :  { %v3955_v19 = vadd.f32 %v3941_v57, %v3823_v2  ;;  %v4623_v45 = vpop.f32.mrb[42].mxu0 }
 0x908   :  { %v3958_v21 = vadd.f32 %v4623_v45, %v3944_v62  ;;  %v3826_v51 = vpop.f32.mrb[43].mxu0 }
 0x909   :  { %v3956_v55 = vadd.f32 %v3944_v62, %v3826_v51  ;;  %v3975_v12 = vsub.f32 %v3957_v15, %v3955_v19 }
 0x90b   :  { %v3991_v37 = vmul.f32 %v3975_v12, %v3975_v12  ;;  %v3976_v24 = vsub.f32 %v3958_v21, %v3956_v55 }
 0x90d   :  { %v4007_v44 = vsel %vm727_vm5, %v3991_v37, 0.0  ;;  %v3992_v20 = vmul.f32 %v3976_v24, %v3976_v24 }
 0x90e   :  { %4008 = vadd.xlane.f32.xlu0 %v4007_v44 }
 0x90f   :  { %v4010_v52 = vsel %vm727_vm5, %v3992_v20, 0.0 }
 0x910   :  { %4011 = vadd.xlane.f32.xlu1 %v4010_v52 }
 0x915   :  { %v4626_v32 = vpop.f32.mrb[44].mxu0 }
 0x916   :  { %v3961_v54 = vadd.f32 %v4626_v32, %v3941_v57  ;;  %v3839_v59 = vpop.f32.mrb[45].mxu0 }
 0x917   :  { %v3959_v50 = vadd.f32 %v3941_v57, %v3839_v59  ;;  %v4627_v0 = vpop.f32.mrb[46].mxu0 }
 0x918   :  { %v3979_v13 = vsub.f32 %v3961_v54, %v3955_v19  ;;  %v3962_v1 = vadd.f32 %v4627_v0, %v3944_v62  ;;  %v3842_v39 = vpop.f32.mrb[47].mxu0 }
 0x919   :  { %v3977_v33 = vsub.f32 %v3959_v50, %v3955_v19  ;;  %v3960_v60 = vadd.f32 %v3944_v62, %v3842_v39  ;;  %v161_v39 = vrot.slane %v4904_v29, 4 }
 0x91a   :  { %v3980_v34 = vsub.f32 %v3962_v1, %v3956_v55  ;;  %v3995_v14 = vmul.f32 %v3979_v13, %v3979_v13 }
 0x91b   :  { %v3978_v38 = vsub.f32 %v3960_v60, %v3956_v55  ;;  %v3993_v42 = vmul.f32 %v3977_v33, %v3977_v33 }
 0x91c   :  { %v4019_v41 = vsel %vm727_vm5, %v3995_v14, 0.0  ;;  %v3996_v36 = vmul.f32 %v3980_v34, %v3980_v34 }
 0x91d   :  { %4020 = vadd.xlane.f32.xlu0 %v4019_v41  ;;  %v3994_v6 = vmul.f32 %v3978_v38, %v3978_v38  ;;  %v4013_v35 = vsel %vm727_vm5, %v3993_v42, 0.0 }
 0x91e   :  { %v4630_v22 = vpop.f32.mrb[48].mxu0  ;;  %v4022_v5 = vsel %vm727_vm5, %v3996_v36, 0.0 }
 0x91f   :  { %v3965_v25 = vadd.f32 %v4630_v22, %v3949_v49  ;;  %v3855_v61 = vpop.f32.mrb[49].mxu0  ;;  %4023 = vadd.xlane.f32.xlu1 %v4022_v5  ;;  %v4016_v63 = vsel %vm727_vm5, %v3994_v6, 0.0  ;;  %v162_v22 = vadd.f32 %v161_v39, %v4904_v29 }
 0x920   :  { %v3963_v9 = vadd.f32 %v3941_v57, %v3855_v61  ;;  %v4631_v28 = vpop.f32.mrb[50].mxu0 }
 0x921   :  { %v3966_v7 = vadd.f32 %v4631_v28, %v3952_v40  ;;  %v3858_v18 = vpop.f32.mrb[51].mxu0  ;;  %4014 = vadd.xlane.f32.xlu0 %v4013_v35  ;;  %v4076_v35 = vpop.permute.xlu0 %4075 }
 0x922   :  { %v3981_v3 = vsub.f32 %v3963_v9, %v3955_v19  ;;  %v3964_v4 = vadd.f32 %v3944_v62, %v3858_v18 }
 0x923   :  { %4017 = vadd.xlane.f32.xlu1 %v4016_v63 }
 0x924   :  { %v3982_v30 = vsub.f32 %v3964_v4, %v3956_v55  ;;  %v3997_v46 = vmul.f32 %v3981_v3, %v3981_v3 }
 0x926   :  { %v4634_v27 = vpop.f32.mrb[52].mxu0  ;;  %v4025_v17 = vsel %vm727_vm5, %v3997_v46, 0.0  ;;  %v3998_v43 = vmul.f32 %v3982_v30, %v3982_v30 }
 0x927   :  { %v3969_v26 = vadd.f32 %v4634_v27, %v3949_v49  ;;  %v3871_v8 = vpop.f32.mrb[53].mxu0  ;;  %4026 = vadd.xlane.f32.xlu0 %v4025_v17 }
 0x928   :  { %v3967_v47 = vadd.f32 %v3949_v49, %v3871_v8  ;;  %v4635_v16 = vpop.f32.mrb[54].mxu0  ;;  %v4028_v53 = vsel %vm727_vm5, %v3998_v43, 0.0 }
 0x929   :  { %v3985_v56 = vsub.f32 %v3969_v26, %v3965_v25  ;;  %v3970_v57 = vadd.f32 %v4635_v16, %v3952_v40  ;;  %v3874_v31 = vpop.f32.mrb[55].mxu0  ;;  %4029 = vadd.xlane.f32.xlu1 %v4028_v53 }
 0x92a   :  { %v3983_v62 = vsub.f32 %v3967_v47, %v3965_v25  ;;  %v3968_v15 = vadd.f32 %v3952_v40, %v3874_v31 }
 0x92b   :  { %v3986_v2 = vsub.f32 %v3970_v57, %v3966_v7  ;;  %v4001_v19 = vmul.f32 %v3985_v56, %v3985_v56 }
 0x92c   :  { %v3984_v45 = vsub.f32 %v3968_v15, %v3966_v7  ;;  %v3999_v55 = vmul.f32 %v3983_v62, %v3983_v62 }
 0x92d   :  { %v4037_v21 = vsel %vm727_vm5, %v4001_v19, 0.0  ;;  %v4002_v51 = vmul.f32 %v3986_v2, %v3986_v2 }
 0x92e   :  { %v4638_v12 = vpop.f32.mrb[56].mxu0  ;;  %4038 = vadd.xlane.f32.xlu0 %v4037_v21  ;;  %v4000_v20 = vmul.f32 %v3984_v45, %v3984_v45  ;;  %v4031_v0 = vsel %vm727_vm5, %v3999_v55, 0.0 }
 0x92f   :  { %v3973_v37 = vadd.f32 %v4638_v12, %v3949_v49  ;;  %v3887_v24 = vpop.f32.mrb[57].mxu0  ;;  %v4040_v44 = vsel %vm727_vm5, %v4002_v51, 0.0 }
 0x930   :  { %v3971_v52 = vadd.f32 %v3949_v49, %v3887_v24  ;;  %v4639_v32 = vpop.f32.mrb[58].mxu0  ;;  %4041 = vadd.xlane.f32.xlu1 %v4040_v44  ;;  %v4034_v60 = vsel %vm727_vm5, %v4000_v20, 0.0 }
 0x931   :  { %v3989_v54 = vsub.f32 %v3973_v37, %v3965_v25  ;;  %v3974_v59 = vadd.f32 %v4639_v32, %v3952_v40  ;;  %v3890_v50 = vpop.f32.mrb[59].mxu0 }
 0x932   :  { %v3987_v13 = vsub.f32 %v3971_v52, %v3965_v25  ;;  %v3972_v1 = vadd.f32 %v3952_v40, %v3890_v50  ;;  %4032 = vadd.xlane.f32.xlu0 %v4031_v0  ;;  %v163_v40 = vrot.slane %v162_v22, 2 }
 0x933   :  { %v3990_v33 = vsub.f32 %v3974_v59, %v3966_v7  ;;  %v4005_v34 = vmul.f32 %v3989_v54, %v3989_v54 }
 0x934   :  { %v3988_v14 = vsub.f32 %v3972_v1, %v3966_v7  ;;  %4035 = vadd.xlane.f32.xlu1 %v4034_v60  ;;  %v4003_v36 = vmul.f32 %v3987_v13, %v3987_v13  ;;  %v164_v25 = vadd.f32 %v163_v40, %v162_v22  ;;  %v4080_v7 = vpop.permute.xlu1 %4079 }
 0x935   :  { %v4049_v38 = vsel %vm727_vm5, %v4005_v34, 0.0  ;;  %v4006_v41 = vmul.f32 %v3990_v33, %v3990_v33 }
 0x936   :  { %4050 = vadd.xlane.f32.xlu0 %v4049_v38  ;;  %v4004_v49 = vmul.f32 %v3988_v14, %v3988_v14  ;;  %v4043_v5 = vsel %vm727_vm5, %v4003_v36, 0.0  ;;  %v165_v61 = vrot.slane %v164_v25, 1 }
 0x937   :  { %v4052_v42 = vsel %vm727_vm5, %v4006_v41, 0.0 }
 0x938   :  { %4053 = vadd.xlane.f32.xlu1 %v4052_v42  ;;  %v4046_v6 = vsel %vm727_vm5, %v4004_v49, 0.0  ;;  %v166_v9 = vadd.f32 %v165_v61, %v164_v25  ;;  %vm4254_vm5 = vcmask 125952  }
 0x93a   :  { %4044 = vadd.xlane.f32.xlu0 %v4043_v5  ;;  %v168_v28 = vsub.f32 1.0, %v166_v9  ;;  %v781_v5 = vrot.slane %v5116_v11, %v4889_v23  ;;  %v859_v11 = vmul.f32 %v5188_v10, %v5188_v10 }
 0x93c   :  { %4047 = vadd.xlane.f32.xlu1 %v4046_v6  ;;  %v789_v6 = vcombine.high %v781_v5, %v781_v5  ;;  %v797_v25 = vrot.slane %v781_v5, %v4889_v23 }
 0x93e   :  { %v811_v40 = vrot.slane %v789_v6, %v4889_v23  ;;  %v819_v9 = vcombine.high %v797_v25, %v797_v25 }
 0x940   :  { %v821_v61 = vcombine.high %v811_v40, %v811_v40 }
 0x94d   :  { %4082 = vbcast.lane.b32.xlu1 %v168_v28, 256 }
 0x950   :  { %4086 = vbcast.lane.b32.xlu0 %v168_v28, 264  ;;  %v858_v28 = vmul.f32 %v821_v61, %v821_v61 }
 0x99b   :  { %v4009_v18 = vpop.xlane.xlu0 %4008 }
 0x99c   :  { %v4056_v3 = vmul.f32 0.020833334, %v4009_v18  ;;  %v855_v18 = vmul.f32 %v797_v25, %v797_v25 }
 0x99d   :  { %v4012_v4 = vpop.xlane.xlu1 %4011 }
 0x99e   :  { %v4092_v29 = vmul.f32 %v4076_v35, %v4056_v3  ;;  %v4057_v63 = vmul.f32 0.020833334, %v4012_v4  ;;  %v868_v3 = vmul.f32 %v858_v28, %v821_v61 }
 0x9a0   :  { %v4093_v30 = vmul.f32 %v4080_v7, %v4057_v63  ;;  %4125 = vperm.xlu1 %4656, %v4092_v29   ;;  %v865_v63 = vmul.f32 %v855_v18, %v797_v25  ;;  %v6003_v18 = vld [vmem:[#allocation13_spill] sm:$0xff] }
 0x9a2   :  { %4128 = vperm.xlu0 %4657, %v4093_v30   ;;  %v878_v30 = vmul.f32 0.044715, %v868_v3 }
 0x9aa   :  { %v4021_v46 = vpop.xlane.xlu0 %4020 }
 0x9ab   :  { %v4060_v27 = vmul.f32 0.020833334, %v4021_v46 }
 0x9ac   :  { %v4024_v17 = vpop.xlane.xlu1 %4023 }
 0x9ad   :  { %v4096_v43 = vmul.f32 %v4076_v35, %v4060_v27  ;;  %v4061_v47 = vmul.f32 0.020833334, %v4024_v17  ;;  %v875_v17 = vmul.f32 0.044715, %v865_v63 }
 0x9ae   :  { %v4015_v26 = vpop.xlane.xlu0 %4014 }
 0x9af   :  { %v4058_v8 = vmul.f32 0.020833334, %v4015_v26  ;;  %4137 = vperm.xlu0 %4657, %v4096_v43   ;;  %v4097_v57 = vmul.f32 %v4080_v7, %v4061_v47  ;;  %v888_v43 = vadd.f32 %v878_v30, %v821_v61 }
 0x9b0   :  { %v4018_v53 = vpop.xlane.xlu1 %4017 }
 0x9b1   :  { %v4094_v16 = vmul.f32 %v4076_v35, %v4058_v8  ;;  %v4059_v31 = vmul.f32 0.020833334, %v4018_v53  ;;  %v869_v8 = vmul.f32 %v859_v11, %v5188_v10  ;;  %v898_v53 = vmul.f32 0.7978846, %v888_v43 }
 0x9b3   :  { %4131 = vperm.xlu1 %4656, %v4094_v16   ;;  %v4095_v19 = vmul.f32 %v4080_v7, %v4059_v31  ;;  %v885_v16 = vadd.f32 %v875_v17, %v797_v25  ;;  %4768 = vtanh.f32 %v898_v53 }
 0x9b4   :  { %v4027_v56 = vpop.xlane.xlu0 %4026 }
 0x9b5   :  { %v4062_v62 = vmul.f32 0.020833334, %v4027_v56 }
 0x9b6   :  { %v4030_v15 = vpop.xlane.xlu1 %4029 }
 0x9b7   :  { %v4098_v2 = vmul.f32 %v4076_v35, %v4062_v62  ;;  %4140 = vperm.xlu1 %4656, %v4097_v57   ;;  %v4063_v45 = vmul.f32 0.020833334, %v4030_v15  ;;  %v856_v35 = vmul.f32 %v811_v40, %v811_v40  ;;  %v879_v57 = vmul.f32 0.044715, %v869_v8 }
 0x9b8   :  { %v895_v62 = vmul.f32 0.7978846, %v885_v16 }
 0x9b9   :  { %4143 = vperm.xlu0 %4657, %v4098_v2   ;;  %v4099_v51 = vmul.f32 %v4080_v7, %v4063_v45  ;;  %v857_v7 = vmul.f32 %v819_v9, %v819_v9  ;;  %v866_v4 = vmul.f32 %v856_v35, %v811_v40  ;;  %v889_v15 = vadd.f32 %v879_v57, %v5188_v10 }
 0x9bb   :  { %4134 = vperm.xlu1 %4656, %v4095_v19   ;;  %v4039_v21 = vpop.xlane.xlu0 %4038  ;;  %v867_v29 = vmul.f32 %v857_v7, %v819_v9  ;;  %v876_v46 = vmul.f32 0.044715, %v866_v4  ;;  %v899_v2 = vmul.f32 0.7978846, %v889_v15 }
 0x9bc   :  { %v4066_v59 = vmul.f32 0.020833334, %v4039_v21 }
 0x9bd   :  { %v4042_v55 = vpop.xlane.xlu1 %4041  ;;  %v877_v27 = vmul.f32 0.044715, %v867_v29  ;;  %v886_v26 = vadd.f32 %v876_v46, %v811_v40  ;;  %v4769_v19 = vpop.eup %4768 }
 0x9be   :  { %v4067_v32 = vmul.f32 0.020833334, %v4042_v55 }
 0x9bf   :  { %4146 = vperm.xlu1 %4656, %v4099_v51   ;;  %v4033_v12 = vpop.xlane.xlu0 %4032  ;;  %v887_v47 = vadd.f32 %v877_v27, %v819_v9  ;;  %v896_v56 = vmul.f32 0.7978846, %v886_v26  ;;  %v918_v51 = vadd.f32 1.0, %v4769_v19 }
 0x9c0   :  { %v4064_v39 = vmul.f32 0.020833334, %v4033_v12 }
 0x9c1   :  { %v4036_v37 = vpop.xlane.xlu1 %4035  ;;  %v897_v31 = vmul.f32 0.7978846, %v887_v47  ;;  %4770 = vtanh.f32 %v896_v56 }
 0x9c2   :  { %v4065_v13 = vmul.f32 0.020833334, %v4036_v37 }
 0x9c3   :  { %v4051_v24 = vpop.xlane.xlu0 %4050  ;;  %4772 = vtanh.f32 %v897_v31 }
 0x9c4   :  { %v4070_v42 = vmul.f32 0.020833334, %v4051_v24  ;;  %4774 = vtanh.f32 %v895_v62 }
 0x9c5   :  { %v4054_v44 = vpop.xlane.xlu1 %4053  ;;  %4776 = vtanh.f32 %v899_v2 }
 0x9c6   :  { %v4071_v41 = vmul.f32 0.020833334, %v4054_v44  ;;  %v928_v44 = vmul.f32 0.5, %v918_v51 }
 0x9c7   :  { %v4045_v20 = vpop.xlane.xlu0 %4044 }
 0x9c8   :  { %v4068_v14 = vmul.f32 0.020833334, %v4045_v20 }
 0x9c9   :  { %v4048_v52 = vpop.xlane.xlu1 %4047 }
 0x9ca   :  { %v4069_v33 = vmul.f32 0.020833334, %v4048_v52 }
 0x9cb   :  { %v4087_v54 = vpop.permute.xlu0 %4086  ;;  %v4771_v45 = vpop.eup %4770 }
 0x9cc   :  { %v4103_v50 = vmul.f32 %v4087_v54, %v4067_v32  ;;  %v4101_v60 = vmul.f32 %v4087_v54, %v4065_v13  ;;  %v4105_v38 = vmul.f32 %v4087_v54, %v4069_v33  ;;  %v4107_v49 = vmul.f32 %v4087_v54, %v4071_v41 }
 0x9cd   :  { %v4083_v0 = vpop.permute.xlu1 %4082  ;;  %v4773_v21 = vpop.eup %4772  ;;  %v916_v12 = vadd.f32 1.0, %v4771_v45  ;;  %v6004_v45 = vld [vmem:[#allocation11_spill] sm:$0xff] }
 0x9ce   :  { %4158 = vperm.xlu1 %4656, %v4103_v50   ;;  %v4102_v1 = vmul.f32 %v4083_v0, %v4066_v59  ;;  %v4100_v34 = vmul.f32 %v4083_v0, %v4064_v39  ;;  %v4104_v36 = vmul.f32 %v4083_v0, %v4068_v14  ;;  %v4106_v22 = vmul.f32 %v4083_v0, %v4070_v42  ;;  %v4775_v55 = vpop.eup %4774  ;;  %v5999_v14 = vld [vmem:[#allocation10_spill] sm:$0xff] }
 0x9cf   :  { %v917_v37 = vadd.f32 1.0, %v4773_v21  ;;  %v915_v24 = vadd.f32 1.0, %v4775_v55  ;;  %v926_v20 = vmul.f32 0.5, %v916_v12  ;;  %v4777_v32 = vpop.eup %4776  ;;  %v938_v59 = vmul.f32 %v928_v44, %v821_v61  ;;  %v6005_v21 = vld [vmem:[#allocation12_spill] sm:$0xff] }
 0x9d0   :  { %4155 = vperm.xlu0 %4657, %v4102_v1   ;;  %v919_v50 = vadd.f32 1.0, %v4777_v32  ;;  %v6006_v51 = vcombine.low %v6004_v45, %v6005_v21 }
 0x9d1   :  { %v927_v52 = vmul.f32 0.5, %v917_v37  ;;  %v925_v54 = vmul.f32 0.5, %v915_v24  ;;  %v936_v0 = vmul.f32 %v926_v20, %v811_v40  ;;  %v997_v33 = vmul.f32 %v5271_v58, %v938_v59  ;;  %v6002_v58 = vld [vmem:[#allocation9_spill] sm:$0xff] }
 0x9d2   :  { %4152 = vperm.xlu1 %4656, %v4101_v60   ;;  %v929_v60 = vmul.f32 0.5, %v919_v50  ;;  %v1098_v55 = vsel %vm1094_vm10, %v6006_v51, 0.0 }
 0x9d3   :  { %v937_v13 = vmul.f32 %v927_v52, %v819_v9  ;;  %v935_v39 = vmul.f32 %v925_v54, %v797_v25  ;;  %v6001_v25 = vld [vmem:[#allocation14_spill] sm:$0xff] }
 0x9d4   :  { %4149 = vperm.xlu0 %4657, %v4100_v34   ;;  %v995_v34 = vmul.f32 %v5258_v48, %v936_v0  ;;  %v939_v5 = vmul.f32 %v929_v60, %v5188_v10 }
 0x9d6   :  { %4164 = vperm.xlu1 %4656, %v4105_v38   ;;  %v996_v38 = vmul.f32 %v5999_v14, %v937_v13  ;;  %v998_v35 = vmul.f32 %v6002_v58, %v939_v5 }
 0x9d8   :  { %4161 = vperm.xlu0 %4657, %v4104_v36   ;;  %v6000_v36 = vld [vmem:[#allocation8_spill] sm:$0xff]  ;;  %v1036_v27 = vrot.slane %v998_v35, %v4889_v23 }
 0x9d9   :  { %v994_v42 = vmul.f32 %v6000_v36, %v935_v39 }
 0x9da   :  { %4170 = vperm.xlu1 %4656, %v4107_v49   ;;  %v1015_v49 = vcombine.low %v996_v38, %v997_v33  ;;  %v1051_v31 = vrot.slane %v1036_v27, %v4889_v23 }
 0x9db   :  { %v1014_v6 = vcombine.low %v994_v42, %v995_v34 }
 0x9dc   :  { %4167 = vperm.xlu0 %4657, %v4106_v22   ;;  %v1029_v40 = vrot.slane %v1015_v49, %v4889_v23 }
 0x9dd   :  { %v1022_v48 = vrot.slane %v1014_v6, %v4889_v23  ;;  %v1101_v6 = vstv %s5974_s4  ;;  %s4808_s4 = smov [#allocation3]  }
 0x9de   :  { %s4315_s19 = sshll.u32 %s4808_s4, 4  ;;  %s4316_s19 = int_to_ptr.vmem [resolvable:$true] %s4315_s19 }
 0x9df   :  { %v1037_v63 = vcombine.low %v1022_v48, %v1029_v40  ;;  %s4779_s22 = scalar_lea.vmem %s4316_s19, 16  ;;  %s4783_s23 = scalar_lea.vmem %s4316_s19, 32 }
 0x9e0   :  { %p4780_p0 = scmp.ne.s32.totalorder %s4316_s19, %s4779_s22  ;;  %p4784_p1 = scmp.lt.s32.totalorder %s4316_s19, %s4316_s19 }
 0x9e1   :  { %v1044_v16 = vrot.slane %v1037_v63, %v4889_v23  ;;  %p4785_p2 = scmp.lt.s32.totalorder %s4783_s23, %s4779_s22 }
 0x9e3   :  { %v1052_v2 = vcombine.low %v1044_v16, %v1051_v31  ;;  %p4786_p3 = por %p4785_p2, %p4784_p1 }
 0x9e5   :  { %v1095_v19 = vsel %vm1094_vm10, %v1052_v2, 0.0  ;;  %p4787_p4 = pnand %p4786_p3, %p4780_p0 }
 0xa1f   :  { %v4126_v1 = vpop.permute.xlu1 %4125 }
 0xa20   :  { %v4175_v3 = vrot.slane %v4126_v1, %v6003_v18 }
 0xa21   :  { %v4129_v22 = vpop.permute.xlu0 %4128 }
 0xa22   :  { %v4179_v28 = vrot.slane %v4129_v22, %v6001_v25 }
 0xa24   :  { %v4180_v46 = vsel %vm2110_vm1, %v4179_v28, %v4175_v3 }
 0xa2e   :  { %v4138_v9 = vpop.permute.xlu0 %4137 }
 0xa2f   :  { %v4193_v17 = vrot.slane %v4138_v9, %v6003_v18 }
 0xa32   :  { %v4132_v41 = vpop.permute.xlu1 %4131 }
 0xa33   :  { %v4184_v4 = vrot.slane %v4132_v41, %v6003_v18 }
 0xa36   :  { %v4141_v61 = vpop.permute.xlu1 %4140 }
 0xa37   :  { %v4197_v10 = vrot.slane %v4141_v61, %v6001_v25 }
 0xa38   :  { %v4144_v30 = vpop.permute.xlu0 %4143 }
 0xa39   :  { %v4202_v8 = vrot.slane %v4144_v30, %v6003_v18  ;;  %v4198_v53 = vsel %vm2110_vm1, %v4197_v10, %v4193_v17  ;;  %v6008_v10 = vld [vmem:[#allocation6_spill] sm:$0xff] }
 0xa3a   :  { %v4135_v7 = vpop.permute.xlu1 %4134 }
 0xa3b   :  { %v4188_v29 = vrot.slane %v4135_v7, %v6001_v25 }
 0xa3d   :  { %v4189_v11 = vsel %vm2110_vm1, %v4188_v29, %v4184_v4  ;;  %v6007_v29 = vld [vmem:[#allocation7_spill] sm:$0xff] }
 0xa3e   :  { %v4147_v43 = vpop.permute.xlu1 %4146  ;;  %v4244_v26 = vsel %vm2133_vm3, %v4189_v11, %v4180_v46  ;;  %v4281_v63 = vadd.s32 1, %v6007_v29 }
 0xa3f   :  { %v4206_v47 = vrot.slane %v4147_v43, %v6001_v25  ;;  %v4246_v57 = vsel %vm4245_vm0, %v4198_v53, %v4244_v26 }
 0xa40   :  { %v4284_v30 = vsub.s32 %v4281_v63, %v6008_v10 }
 0xa41   :  { %v4207_v56 = vsel %vm2110_vm1, %v4206_v47, %v4202_v8 }
 0xa42   :  { %v4248_v62 = vsel %vm4247_vm4, %v4207_v56, %v4246_v57 }
 0xa43   :  { %v4255_v15 = vsel %vm4254_vm5, %v4248_v62, 0.0 }
 0xa44   :  { %4256 = vadd.xlane.f32.xlu0 %v4255_v15 }
 0xa48   :  { %1096 = vadd.xlane.f32.xlu0 %v1095_v19 }
 0xa4c   :  { %1099 = vadd.xlane.f32.xlu0 %v1098_v55 }
 0xa4d   :  { %v4159_v12 = vpop.permute.xlu1 %4158 }
 0xa4e   :  { %v4224_v13 = vrot.slane %v4159_v12, %v6001_v25 }
 0xa4f   :  { %v4156_v37 = vpop.permute.xlu0 %4155 }
 0xa50   :  { %v4220_v32 = vrot.slane %v4156_v37, %v6003_v18 }
 0xa51   :  { %v4153_v24 = vpop.permute.xlu1 %4152 }
 0xa52   :  { %v4215_v54 = vrot.slane %v4153_v24, %v6001_v25  ;;  %v4225_v60 = vsel %vm2110_vm1, %v4224_v13, %v4220_v32 }
 0xa53   :  { %v4150_v44 = vpop.permute.xlu0 %4149 }
 0xa54   :  { %v4211_v23 = vrot.slane %v4150_v44, %v6003_v18 }
 0xa55   :  { %v4165_v20 = vpop.permute.xlu1 %4164 }
 0xa56   :  { %v4233_v50 = vrot.slane %v4165_v20, %v6001_v25  ;;  %v4216_v1 = vsel %vm2110_vm1, %v4215_v54, %v4211_v23 }
 0xa57   :  { %v4162_v52 = vpop.permute.xlu0 %4161  ;;  %v4249_v38 = vsel %vm2133_vm3, %v4225_v60, %v4216_v1 }
 0xa58   :  { %v4229_v59 = vrot.slane %v4162_v52, %v6003_v18 }
 0xa59   :  { %v4171_v0 = vpop.permute.xlu1 %4170 }
 0xa5a   :  { %v4234_v39 = vsel %vm2110_vm1, %v4233_v50, %v4229_v59  ;;  %v4242_v34 = vrot.slane %v4171_v0, %v6001_v25 }
 0xa5b   :  { %v4168_v33 = vpop.permute.xlu0 %4167  ;;  %v4250_v36 = vsel %vm4245_vm0, %v4234_v39, %v4249_v38 }
 0xa5c   :  { %v4238_v14 = vrot.slane %v4168_v33, %v6003_v18 }
 0xa5e   :  { %v4243_v41 = vsel %vm2110_vm1, %v4242_v34, %v4238_v14 }
 0xa5f   :  { %v4251_v42 = vsel %vm4247_vm4, %v4243_v41, %v4250_v36 }
 0xa60   :  { %v4258_v49 = vsel %vm4254_vm5, %v4251_v42, 0.0 }
 0xa61   :  { %4259 = vadd.xlane.f32.xlu1 %v4258_v49 }
 0xad1   :  { %v4257_v22 = vpop.xlane.xlu0 %4256 }
 0xad2   :  { %v4261_v5 = vmul.f32 0.083333336, %v4257_v22 }
 0xad4   :  { %v4265_v40 = vrot.slane %v4261_v5, 7 }
 0xad5   :  { %v1097_v61 = vpop.xlane.xlu0 %1096 }
 0xad6   :  { %v1102_v9 = vadd.f32 %v1101_v6, %v1097_v61 }
 0xad8   :  { %v4269_v25 = vsub.f32 %v1102_v9, %v4265_v40 }
 0xad9   :  { %v1100_v58 = vpop.xlane.xlu0 %1099 }
 0xada   :  { %v4271_v28 = vmul.f32 %v4269_v25, %v4269_v25  ;;  %v1103_v7 = vadd.f32 %v1101_v6, %v1100_v58 }
 0xadc   :  { %4276 = vperm.xlu1 %4656, %v4271_v28  }
 0xaee   :  { %v4260_v35 = vpop.xlane.xlu1 %4259 }
 0xaef   :  { %v4262_v48 = vmul.f32 0.083333336, %v4260_v35 }
 0xaf1   :  { %v4266_v18 = vrot.slane %v4262_v48, 7 }
 0xaf3   :  { %v4270_v3 = vsub.f32 %v1103_v7, %v4266_v18 }
 0xaf5   :  { %v4272_v4 = vmul.f32 %v4270_v3, %v4270_v3 }
 0xaf7   :  { %4279 = vperm.xlu0 %4657, %v4272_v4  }
 0xb5b   :  { %v4277_v46 = vpop.permute.xlu1 %4276 }
 0xb5c   :  { %v4285_v27 = vrot.slane %v4277_v46, %v4284_v30 }
 0xb76   :  { %v4280_v11 = vpop.permute.xlu0 %4279 }
 0xb77   :  { %v4289_v17 = vrot.slane %v4280_v11, %v4284_v30 }
 0xb79   :  { %v4290_v43 = vsel %vm2133_vm3, %v4289_v17, %v4285_v27 }
 0xb7a   :  { %v4293_v26 = vsel %vm4292_vm11, %v4290_v43, 0.0 }
 0xb7b   :  { %4294 = vadd.xlane.f32.xlu1 %v4293_v26 }
 0xc08   :  { %v4295_v8 = vpop.xlane.xlu1 %4294 }
 0xc09   :  { %v4296_v47 = vrot.slane %v4295_v8, 4 }
 0xc0b   :  { %v4297_v16 = vadd.f32 %v4296_v47, %v4295_v8 }
 0xc0d   :  { %v4298_v53 = vrot.slane %v4297_v16, 2 }
 0xc0f   :  { %v4299_v56 = vadd.f32 %v4298_v53, %v4297_v16 }
 0xc11   :  { %v4300_v57 = vrot.slane %v4299_v56, 1 }
 0xc13   :  { %v4301_v31 = vadd.f32 %v4300_v57, %v4299_v56 }
 0xc15   :  { %4648 = vpush %v4301_v31 }
 0xc46   :  { %s4649_s20 = spop %4648 }
 0xc47   :  { %s4305_s21 = smul.f32 0.125, %s4649_s20 }
 0xc49   :  { %v4306_v62 = vstv %s4305_s21 }
 0xc4a   :  { %4308 = vst.msk [vmem:[#allocation3] sm:$0x1] %vm4307_vm12, %v4306_v62 }
 0xc4b   :  { %4790 = shalt.err (!%p4787_p4)
}
 0xc4c   :  { %s4791_s0 = scalar_lea.hbm %s5975_s5, 16 }
 0xc4d   :  { %p4792_p5 = scmp.ne.s32.totalorder %s5975_s5, %s4791_s0  ;;  %p4795_p6 = scmp.lt.u32.totalorder %s4791_s0, %s5975_s5 }
 0xc4f   :  { %p4797_p7 = pnand %p4795_p6, %p4792_p5 }
 0xc51   :  { %4800 = shalt.err (!%p4797_p7)
}
 0xc52   :  { %4318 = dma.vmem_to_hbm [thread:$0]  %s4316_s19, 16, %s5975_s5, [#allocation4]  }
 0xc53   :  { %4801 = dma.done.wait [#allocation4], 16  }
 0xc54   :  { %4802 = vsyncadd [#allocation4], 4294967280 }
 0xc55   :  { %4322 = vsyncpa [#allocation4], 1 }

</bundles_post_ra>
